<compile_context>
chip_gen: v5e
topology: v5e:2x2
jax: 0.10.0
libtpu: 0.0.40
codegen_flags: <defaults>
</compile_context>

<pallas_src>
import math
import functools

import jax
import jax.numpy as jnp
from jax.experimental import pallas as pl
from jax.experimental.pallas import tpu as pltpu


# ----------------------------- Pallas kernel ------------------------------ #

def pos_embed_sine2_kernel(col_mul_ref, col_add_ref, out_ref, *, TH):
    th, cols = out_ref.shape                       # (TH, W*D) block
    h0 = pl.program_id(1) * TH                     # row offset within the image
    # y_embed = cumsum of ones along H  ->  (h + 1) for row h (same for every b)
    row = jax.lax.broadcasted_iota(jnp.int32, (th, cols), 0)
    y = (row + (h0 + 1)).astype(jnp.float32)
    # angle[h, w*D+c] = y * (is_y[c] * y_norm / dim_t[c])
    #                 + (x_embed[w] * (1 - is_y[c]) / dim_t[c] + phase[c])
    angle = y * col_mul_ref[...] + col_add_ref[...]
    out_ref[...] = jnp.sin(angle).astype(out_ref.dtype)


# ------------------------------- Wrapper ----------------------------------- #

def _pick_row_tile(H, WD):
    """Largest divisor of H that is a multiple of 8 and keeps one output block
    under ~4 MiB.  Falls back to the full H (block dim == array dim is legal)."""
    if H % 8 != 0:
        return H
    budget_rows = max(8, (4 << 20) // (WD * 4))
    th = 8
    for cand in range(8, H + 1, 8):
        if H % cand == 0 and cand <= budget_rows:
            th = cand
    return th


def position_embedding_sine2(x, *, temperature=10000, normalize=False, scale=None):
    """JAX/Pallas equivalent of PositionEmbeddingSine2.forward.  x: (B, H, W, C)."""
    if scale is not None and normalize is False:
        raise ValueError("normalize should be True if scale is passed")
    if scale is None:
        scale = 2 * math.pi

    B, H, W, C = x.shape
    npf = C // 2                 # num_pos_feats used by the forward
    D = 2 * npf                  # output feature count (== C when C is even)
    WD = W * D
    eps = 1e-5

    # ---- host-side precompute of per-column (w, c) terms (tiny arrays) ----
    half_idx = (jnp.arange(npf) // 2).astype(jnp.float32)
    dim_t = jnp.float32(temperature) ** (2.0 * half_idx / npf)          # (npf,)
    inv_freq = 1.0 / dim_t                                              # (npf,)
    # even j -> sin (phase 0), odd j -> cos == sin(.+pi/2)
    phase = jnp.where((jnp.arange(npf) % 2) == 0, 0.0, math.pi / 2).astype(jnp.float32)

    # channel layout of the output: [y-channels (npf), x-channels (npf)]
    inv_full = jnp.concatenate([inv_freq, inv_freq])                    # (D,)
    phase_full = jnp.concatenate([phase, phase])                        # (D,)
    is_y = jnp.concatenate([jnp.ones(npf, jnp.float32),
                            jnp.zeros(npf, jnp.float32)])               # (D,)

    # x_embed = cumsum of ones along W  ->  (w + 1); normalization folded here
    w_vals = jnp.arange(1, W + 1, dtype=jnp.float32)                    # (W,)
    if normalize:
        w_vals = w_vals / (W + eps) * scale
        y_mult = scale / (H + eps)
    else:
        y_mult = 1.0

    # column q = w*D + c  (row-major flatten of (W, D))
    col_mul = jnp.broadcast_to((is_y * inv_full * y_mult)[None, :],
                               (W, D)).reshape(1, WD)
    col_add = ((1.0 - is_y)[None, :] * w_vals[:, None] * inv_full[None, :]
               + phase_full[None, :]).reshape(1, WD)

    TH = _pick_row_tile(H, WD)
    kernel = functools.partial(pos_embed_sine2_kernel, TH=TH)

    out3d = pl.pallas_call(
        kernel,
        out_shape=jax.ShapeDtypeStruct((B, H, WD), jnp.float32),
        grid_spec=pltpu.PrefetchScalarGridSpec(
            num_scalar_prefetch=0,
            grid=(B, H // TH),
            in_specs=[pl.BlockSpec((1, WD), lambda b, hh: (0, 0)),   # col_mul (stays resident)
                      pl.BlockSpec((1, WD), lambda b, hh: (0, 0))],  # col_add (stays resident)
            out_specs=pl.BlockSpec((None, TH, WD), lambda b, hh: (b, hh, 0)),
        ),
        compiler_params=pltpu.CompilerParams(
            dimension_semantics=("parallel", "parallel")),           # feeds both v7x TCs
    )(col_mul, col_add)

    # (B, H, W*D) -> (B, H, W, D); row-major, so element (b,h,w,c) maps exactly.
    return out3d.reshape(B, H, W, D)


# --------------------------- Pure-JAX reference ----------------------------- #

def reference(x, *, temperature=10000, normalize=False, scale=None):
    if scale is None:
        scale = 2 * math.pi
    B, H, W, C = x.shape
    npf = C // 2
    not_mask = jnp.ones((B, H, W), jnp.float32)          # mask is all-False zeros
    y_embed = jnp.cumsum(not_mask, axis=1)
    x_embed = jnp.cumsum(not_mask, axis=2)
    if normalize:
        eps = 1e-5
        y_embed = y_embed / (y_embed[:, -1:, :] + eps) * scale
        x_embed = x_embed / (x_embed[:, :, -1:] + eps) * scale
    dim_t = jnp.arange(npf, dtype=jnp.float32)
    dim_t = temperature ** (2 * jnp.floor(dim_t / 2) / npf)
    pos_x = x_embed[..., None] / dim_t
    pos_y = y_embed[..., None] / dim_t
    pos_x = jnp.stack([jnp.sin(pos_x[..., 0::2]), jnp.cos(pos_x[..., 1::2])],
                      axis=4).reshape(B, H, W, -1)
    pos_y = jnp.stack([jnp.sin(pos_y[..., 0::2]), jnp.cos(pos_y[..., 1::2])],
                      axis=4).reshape(B, H, W, -1)
    return jnp.concatenate([pos_y, pos_x], axis=3)


# --------------------------------- Main ------------------------------------ #

if __name__ == "__main__":
    B, H, W, C = 2, 16, 16, 64        # x: (B, H, W, C) channels-last
    key = jax.random.PRNGKey(0)
    x = jax.random.normal(key, (B, H, W, C), jnp.float32)

    # default path (normalize=False)
    out = position_embedding_sine2(x)
    out = jax.block_until_ready(out)
    ref = reference(x)
    assert out.shape == (B, H, W, C)
    err = float(jnp.max(jnp.abs(out - ref)))
    assert jnp.allclose(out, ref, atol=1e-5, rtol=1e-5), err

    # normalized path (normalize=True, default scale=2*pi)
    out_n = jax.block_until_ready(position_embedding_sine2(x, normalize=True))
    ref_n = reference(x, normalize=True)
    err_n = float(jnp.max(jnp.abs(out_n - ref_n)))
    assert jnp.allclose(out_n, ref_n, atol=1e-5, rtol=1e-5), err_n

    print("KERNEL_OK")
</pallas_src>

<mosaic_0001>
module attributes {stable_mosaic.version = 11 : i64} {
  func.func @pos_embed_sine2_kernel(%arg0: i32, %arg1: i32, %arg2: memref<1x1024xf32, #tpu.memory_space<vmem>>, %arg3: memref<1x1024xf32, #tpu.memory_space<vmem>>, %arg4: memref<1x16x1024xf32, #tpu.memory_space<vmem>>) attributes {dimension_semantics = [#tpu.dimension_semantics<parallel>, #tpu.dimension_semantics<parallel>], iteration_bounds = array<i64: 2, 1>, scalar_prefetch = 0 : i64, scratch_operands = 0 : i64, tpu.core_type = #tpu.core_type<tc>, window_params = [{pipeline_mode = #tpu.pipeline_mode<synchronous>, transform_indices = @transform_0, window_bounds = array<i64: 1, 1024>}, {pipeline_mode = #tpu.pipeline_mode<synchronous>, transform_indices = @transform_1, window_bounds = array<i64: 1, 1024>}, {transform_indices = @transform_2, window_bounds = array<i64: 1, 16, 1024>}]} {
    %c16_i32 = arith.constant 16 : i32
    %0 = arith.muli %arg1, %c16_i32 : i32
    %1 = tpu.iota {dimensions = array<i32: 0>} : vector<16x1024xi32>
    %c1_i32 = arith.constant 1 : i32
    %2 = arith.addi %0, %c1_i32 : i32
    %3 = vector.broadcast %2 : i32 to vector<16x1024xi32>
    %4 = arith.addi %1, %3 : vector<16x1024xi32>
    %5 = arith.sitofp %4 : vector<16x1024xi32> to vector<16x1024xf32>
    %c0 = arith.constant 0 : index
    %c0_0 = arith.constant 0 : index
    %6 = vector.load %arg2[%c0, %c0_0] : memref<1x1024xf32, #tpu.memory_space<vmem>>, vector<1x1024xf32>
    %7 = vector.broadcast %6 : vector<1x1024xf32> to vector<16x1024xf32>
    %8 = arith.mulf %5, %7 : vector<16x1024xf32>
    %c0_1 = arith.constant 0 : index
    %c0_2 = arith.constant 0 : index
    %9 = vector.load %arg3[%c0_1, %c0_2] : memref<1x1024xf32, #tpu.memory_space<vmem>>, vector<1x1024xf32>
    %10 = vector.broadcast %9 : vector<1x1024xf32> to vector<16x1024xf32>
    %11 = arith.addf %8, %10 : vector<16x1024xf32>
    %12 = math.sin %11 : vector<16x1024xf32>
    %c0_3 = arith.constant 0 : index
    %c0_4 = arith.constant 0 : index
    %c0_5 = arith.constant 0 : index
    %13 = vector.load %arg4[%c0_3, %c0_4, %c0_5] : memref<1x16x1024xf32, #tpu.memory_space<vmem>>, vector<1x16x1024xf32>
    %14 = vector.shape_cast %13 : vector<1x16x1024xf32> to vector<16x1024xf32>
    %15 = vector.shape_cast %12 : vector<16x1024xf32> to vector<1x16x1024xf32>
    tpu.vector_store %arg4[%c0_3, %c0_4, %c0_5], %15 {strides = array<i32>} : memref<1x16x1024xf32, #tpu.memory_space<vmem>>, vector<1x16x1024xf32>,
    return
  }
  func.func @transform_0(%arg0: i32, %arg1: i32) -> (i32, i32) {
    %c0_i32 = arith.constant 0 : i32
    %c0_i32_0 = arith.constant 0 : i32
    %c0_i32_1 = arith.constant 0 : i32
    return %c0_i32, %c0_i32_0 : i32, i32
  }
  func.func @transform_1(%arg0: i32, %arg1: i32) -> (i32, i32) {
    %c0_i32 = arith.constant 0 : i32
    %c0_i32_0 = arith.constant 0 : i32
    %c0_i32_1 = arith.constant 0 : i32
    return %c0_i32, %c0_i32_0 : i32, i32
  }
  func.func @transform_2(%arg0: i32, %arg1: i32) -> (i32, i32, i32) {
    %c0_i32 = arith.constant 0 : i32
    %c0_i32_0 = arith.constant 0 : i32
    return %arg0, %arg1, %c0_i32 : i32, i32, i32
  }
}

</mosaic_0001>

<bundles_post_ra>
// kernel: tpu_custom_call.1
= control target key start
LH: loop header
LB: loop body
LE: loop exit
PB: predicated region body
PF: predicated region fallthrough
CT: control target
= control target key end

     0   :  { %7 = vsyncpa [#allocation3], 0  ;;  %s5098_s0 = inlined_call_operand.hbm [shape: f32[1,1024], index: 0, kind: input, shape index: {}]   ;;  %s5099_s1 = inlined_call_operand.hbm [shape: f32[1,1024], index: 1, kind: input, shape index: {}]   ;;  %s5100_s2 = inlined_call_operand.hbm [shape: f32[2,16,1024], index: 2, kind: output, shape index: {}]  }
   0x1   :  { %8 = vsyncpa [#allocation6], 0 }
   0x2   :  { %9 = vsyncpa [#allocation4], 0 }
   0x3   :  { %11 = vsyncpa [#allocation4 + $0x1], 0  ;;  %s3165_s9 = smov 0   ;;  %s3167_s10 = smov 0  }
   0x4   :  { %s3169_s11 = smov 0   ;;  %s3171_s12 = smov 0  }
   0x5   :  { %s3173_s13 = smov 0   ;;  %s3175_s14 = smov 0  }
   0x6 LB: > { %s2843_s15 = sadd.s32 4294967295, %s3137_s14   ;;  %s2844_s16 = sadd.s32 4294967294, %s3137_s14   ;;  %s3137_s14 = sphi %s3175_s14, %s17_s14   ;;  %s3133_s13 = sphi %s3173_s13, %s5139_s13   ;;  %s3129_s12 = sphi %s3171_s12, %s5138_s12   ;;  %s3125_s11 = sphi %s3169_s11, %s5137_s11   ;;  %s3121_s10 = sphi %s3167_s10, %s5136_s10   ;;  %s3117_s9 = sphi %s3165_s9, %s5135_s9  }
   0x7   : > { %s29_s17 = sadd.s32 1, %s3133_s13  ;;  %s80_s18 = sadd.s32 1, %s3125_s11 }
   0x8   : > { %p31_p0 = scmp.ge.s32.totalorder %s29_s17, 2  ;;  %p90_p1 = scmp.ne.s32.totalorder %s3125_s11, %s3121_s10 }
   0x9   : > { %p91_p2 = scmp.eq.s32.totalorder %s2843_s15, 1  ;;  %p96_p3 = scmp.ne.s32.totalorder %s3121_s10, %s3117_s9 }
   0xa   : > { %s5141_s17 = smov (%p31_p0, %s29_s17), 0  ;;  %p97_p5 = scmp.eq.s32.totalorder %s2844_s16, 1 }
   0xb   : > { %p3205_p4 = por %p91_p2, %p90_p1  ;;  %s75_s20 = ssub.s32 %s3133_s13, %s5141_s17 }
   0xc   : > { %p2845_p6 = scmp.ge.s32.totalorder %s3137_s14, 1  ;;  %p78_p7 = scmp.eq.s32.totalorder %s75_s20, 0 }
   0xd   : > { %p3212_p8 = por %p97_p5, %p96_p3  ;;  %p104_p9 = scmp.lt.s32.totalorder %s3137_s14, 3 }
   0xe   : > { %s3218_s22 = scalar_select %p78_p7, %s3125_s11, %s80_s18  }
   0xf   : > { %p3220_p10 = pnand %p2845_p6, %p104_p9  ;;  %p3224_p11 = scmp.eq.s32.totalorder %s2843_s15, 0 }
  0x10   : > { %s116_s27 = sshll.u32 %s5098_s0, 4  ;;  %s3139_s28 = smov [#allocation2]   ;;  %s117_s27 = int_to_ptr.hbm [resolvable:$true] %s116_s27 }
  0x11   : > { %p2916_p12 = pneg %p3220_p10  ;;  %s118_s29 = sshll.u32 %s3139_s28, 4  ;;  %s119_s29 = int_to_ptr.vmem [resolvable:$true] %s118_s29 }
  0x12   : > { %s128_s4 = sshll.u32 %s5099_s1, 4  ;;  %s3140_s5 = smov [#allocation5]   ;;  %s129_s4 = int_to_ptr.hbm [resolvable:$true] %s128_s4 }
  0x13   : > { %p2917_p13 = pnand %p3224_p11, %p2916_p12  ;;  %s130_s6 = sshll.u32 %s3140_s5, 4  ;;  %s131_s6 = int_to_ptr.vmem [resolvable:$true] %s130_s6 }
  0x14   : > { %143 = sbr.rel (%p3220_p10) target bundleno = 683 (0x2ab), region = 28 }
  0x15   : > { %2919 = dma.hbm_to_vmem [thread:$0]  (!%p2917_p13), %s117_s27, 128, %s119_s29, [#allocation3]  }
  0x16   : > { %2922 = dma.hbm_to_vmem [thread:$0]  (!%p2917_p13), %s129_s4, 128, %s131_s6, [#allocation6]  }
  0x19   : > { %3104 = dma.done.wait (%p3224_p11), [#allocation3], 128  }
  0x1a   : > { %3106 = vsyncadd (%p3224_p11), [#allocation3], 4294967168 }
  0x1b   : > { %3108 = dma.done.wait (%p3224_p11), [#allocation6], 128  }
  0x1c   : > { %3110 = vsyncadd (%p3224_p11), [#allocation6], 4294967168  ;;  %v168_v0 = vlaneseq  ;;  %v177_v6 = vld [vmem:[#allocation2] sm:$0xff]  ;;  %v211_v23 = vld [vmem:[#allocation5] sm:$0xff]  ;;  %s163_s7 = sand.u32 1, %s3121_s10   ;;  %s2905_s16 = sshll.u32 %s3129_s12, 7 }
  0x1d   : > { %v179_v8 = vperm.slane %v177_v6, 0  ;;  %v180_v9 = vperm.slane %v177_v6, 1  ;;  %v181_v10 = vperm.slane %v177_v6, 2  ;;  %v182_v11 = vperm.slane %v177_v6, 3  ;;  %s2851_s8 = sshll.u32 %s163_s7, 7  ;;  %s2756_s23 = scalar_lea.hbm %s5100_s2, %s2905_s16 }
  0x1e   : > { %v169_v1 = vshrl.u32 %v168_v0, 7  ;;  %v183_v12 = vperm.slane %v177_v6, 4  ;;  %v184_v13 = vperm.slane %v177_v6, 5  ;;  %v185_v14 = vperm.slane %v177_v6, 6  ;;  %s3579_s15 = scalar_lea.vmem [#allocation7], %s2851_s8  ;;  %s2759_s25 = sshll.u32 %s2756_s23, 4  ;;  %s2760_s25 = int_to_ptr.hbm [resolvable:$true] %s2759_s25 }
  0x1f   : > { %v186_v15 = vperm.slane %v177_v6, 7  ;;  %v213_v33 = vperm.slane %v211_v23, 0  ;;  %v214_v34 = vperm.slane %v211_v23, 1  ;;  %v215_v35 = vperm.slane %v211_v23, 2  ;;  %s2757_s24 = sshll.u32 %s3579_s15, 4  ;;  %s2742_s12 = scalar_lea.sflag [#allocation4], %s163_s7  ;;  %s2758_s24 = int_to_ptr.vmem [resolvable:$true] %s2757_s24 }
  0x20   : > { %v170_v2 = vadd.s32 8, %v169_v1  ;;  %v173_v3 = vadd.s32 1, %v169_v1  ;;  %v216_v36 = vperm.slane %v211_v23, 3  ;;  %v217_v37 = vperm.slane %v211_v23, 4  ;;  %s3065_s26 = sshra.s32 %s2760_s25, 4  ;;  %s3071_s30 = scalar_lea.hbm %s5100_s2, 256  ;;  %s3066_s26 = int_to_ptr.hbm [resolvable:$true] %s3065_s26 }
  0x21   : > { %v218_v38 = vperm.slane %v211_v23, 5  ;;  %v219_v39 = vperm.slane %v211_v23, 6  ;;  %v220_v40 = vperm.slane %v211_v23, 7  ;;  %s3067_s27 = scalar_lea.hbm %s3066_s26, 128  ;;  %p3072_p3 = scmp.lt.s32.totalorder %s3066_s26, %s5100_s2 }
  0x22   : > { %v174_v4 = vadd.s32 1, %v170_v2  ;;  %v175_v5 = vcvt.s32.f32 %v173_v3  ;;  %p3068_p0 = scmp.ne.s32.totalorder %s3066_s26, %s3067_s27  ;;  %p3073_p5 = scmp.lt.s32.totalorder %s3071_s30, %s3067_s27 }
  0x24   : > { %v176_v7 = vcvt.s32.f32 %v174_v4  ;;  %v195_v16 = vmul.f32 %v179_v8, %v175_v5  ;;  %v196_v17 = vmul.f32 %v180_v9, %v175_v5  ;;  %v197_v18 = vmul.f32 %v181_v10, %v175_v5  ;;  %p3069_p1 = pnand %p3068_p0, %p3205_p4  ;;  %p3074_p6 = por %p3073_p5, %p3072_p3 }
  0x25   : > { %v198_v19 = vmul.f32 %v182_v11, %v175_v5  ;;  %v199_v20 = vmul.f32 %v183_v12, %v175_v5  ;;  %v200_v21 = vmul.f32 %v184_v13, %v175_v5  ;;  %v201_v22 = vmul.f32 %v185_v14, %v175_v5 }
  0x26   : > { %v202_v24 = vmul.f32 %v186_v15, %v175_v5  ;;  %v203_v25 = vmul.f32 %v179_v8, %v176_v7  ;;  %v204_v26 = vmul.f32 %v180_v9, %v176_v7  ;;  %v205_v27 = vmul.f32 %v181_v10, %v176_v7  ;;  %p3070_p2 = pneg %p3069_p1 }
  0x27   : > { %v206_v28 = vmul.f32 %v182_v11, %v176_v7  ;;  %v207_v29 = vmul.f32 %v183_v12, %v176_v7  ;;  %v208_v30 = vmul.f32 %v184_v13, %v176_v7  ;;  %v209_v31 = vmul.f32 %v185_v14, %v176_v7 }
  0x28   : > { %v210_v32 = vmul.f32 %v186_v15, %v176_v7  ;;  %v3248_v41 = vadd.f32 %v213_v33, %v195_v16  ;;  %v3250_v42 = vadd.f32 %v214_v34, %v196_v17  ;;  %v3252_v43 = vadd.f32 %v215_v35, %v197_v18  ;;  %p3075_p7 = pnand %p3074_p6, %p3070_p2 }
  0x29   : > { %v3254_v44 = vadd.f32 %v216_v36, %v198_v19  ;;  %v3256_v45 = vadd.f32 %v217_v37, %v199_v20  ;;  %v3258_v46 = vadd.f32 %v218_v38, %v200_v21  ;;  %v3260_v47 = vadd.f32 %v219_v39, %v201_v22 }
  0x2a   : > { %v3262_v48 = vadd.f32 %v220_v40, %v202_v24  ;;  %v3264_v49 = vadd.f32 %v213_v33, %v203_v25  ;;  %v3266_v50 = vadd.f32 %v214_v34, %v204_v26  ;;  %v3268_v51 = vadd.f32 %v215_v35, %v205_v27 }
  0x2b   : > { %v3270_v52 = vadd.f32 %v216_v36, %v206_v28  ;;  %v3272_v53 = vadd.f32 %v217_v37, %v207_v29  ;;  %v3274_v54 = vadd.f32 %v218_v38, %v208_v30  ;;  %v3276_v55 = vadd.f32 %v219_v39, %v209_v31 }
  0x2c   : > { %v3278_v56 = vadd.f32 %v220_v40, %v210_v32  ;;  %v245_v57 = vand.u32 2147483647, %v3248_v41  ;;  %v248_v58 = vand.u32 2139095040, %v3248_v41  ;;  %v400_v59 = vand.u32 2147483647, %v3250_v42 }
  0x2d   : > { %v403_v60 = vand.u32 2139095040, %v3250_v42  ;;  %v558_v61 = vand.u32 2139095040, %v3252_v43  ;;  %v3141_v18 = vmov 683565275   ;;  %v3142_v20 = vmov 2475754826  }
  0x2e   : > { %v249_v62 = vshrl.u32 %v248_v58, 23  ;;  %v252_v63 = vand.u32 8388607, %v245_v57  ;;  %v407_v1 = vand.u32 8388607, %v400_v59 }
  0x2f   : > { %v404_v0 = vshrl.u32 %v403_v60, 23  ;;  %v559_v5 = vshrl.u32 %v558_v61, 23  ;;  %v3143_v22 = vmov 2131351028   ;;  %v3144_v24 = vmov 2102212464  }
  0x30   : > { %v2852_v2 = vadd.s32 4294967169, %v249_v62  ;;  %v253_v3 = vor.u32 8388608, %v252_v63  ;;  %v408_v7 = vor.u32 8388608, %v407_v1  ;;  %v3145_v26 = vmov 920167782  }
  0x31   : > { %v2855_v4 = vadd.s32 4294967169, %v404_v0  ;;  %v2858_v11 = vadd.s32 4294967169, %v559_v5  ;;  %v3146_v35 = vmov 1326507024  }
  0x32   : > { %v255_v6 = vadd.s32 1, %v2852_v2  ;;  %v3289_v10 = vshll.u32 %v253_v3, 8  ;;  %v3295_v16 = vshll.u32 %v408_v7, 8 }
  0x33   : > { %v410_v8 = vadd.s32 1, %v2855_v4  ;;  %v3303_v29 = vadd.s32 1, %v2858_v11 }
  0x34   : > { %vm256_vm0 = vcmp.gt.s32.totalorder %v255_v6, 0  ;;  %v294_v28 = vand.u32 65535, %v3289_v10  ;;  %v295_v33 = vshrl.u32 %v3289_v10, 16 }
  0x35   : > { %v257_v9 = vsel %vm256_vm0, %v255_v6, 0  ;;  %vm411_vm1 = vcmp.gt.s32.totalorder %v410_v8, 0  ;;  %vm566_vm15 = vcmp.gt.s32.totalorder %v3303_v29, 0 }
  0x36   : > { %v259_v12 = vand.u32 31, %v257_v9  ;;  %v412_v13 = vsel %vm411_vm1, %v410_v8, 0  ;;  %v3291_v14 = vshrl.u32 %v257_v9, 5 }
  0x37   : > { %v3293_v15 = vand.u32 31, %v412_v13  ;;  %v3323_v0 = vshrl.u32 %v412_v13, 5 }
  0x38   : > { %v260_v17 = vsub.s32 32, %v259_v12  ;;  %v262_v19 = vshll.u32 %v3141_v18, %v259_v12  ;;  %v265_v21 = vshll.u32 %v3142_v20, %v259_v12  ;;  %v268_v23 = vshll.u32 %v3143_v22, %v259_v12 }
  0x39   : > { %v271_v25 = vshll.u32 %v3144_v24, %v259_v12  ;;  %v274_v27 = vshll.u32 %v3145_v26, %v259_v12  ;;  %vm277_vm2 = vcmp.lt.s32.totalorder %v3291_v14, 1  ;;  %vm280_vm3 = vcmp.lt.s32.totalorder %v3291_v14, 4 }
  0x3a   : > { %v263_v30 = vshrl.u32 %v3142_v20, %v260_v17  ;;  %v266_v31 = vshrl.u32 %v3143_v22, %v260_v17  ;;  %v269_v32 = vshrl.u32 %v3144_v24, %v260_v17  ;;  %v272_v34 = vshrl.u32 %v3145_v26, %v260_v17 }
  0x3b   : > { %v275_v36 = vshrl.u32 %v3146_v35, %v260_v17  ;;  %v3314_v40 = vsub.s32 32, %v3293_v15  ;;  %v261_v58 = vshrl.u32 %v3141_v18, %v260_v17  ;;  %vm279_vm4 = vcmp.lt.s32.totalorder %v3291_v14, 3 }
  0x3c   : > { %v264_v37 = vor.u32 %v263_v30, %v262_v19  ;;  %v267_v38 = vor.u32 %v266_v31, %v265_v21  ;;  %v270_v39 = vor.u32 %v269_v32, %v268_v23  ;;  %v273_v60 = vor.u32 %v272_v34, %v271_v25 }
  0x3d   : > { %v276_v61 = vor.u32 %v275_v36, %v274_v27  ;;  %vm278_vm5 = vcmp.lt.s32.totalorder %v3291_v14, 2  ;;  %v417_v3 = vshll.u32 %v3141_v18, %v3293_v15  ;;  %v420_v4 = vshll.u32 %v3142_v20, %v3293_v15 }
  0x3e   : > { %v285_v62 = vsel %vm277_vm2, %v264_v37, %v267_v38  ;;  %v289_v63 = vsel %vm277_vm2, %v267_v38, %v270_v39  ;;  %v286_v1 = vsel %vm280_vm3, %v273_v60, 920167782  ;;  %v282_v5 = vsel %vm280_vm3, %v270_v39, 2102212464 }
  0x3f   : > { %v290_v2 = vsel %vm280_vm3, %v276_v61, 1326507024  ;;  %v287_v6 = vsel %vm279_vm4, %v270_v39, %v286_v1  ;;  %v418_v8 = vshrl.u32 %v3142_v20, %v3314_v40  ;;  %v281_v9 = vsel %vm277_vm2, %v261_v58, %v264_v37 }
  0x40   : > { %v291_v7 = vsel %vm279_vm4, %v273_v60, %v290_v2  ;;  %v288_v11 = vsel %vm278_vm5, %v285_v62, %v287_v6  ;;  %v421_v13 = vshrl.u32 %v3143_v22, %v3314_v40  ;;  %v283_v25 = vsel %vm279_vm4, %v267_v38, %v282_v5 }
  0x41   : > { %v292_v12 = vsel %vm278_vm5, %v289_v63, %v291_v7  ;;  %v318_v21 = vand.u32 65535, %v288_v11  ;;  %v319_v23 = vshrl.u32 %v288_v11, 16  ;;  %v3351_v27 = vor.u32 %v418_v8, %v417_v3 }
  0x42   : > { %v296_v17 = vand.u32 65535, %v292_v12  ;;  %v297_v19 = vshrl.u32 %v292_v12, 16  ;;  %v3353_v30 = vor.u32 %v421_v13, %v420_v4  ;;  %v423_v31 = vshll.u32 %v3143_v22, %v3293_v15 }
  0x43   : > { %v424_v37 = vshrl.u32 %v3144_v24, %v3314_v40  ;;  %v320_v58 = vmul.u32 %v318_v21, %v294_v28  ;;  %v321_v60 = vmul.u32 %v319_v23, %v294_v28  ;;  %v322_v61 = vmul.u32 %v318_v21, %v295_v33 }
  0x44   : > { %v298_v32 = vmul.u32 %v296_v17, %v294_v28  ;;  %v299_v34 = vmul.u32 %v297_v19, %v294_v28  ;;  %v300_v36 = vmul.u32 %v296_v17, %v295_v33  ;;  %v301_v39 = vmul.u32 %v297_v19, %v295_v33 }
  0x45   : > { %v323_v1 = vmul.u32 %v319_v23, %v295_v33  ;;  %v324_v3 = vshll.u32 %v321_v60, 16  ;;  %v325_v4 = vshrl.u32 %v321_v60, 16  ;;  %v326_v5 = vshll.u32 %v322_v61, 16 }
  0x46   : > { %v302_v62 = vshll.u32 %v299_v34, 16  ;;  %v303_v63 = vshrl.u32 %v299_v34, 16  ;;  %v304_v38 = vshll.u32 %v300_v36, 16  ;;  %v305_v2 = vshrl.u32 %v300_v36, 16 }
  0x47   : > { %v327_v7 = vshrl.u32 %v322_v61, 16  ;;  %v426_v8 = vshll.u32 %v3144_v24, %v3293_v15  ;;  %v3147_v11 = vmov 0   ;;  %vm328_vm7 = vc.u32 %v320_v58, %v324_v3 }
  0x48   : > { %vm306_vm6 = vc.u32 %v298_v32, %v302_v62  ;;  %v308_v6 = vadd.s32 %v302_v62, %v298_v32  ;;  %v330_v28 = vadd.s32 %v324_v3, %v320_v58  ;;  %v427_v13 = vshrl.u32 %v3145_v26, %v3314_v40 }
  0x49   : > { %v307_v12 = vsel %vm306_vm6, 1, %v3147_v11  ;;  %v329_v33 = vsel %vm328_vm7, 1, %v3147_v11  ;;  %v429_v19 = vshll.u32 %v3145_v26, %v3293_v15  ;;  %v425_v32 = vor.u32 %v424_v37, %v423_v31 }
  0x4a   : > { %v309_v17 = vadd.s32 %v307_v12, %v301_v39  ;;  %vm310_vm8 = vc.u32 %v308_v6, %v304_v38  ;;  %v331_v23 = vadd.s32 %v329_v33, %v323_v1  ;;  %vm332_vm9 = vc.u32 %v330_v28, %v326_v5 }
  0x4b   : > { %v311_v21 = vsel %vm310_vm8, 1, %v3147_v11  ;;  %v333_v36 = vsel %vm332_vm9, 1, %v3147_v11  ;;  %v428_v60 = vor.u32 %v427_v13, %v426_v8  ;;  %v430_v58 = vshrl.u32 %v3146_v35, %v3314_v40 }
  0x4c   : > { %v313_v34 = vadd.s32 %v311_v21, %v309_v17  ;;  %v3371_v61 = vadd.s32 %v330_v28, %v326_v5  ;;  %v335_v39 = vadd.s32 %v333_v36, %v331_v23  ;;  %vm432_vm10 = vcmp.lt.s32.totalorder %v3323_v0, 1 }
  0x4d   : > { %vm434_vm11 = vcmp.lt.s32.totalorder %v3323_v0, 3  ;;  %v431_v62 = vor.u32 %v430_v58, %v429_v19  ;;  %vm433_vm12 = vcmp.lt.s32.totalorder %v3323_v0, 2  ;;  %vm435_vm13 = vcmp.lt.s32.totalorder %v3323_v0, 4 }
  0x4e   : > { %v314_v15 = vadd.s32 %v313_v34, %v303_v63  ;;  %v284_v31 = vsel %vm278_vm5, %v281_v9, %v283_v25  ;;  %v336_v37 = vadd.s32 %v335_v39, %v325_v4  ;;  %v440_v38 = vsel %vm432_vm10, %v3351_v27, %v3353_v30 }
  0x4f   : > { %v441_v1 = vsel %vm435_vm13, %v428_v60, 920167782  ;;  %v444_v5 = vsel %vm432_vm10, %v3353_v30, %v425_v32  ;;  %v449_v14 = vand.u32 65535, %v3295_v16  ;;  %v445_v4 = vsel %vm435_vm13, %v431_v62, 1326507024 }
  0x50   : > { %v3385_v3 = vadd.s32 %v314_v15, %v305_v2  ;;  %v442_v63 = vsel %vm434_vm11, %v425_v32, %v441_v1  ;;  %v337_v9 = vadd.s32 %v336_v37, %v327_v7  ;;  %v450_v6 = vshrl.u32 %v3295_v16, 16 }
  0x51   : > { %v443_v25 = vsel %vm433_vm12, %v440_v38, %v442_v63  ;;  %v338_v2 = vmul.u32 %v3289_v10, %v284_v31  ;;  %v446_v8 = vsel %vm434_vm11, %v428_v60, %v445_v4  ;;  %v416_v17 = vshrl.u32 %v3141_v18, %v3314_v40 }
  0x52   : > { %vm340_vm14 = vc.u32 %v3385_v3, %v3371_v61  ;;  %v473_v12 = vand.u32 65535, %v443_v25  ;;  %v341_v28 = vadd.s32 1, %v337_v9  ;;  %v447_v7 = vsel %vm433_vm12, %v444_v5, %v446_v8 }
  0x53   : > { %v474_v13 = vshrl.u32 %v443_v25, 16  ;;  %v451_v33 = vand.u32 65535, %v447_v7  ;;  %v452_v19 = vshrl.u32 %v447_v7, 16  ;;  %v437_v21 = vsel %vm435_vm13, %v425_v32, 2102212464 }
  0x54   : > { %v342_v10 = vsel %vm340_vm14, %v341_v28, %v337_v9  ;;  %v477_v34 = vmul.u32 %v473_v12, %v450_v6  ;;  %v475_v39 = vmul.u32 %v473_v12, %v449_v14  ;;  %v567_v31 = vsel %vm566_vm15, %v3303_v29, 0 }
  0x55   : > { %v476_v23 = vmul.u32 %v474_v13, %v449_v14  ;;  %v343_v36 = vadd.s32 %v342_v10, %v338_v2  ;;  %v453_v60 = vmul.u32 %v451_v33, %v449_v14  ;;  %v454_v58 = vmul.u32 %v452_v19, %v449_v14 }
  0x56   : > { %v455_v15 = vmul.u32 %v451_v33, %v450_v6  ;;  %v436_v40 = vsel %vm432_vm10, %v416_v17, %v3351_v27  ;;  %v456_v38 = vmul.u32 %v452_v19, %v450_v6  ;;  %v438_v32 = vsel %vm434_vm11, %v3353_v30, %v437_v21 }
  0x57   : > { %v479_v62 = vshll.u32 %v476_v23, 16  ;;  %v344_v37 = vadd.s32 536870912, %v343_v36  ;;  %v457_v1 = vshll.u32 %v454_v58, 16  ;;  %v478_v5 = vmul.u32 %v474_v13, %v450_v6 }
  0x58   : > { %v459_v63 = vshll.u32 %v455_v15, 16  ;;  %v481_v9 = vshll.u32 %v477_v34, 16  ;;  %v458_v29 = vshrl.u32 %v454_v58, 16  ;;  %v480_v28 = vshrl.u32 %v476_v23, 16 }
  0x59   : > { %v3417_v25 = vshrl.u32 %v344_v37, 30  ;;  %vm461_vm0 = vc.u32 %v453_v60, %v457_v1  ;;  %v463_v14 = vadd.s32 %v457_v1, %v453_v60  ;;  %vm483_vm1 = vc.u32 %v475_v39, %v479_v62 }
  0x5a   : > { %v462_v4 = vsel %vm461_vm0, 1, %v3147_v11  ;;  %v484_v2 = vsel %vm483_vm1, 1, %v3147_v11  ;;  %v485_v27 = vadd.s32 %v479_v62, %v475_v39  ;;  %v569_v7 = vand.u32 31, %v567_v31 }
  0x5b   : > { %v346_v8 = vshll.u32 %v3417_v25, 30  ;;  %v464_v12 = vadd.s32 %v462_v4, %v456_v38  ;;  %vm465_vm2 = vc.u32 %v463_v14, %v459_v63  ;;  %v486_v6 = vadd.s32 %v484_v2, %v478_v5 }
  0x5c   : > { %v466_v30 = vsel %vm465_vm2, 1, %v3147_v11  ;;  %vm487_vm3 = vc.u32 %v485_v27, %v481_v9  ;;  %v460_v17 = vshrl.u32 %v455_v15, 16  ;;  %v482_v10 = vshrl.u32 %v477_v34, 16 }
  0x5d   : > { %v347_v13 = vsub.s32 %v343_v36, %v346_v8  ;;  %v468_v33 = vadd.s32 %v466_v30, %v464_v12  ;;  %v488_v19 = vsel %vm487_vm3, 1, %v3147_v11  ;;  %v555_v60 = vand.u32 2147483647, %v3252_v43 }
  0x5e   : > { %v490_v21 = vadd.s32 %v488_v19, %v486_v6  ;;  %v3425_v62 = vadd.s32 %v485_v27, %v481_v9  ;;  %v439_v23 = vsel %vm433_vm12, %v436_v40, %v438_v32  ;;  %v570_v38 = vsub.s32 32, %v569_v7 }
  0x5f   : > { %vm348_vm4 = vcmp.lt.s32.totalorder %v347_v13, 0  ;;  %v349_v58 = vsub.s32 0, %v347_v13  ;;  %v469_v39 = vadd.s32 %v468_v33, %v458_v29  ;;  %vm247_vm5 = vcmp.lt.s32.totalorder %v3248_v41, 0 }
  0x60   : > { %v491_v37 = vadd.s32 %v490_v21, %v480_v28  ;;  %v339_v34 = vadd.s32 %v3371_v61, %v3385_v3  ;;  %v562_v5 = vand.u32 8388607, %v555_v60  ;;  %v369_v9 = vsub.s32 4, %v3417_v25 }
  0x61   : > { %v350_v36 = vsel %vm348_vm4, %v349_v58, %v347_v13  ;;  %v3430_v15 = vadd.s32 %v469_v39, %v460_v17  ;;  %v493_v0 = vmul.u32 %v3295_v16, %v439_v23  ;;  %v3440_v40 = vshrl.u32 %v567_v31, 5 }
  0x62   : > { %v351_v1 = vclz %v350_v36  ;;  %v492_v63 = vadd.s32 %v491_v37, %v482_v10  ;;  %vm3444_vm7 = vcmp.le.f32.partialorder %v245_v57, 0.7853982  ;;  %v581_v14 = vshll.u32 %v3144_v24, %v569_v7 }
  0x63   : > { %vm495_vm6 = vc.u32 %v3430_v15, %v3425_v62  ;;  %v582_v29 = vshrl.u32 %v3145_v26, %v570_v38  ;;  %v572_v4 = vshll.u32 %v3141_v18, %v569_v7  ;;  %v573_v16 = vshrl.u32 %v3142_v20, %v570_v38 }
  0x64   : > { %v2853_v61 = vadd.s32 4294967294, %v351_v1  ;;  %v496_v3 = vadd.s32 1, %v492_v63  ;;  %v575_v2 = vshll.u32 %v3142_v20, %v569_v7  ;;  %v576_v31 = vshrl.u32 %v3143_v22, %v570_v38 }
  0x65   : > { %v578_v57 = vshll.u32 %v3143_v22, %v569_v7  ;;  %v579_v8 = vshrl.u32 %v3144_v24, %v570_v38  ;;  %v584_v30 = vshll.u32 %v3145_v26, %v569_v7  ;;  %v585_v6 = vshrl.u32 %v3146_v35, %v570_v38 }
  0x66   : > { %vm2854_vm8 = vcmp.lt.s32.totalorder %v2853_v61, 0  ;;  %v497_v27 = vsel %vm495_vm6, %v496_v3, %v492_v63  ;;  %v583_v10 = vor.u32 %v582_v29, %v581_v14  ;;  %v370_v21 = vsel %vm247_vm5, %v369_v9, %v3417_v25 }
  0x67   : > { %v354_v12 = vsel %vm2854_vm8, 0, %v2853_v61  ;;  %v498_v28 = vadd.s32 %v497_v27, %v493_v0  ;;  %v574_v39 = vor.u32 %v573_v16, %v572_v4  ;;  %v577_v23 = vor.u32 %v576_v31, %v575_v2 }
  0x68   : > { %v355_v17 = vsub.s32 32, %v354_v12  ;;  %v356_v33 = vshll.u32 %v347_v13, %v354_v12  ;;  %v359_v19 = vsub.s32 4294967266, %v354_v12  ;;  %v580_v1 = vor.u32 %v579_v8, %v578_v57 }
  0x69   : > { %v499_v58 = vadd.s32 536870912, %v498_v28  ;;  %vm587_vm9 = vcmp.lt.s32.totalorder %v3440_v40, 1  ;;  %v586_v7 = vor.u32 %v585_v6, %v584_v30  ;;  %vm589_vm10 = vcmp.lt.s32.totalorder %v3440_v40, 3 }
  0x6a   : > { %v357_v37 = vshrl.u32 %v339_v34, %v355_v17  ;;  %v360_v36 = vadd.s32 127, %v359_v19  ;;  %vm590_vm11 = vcmp.lt.s32.totalorder %v3440_v40, 4  ;;  %v563_v61 = vor.u32 8388608, %v562_v5 }
  0x6b   : > { %v3462_v63 = vshrl.u32 %v499_v58, 30  ;;  %v596_v25 = vsel %vm590_vm11, %v583_v10, 920167782  ;;  %v372_v34 = vsel %vm3444_vm7, 0, %v370_v21  ;;  %vm588_vm12 = vcmp.lt.s32.totalorder %v3440_v40, 2 }
  0x6c   : > { %v358_v13 = vor.u32 %v357_v37, %v356_v33  ;;  %v361_v0 = vshll.u32 %v360_v36, 23  ;;  %v595_v29 = vsel %vm587_vm9, %v574_v39, %v577_v23  ;;  %v597_v4 = vsel %vm589_vm10, %v580_v1, %v596_v25 }
  0x6d   : > { %v501_v9 = vshll.u32 %v3462_v63, 30  ;;  %v571_v5 = vshrl.u32 %v3141_v18, %v570_v38  ;;  %v599_v2 = vsel %vm587_vm9, %v577_v23, %v580_v1  ;;  %v600_v31 = vsel %vm590_vm11, %v586_v7, 1326507024 }
  0x6e   : > { %v362_v3 = vor.u32 4788187, %v361_v0  ;;  %v365_v14 = vcvt.s32.f32 %v358_v13  ;;  %v389_v57 = vadd.s32 3, %v372_v34  ;;  %v601_v8 = vsel %vm589_vm10, %v583_v10, %v600_v31 }
  0x6f   : > { %v3476_v16 = vsub.s32 %v498_v28, %v501_v9  ;;  %v3485_v12 = vshll.u32 %v563_v61, 8  ;;  %v598_v38 = vsel %vm588_vm12, %v595_v29, %v597_v4  ;;  %v602_v30 = vsel %vm588_vm12, %v599_v2, %v601_v8 }
  0x70   : > { %v363_v27 = vand.u32 2147483647, %v362_v3  ;;  %v606_v19 = vand.u32 65535, %v602_v30  ;;  %v494_v10 = vadd.s32 %v3425_v62, %v3430_v15  ;;  %v607_v58 = vshrl.u32 %v602_v30, 16 }
  0x71   : > { %vm503_vm13 = vcmp.lt.s32.totalorder %v3476_v16, 0  ;;  %v504_v28 = vsub.s32 0, %v3476_v16  ;;  %v604_v17 = vand.u32 65535, %v3485_v12  ;;  %v605_v33 = vshrl.u32 %v3485_v12, 16 }
  0x72   : > { %v366_v6 = vmul.f32 %v365_v14, %v363_v27  ;;  %v3498_v36 = vand.u32 3, %v389_v57  ;;  %vm402_vm14 = vcmp.lt.s32.totalorder %v3250_v42, 0  ;;  %v592_v0 = vsel %vm590_vm11, %v580_v1, 2102212464 }
  0x73   : > { %v505_v21 = vsel %vm503_vm13, %v504_v28, %v3476_v16  ;;  %v3501_v13 = vmul.u32 %v606_v19, %v605_v33  ;;  %v608_v61 = vmul.u32 %v606_v19, %v604_v17  ;;  %v609_v25 = vmul.u32 %v607_v58, %v604_v17 }
  0x74   : > { %v367_v37 = vxor.u32 2147483648, %v366_v6  ;;  %v506_v7 = vclz %v505_v21  ;;  %v629_v34 = vshrl.u32 %v598_v38, 16  ;;  %v524_v9 = vsub.s32 4, %v3462_v63 }
  0x75   : > { %v591_v3 = vsel %vm587_vm9, %v571_v5, %v574_v39  ;;  %v612_v29 = vshll.u32 %v609_v25, 16  ;;  %v614_v1 = vshll.u32 %v3501_v13, 16  ;;  %v628_v4 = vand.u32 65535, %v598_v38 }
  0x76   : > { %v368_v62 = vsel %vm247_vm5, %v367_v37, %v366_v6  ;;  %v2856_v15 = vadd.s32 4294967294, %v506_v7  ;;  %vm3520_vm15 = vcmp.le.f32.partialorder %v400_v59, 0.7853982  ;;  %v593_v39 = vsel %vm589_vm10, %v577_v23, %v592_v0 }
  0x77   : > { %v3513_v14 = vsel %vm3444_vm7, %v3248_v41, %v368_v62  ;;  %v611_v32 = vmul.u32 %v607_v58, %v605_v33  ;;  %vm616_vm1 = vc.u32 %v608_v61, %v612_v29  ;;  %v618_v27 = vadd.s32 %v612_v29, %v608_v61 }
  0x78   : > { %v373_v2 = vmul.f32 %v3513_v14, %v3513_v14  ;;  %vm2857_vm0 = vcmp.lt.s32.totalorder %v2856_v15, 0  ;;  %v3526_v57 = vmul.u32 %v629_v34, %v604_v17  ;;  %v617_v59 = vsel %vm616_vm1, 1, %v3147_v11 }
  0x79   : > { %v509_v5 = vsel %vm2857_vm0, 0, %v2856_v15  ;;  %vm620_vm2 = vc.u32 %v618_v27, %v614_v1  ;;  %v3530_v19 = vmul.u32 %v628_v4, %v605_v33  ;;  %v619_v58 = vadd.s32 %v617_v59, %v611_v32 }
  0x7a   : > { %v374_v8 = vmul.f32 -0.001358992, %v373_v2  ;;  %v381_v28 = vmul.f32 -0.00019511016, %v373_v2  ;;  %v510_v38 = vsub.s32 32, %v509_v5  ;;  %v511_v30 = vshll.u32 %v3476_v16, %v509_v5 }
  0x7b   : > { %v514_v6 = vsub.s32 4294967266, %v509_v5  ;;  %vm395_vm3 = vcmp.eq.s32.totalorder %v3498_v36, 2  ;;  %v525_v0 = vsel %vm402_vm14, %v524_v9, %v3462_v63  ;;  %v613_v61 = vshrl.u32 %v609_v25, 16 }
  0x7c   : > { %v375_v21 = vadd.f32 0.041655596, %v374_v8  ;;  %v382_v37 = vadd.f32 0.008332121, %v381_v28  ;;  %v512_v23 = vshrl.u32 %v494_v10, %v510_v38  ;;  %v630_v62 = vmul.u32 %v628_v4, %v604_v17 }
  0x7d   : > { %v515_v7 = vadd.s32 127, %v514_v6  ;;  %v621_v1 = vsel %vm620_vm2, 1, %v3147_v11  ;;  %vm392_vm4 = vcmp.eq.s32.totalorder %v3498_v36, 0  ;;  %v633_v10 = vmul.u32 %v629_v34, %v605_v33 }
  0x7e   : > { %v376_v16 = vmul.f32 %v375_v21, %v373_v2  ;;  %v383_v15 = vmul.f32 %v382_v37, %v373_v2  ;;  %v513_v29 = vor.u32 %v512_v23, %v511_v30  ;;  %v623_v27 = vadd.s32 %v621_v1, %v619_v58 }
  0x7f   : > { %v516_v5 = vshll.u32 %v515_v7, 23  ;;  %v634_v32 = vshll.u32 %v3526_v57, 16  ;;  %vm391_vm5 = vcmp.lt.s32.totalorder %v3498_v36, 2  ;;  %v594_v63 = vsel %vm588_vm12, %v591_v3, %v593_v39 }
  0x80   : > { %v377_v8 = vadd.f32 -0.4999988, %v376_v16  ;;  %v384_v28 = vadd.f32 -0.16666654, %v383_v15  ;;  %v636_v17 = vshll.u32 %v3530_v19, 16  ;;  %v520_v9 = vcvt.s32.f32 %v513_v29 }
  0x81   : > { %v517_v25 = vor.u32 4788187, %v516_v5  ;;  %v527_v4 = vsel %vm3520_vm15, 0, %v525_v0  ;;  %vm638_vm6 = vc.u32 %v630_v62, %v634_v32  ;;  %v640_v30 = vadd.s32 %v634_v32, %v630_v62 }
  0x82   : > { %v378_v38 = vmul.f32 %v377_v8, %v373_v2  ;;  %v385_v33 = vmul.f32 %v384_v28, %v373_v2  ;;  %v639_v34 = vsel %vm638_vm6, 1, %v3147_v11  ;;  %v615_v59 = vshrl.u32 %v3501_v13, 16 }
  0x83   : > { %v518_v6 = vand.u32 2147483647, %v517_v25  ;;  %v624_v21 = vadd.s32 %v623_v27, %v613_v61  ;;  %v641_v40 = vadd.s32 %v639_v34, %v633_v10  ;;  %v635_v37 = vshrl.u32 %v3526_v57, 16 }
  0x84   : > { %v379_v3 = vadd.f32 1.0, %v378_v38  ;;  %v386_v39 = vadd.f32 1.0, %v385_v33  ;;  %vm642_vm7 = vc.u32 %v640_v30, %v636_v17  ;;  %v544_v58 = vadd.s32 3, %v527_v4 }
  0x85   : > { %v521_v23 = vmul.f32 %v520_v9, %v518_v6  ;;  %v643_v7 = vsel %vm642_vm7, 1, %v3147_v11  ;;  %v713_v2 = vand.u32 2139095040, %v3254_v44  ;;  %v637_v13 = vshrl.u32 %v3530_v19, 16 }
  0x86   : > { %v387_v0 = vmul.f32 %v386_v39, %v3513_v14  ;;  %v396_v62 = vxor.u32 2147483648, %v379_v3  ;;  %v645_v16 = vadd.s32 %v643_v7, %v641_v40  ;;  %v3555_v15 = vadd.s32 %v624_v21, %v615_v59 }
  0x87   : > { %v522_v61 = vxor.u32 2147483648, %v521_v23  ;;  %v3557_v29 = vadd.s32 %v640_v30, %v636_v17  ;;  %v714_v57 = vshrl.u32 %v713_v2, 23  ;;  %v710_v10 = vand.u32 2147483647, %v3254_v44 }
  0x88   : > { %v393_v1 = vxor.u32 2147483648, %v387_v0  ;;  %v397_v5 = vsel %vm395_vm3, %v396_v62, %v387_v0  ;;  %v646_v27 = vadd.s32 %v645_v16, %v635_v37  ;;  %vm388_vm8 = vweird.f32 %v3248_v41 }
  0x89   : > { %v523_v14 = vsel %vm402_vm14, %v522_v61, %v521_v23  ;;  %v2861_v19 = vadd.s32 4294967169, %v714_v57  ;;  %v648_v17 = vmul.u32 %v3485_v12, %v594_v63  ;;  %vm650_vm9 = vc.u32 %v3555_v15, %v3557_v29 }
  0x8a   : > { %v394_v32 = vsel %vm392_vm4, %v379_v3, %v393_v1  ;;  %v526_v8 = vsel %vm3520_vm15, %v3250_v42, %v523_v14  ;;  %v647_v28 = vadd.s32 %v646_v27, %v637_v13  ;;  %v3575_v38 = vand.u32 3, %v544_v58 }
  0x8b   : > { %v398_v25 = vsel %vm391_vm5, %v394_v32, %v397_v5  ;;  %v528_v9 = vmul.f32 %v526_v8, %v526_v8  ;;  %v720_v41 = vadd.s32 1, %v2861_v19  ;;  %v717_v34 = vand.u32 8388607, %v710_v10 }
  0x8c   : > { %v399_v4 = vsel %vm388_vm8, nan, %v398_v25  ;;  %v651_v33 = vadd.s32 1, %v647_v28  ;;  %vm550_vm11 = vcmp.eq.s32.totalorder %v3575_v38, 2  ;;  %v865_v23 = vand.u32 2147483647, %v3256_v45 }
  0x8d   : > { %v529_v31 = vmul.f32 -0.001358992, %v528_v9  ;;  %v536_v30 = vmul.f32 -0.00019511016, %v528_v9  ;;  %vm721_vm10 = vcmp.gt.s32.totalorder %v720_v41, 0  ;;  %2725 = vst [vmem:[%s3579_s15] sm:$0xff] %v399_v4  ;;  %v718_v21 = vor.u32 8388608, %v717_v34 }
  0x8e   : > { %v652_v12 = vsel %vm650_vm9, %v651_v33, %v647_v28  ;;  %v722_v36 = vsel %vm721_vm10, %v720_v41, 0  ;;  %vm547_vm12 = vcmp.eq.s32.totalorder %v3575_v38, 0  ;;  %vm546_vm13 = vcmp.lt.s32.totalorder %v3575_v38, 2 }
  0x8f   : > { %v530_v63 = vadd.f32 0.041655596, %v529_v31  ;;  %v537_v6 = vadd.f32 0.008332121, %v536_v30  ;;  %v653_v59 = vadd.s32 %v652_v12, %v648_v17  ;;  %v724_v40 = vand.u32 31, %v722_v36 }
  0x90   : > { %v3585_v58 = vshrl.u32 %v722_v36, 5  ;;  %vm543_vm14 = vweird.f32 %v3250_v42  ;;  %v3601_v28 = vshll.u32 %v718_v21, 8  ;;  %v868_v41 = vand.u32 2139095040, %v3256_v45 }
  0x91   : > { %v531_v3 = vmul.f32 %v530_v63, %v528_v9  ;;  %v538_v39 = vmul.f32 %v537_v6, %v528_v9  ;;  %v654_v37 = vadd.s32 536870912, %v653_v59  ;;  %v3587_v7 = vsub.s32 32, %v724_v40 }
  0x92   : > { %v727_v2 = vshll.u32 %v3141_v18, %v724_v40  ;;  %v730_v0 = vshll.u32 %v3142_v20, %v724_v40  ;;  %v733_v61 = vshll.u32 %v3143_v22, %v724_v40  ;;  %v736_v27 = vshll.u32 %v3144_v24, %v724_v40 }
  0x93   : > { %v532_v62 = vadd.f32 -0.4999988, %v531_v3  ;;  %v539_v13 = vadd.f32 -0.16666654, %v538_v39  ;;  %v655_v16 = vshrl.u32 %v654_v37, 30  ;;  %v728_v57 = vshrl.u32 %v3142_v20, %v3587_v7 }
  0x94   : > { %v731_v1 = vshrl.u32 %v3143_v22, %v3587_v7  ;;  %v734_v5 = vshrl.u32 %v3144_v24, %v3587_v7  ;;  %v737_v25 = vshrl.u32 %v3145_v26, %v3587_v7  ;;  %vm742_vm15 = vcmp.lt.s32.totalorder %v3585_v58, 1 }
  0x95   : > { %v533_v14 = vmul.f32 %v532_v62, %v528_v9  ;;  %v540_v19 = vmul.f32 %v539_v13, %v528_v9  ;;  %v656_v32 = vshll.u32 %v655_v16, 30  ;;  %v3603_v17 = vor.u32 %v728_v57, %v727_v2 }
  0x96   : > { %vm557_vm0 = vcmp.lt.s32.totalorder %v3252_v43, 0  ;;  %v3610_v31 = vor.u32 %v731_v1, %v730_v0  ;;  %v735_v9 = vor.u32 %v734_v5, %v733_v61  ;;  %v738_v30 = vor.u32 %v737_v25, %v736_v27 }
  0x97   : > { %v534_v4 = vadd.f32 1.0, %v533_v14  ;;  %v541_v33 = vadd.f32 1.0, %v540_v19  ;;  %v657_v34 = vsub.s32 %v653_v59, %v656_v32  ;;  %v739_v12 = vshll.u32 %v3145_v26, %v724_v40 }
  0x98   : > { %v740_v36 = vshrl.u32 %v3146_v35, %v3587_v7  ;;  %v679_v3 = vsub.s32 4, %v655_v16  ;;  %vm744_vm2 = vcmp.lt.s32.totalorder %v3585_v58, 3  ;;  %vm745_vm3 = vcmp.lt.s32.totalorder %v3585_v58, 4 }
  0x99   : > { %v542_v63 = vmul.f32 %v541_v33, %v526_v8  ;;  %v551_v6 = vxor.u32 2147483648, %v534_v4  ;;  %vm658_vm1 = vcmp.lt.s32.totalorder %v657_v34, 0  ;;  %v659_v21 = vsub.s32 0, %v657_v34 }
  0x9a   : > { %v869_v39 = vshrl.u32 %v868_v41, 23  ;;  %v741_v0 = vor.u32 %v740_v36, %v739_v12  ;;  %vm743_vm4 = vcmp.lt.s32.totalorder %v3585_v58, 2  ;;  %v750_v8 = vsel %vm742_vm15, %v3603_v17, %v3610_v31 }
  0x9b   : > { %v548_v59 = vxor.u32 2147483648, %v542_v63  ;;  %v552_v37 = vsel %vm550_vm11, %v551_v6, %v542_v63  ;;  %v660_v2 = vsel %vm658_vm1, %v659_v21, %v657_v34  ;;  %v751_v62 = vsel %vm745_vm3, %v738_v30, 920167782 }
  0x9c   : > { %v661_v40 = vclz %v660_v2  ;;  %vm3630_vm5 = vcmp.le.f32.partialorder %v555_v60, 0.7853982  ;;  %v649_v57 = vadd.s32 %v3557_v29, %v3555_v15  ;;  %v752_v1 = vsel %vm744_vm2, %v735_v9, %v751_v62 }
  0x9d   : > { %v549_v13 = vsel %vm547_vm12, %v534_v4, %v548_v59  ;;  %v759_v14 = vand.u32 65535, %v3601_v28  ;;  %v3643_v19 = vand.u32 8388607, %v865_v23  ;;  %v753_v32 = vsel %vm743_vm4, %v750_v8, %v752_v1 }
  0x9e   : > { %v553_v5 = vsel %vm546_vm13, %v549_v13, %v552_v37  ;;  %v2859_v27 = vadd.s32 4294967294, %v661_v40  ;;  %v754_v15 = vsel %vm742_vm15, %v3610_v31, %v735_v9  ;;  %v2864_v29 = vadd.s32 4294967169, %v869_v39 }
  0x9f   : > { %v554_v60 = vsel %vm543_vm14, nan, %v553_v5  ;;  %v680_v38 = vsel %vm557_vm0, %v679_v3, %v655_v16  ;;  %v755_v25 = vsel %vm745_vm3, %v741_v0, 1326507024  ;;  %v760_v41 = vshrl.u32 %v3601_v28, 16 }
  0xa0   : > { %vm2860_vm6 = vcmp.lt.s32.totalorder %v2859_v27, 0  ;;  %2726 = vst [vmem:[%s3579_s15 + $0x8] sm:$0xff] %v554_v60  ;;  %v756_v4 = vsel %vm744_vm2, %v738_v30, %v755_v25  ;;  %v783_v33 = vand.u32 65535, %v753_v32  ;;  %v784_v12 = vshrl.u32 %v753_v32, 16 }
  0xa1   : > { %v664_v42 = vsel %vm2860_vm6, 0, %v2859_v27  ;;  %v757_v21 = vsel %vm743_vm4, %v754_v15, %v756_v4  ;;  %v682_v16 = vsel %vm3630_vm5, 0, %v680_v38  ;;  %v726_v3 = vshrl.u32 %v3141_v18, %v3587_v7 }
  0xa2   : > { %v665_v36 = vsub.s32 32, %v664_v42  ;;  %v666_v63 = vshll.u32 %v657_v34, %v664_v42  ;;  %v669_v6 = vsub.s32 4294967266, %v664_v42  ;;  %v761_v39 = vand.u32 65535, %v757_v21 }
  0xa3   : > { %v875_v59 = vadd.s32 1, %v2864_v29  ;;  %v747_v30 = vsel %vm745_vm3, %v735_v9, 2102212464  ;;  %v762_v0 = vshrl.u32 %v757_v21, 16  ;;  %v785_v34 = vmul.u32 %v783_v33, %v759_v14 }
  0xa4   : > { %v667_v37 = vshrl.u32 %v649_v57, %v665_v36  ;;  %v670_v2 = vadd.s32 127, %v669_v6  ;;  %v765_v40 = vmul.u32 %v761_v39, %v760_v41  ;;  %v786_v8 = vmul.u32 %v784_v12, %v759_v14 }
  0xa5   : > { %v787_v62 = vmul.u32 %v783_v33, %v760_v41  ;;  %v763_v5 = vmul.u32 %v761_v39, %v759_v14  ;;  %v764_v27 = vmul.u32 %v762_v0, %v759_v14  ;;  %v746_v7 = vsel %vm742_vm15, %v726_v3, %v3603_v17 }
  0xa6   : > { %v668_v13 = vor.u32 %v667_v37, %v666_v63  ;;  %v671_v1 = vshll.u32 %v670_v2, 23  ;;  %v766_v60 = vmul.u32 %v762_v0, %v760_v41  ;;  %v788_v32 = vmul.u32 %v784_v12, %v760_v41 }
  0xa7   : > { %v789_v57 = vshll.u32 %v786_v8, 16  ;;  %v767_v38 = vshll.u32 %v764_v27, 16  ;;  %v769_v9 = vshll.u32 %v765_v40, 16  ;;  %v699_v25 = vadd.s32 3, %v682_v16 }
  0xa8   : > { %v672_v15 = vor.u32 4788187, %v671_v1  ;;  %v675_v29 = vcvt.s32.f32 %v668_v13  ;;  %v748_v42 = vsel %vm744_vm2, %v3610_v31, %v747_v30  ;;  %v791_v4 = vshll.u32 %v787_v62, 16 }
  0xa9   : > { %vm793_vm7 = vc.u32 %v785_v34, %v789_v57  ;;  %vm771_vm8 = vc.u32 %v763_v5, %v767_v38  ;;  %v773_v14 = vadd.s32 %v767_v38, %v763_v5  ;;  %v768_v17 = vshrl.u32 %v764_v27, 16 }
  0xaa   : > { %v673_v33 = vand.u32 2147483647, %v672_v15  ;;  %v794_v36 = vsel %vm793_vm7, 1, %v3147_v11  ;;  %v772_v41 = vsel %vm771_vm8, 1, %v3147_v11  ;;  %v795_v12 = vadd.s32 %v789_v57, %v785_v34 }
  0xab   : > { %v796_v63 = vadd.s32 %v794_v36, %v788_v32  ;;  %v774_v21 = vadd.s32 %v772_v41, %v766_v60  ;;  %vm775_vm9 = vc.u32 %v773_v14, %v769_v9  ;;  %vm876_vm10 = vcmp.gt.s32.totalorder %v875_v59, 0 }
  0xac   : > { %v676_v6 = vmul.f32 %v675_v29, %v673_v33  ;;  %v776_v16 = vsel %vm775_vm9, 1, %v3147_v11  ;;  %v790_v3 = vshrl.u32 %v786_v8, 16  ;;  %vm797_vm11 = vc.u32 %v795_v12, %v791_v4 }
  0xad   : > { %v877_v31 = vsel %vm876_vm10, %v875_v59, 0  ;;  %v770_v37 = vshrl.u32 %v765_v40, 16  ;;  %v778_v2 = vadd.s32 %v776_v16, %v774_v21  ;;  %v798_v30 = vsel %vm797_vm11, 1, %v3147_v11 }
  0xae   : > { %v677_v39 = vxor.u32 2147483648, %v676_v6  ;;  %v749_v0 = vsel %vm743_vm4, %v746_v7, %v748_v42  ;;  %v792_v13 = vshrl.u32 %v787_v62, 16  ;;  %v800_v34 = vadd.s32 %v798_v30, %v796_v63 }
  0xaf   : > { %v879_v1 = vand.u32 31, %v877_v31  ;;  %v779_v27 = vadd.s32 %v778_v2, %v768_v17  ;;  %v3682_v60 = vadd.s32 %v795_v12, %v791_v4  ;;  %v873_v8 = vor.u32 8388608, %v3643_v19 }
  0xb0   : > { %v678_v5 = vsel %vm557_vm0, %v677_v39, %v676_v6  ;;  %v801_v40 = vadd.s32 %v800_v34, %v790_v3  ;;  %v3688_v32 = vshrl.u32 %v877_v31, 5  ;;  %v3690_v62 = vand.u32 3, %v699_v25 }
  0xb1   : > { %v681_v59 = vsel %vm3630_vm5, %v3252_v43, %v678_v5  ;;  %v880_v58 = vsub.s32 32, %v879_v1  ;;  %v3692_v57 = vadd.s32 %v779_v27, %v770_v37  ;;  %v803_v15 = vmul.u32 %v3601_v28, %v749_v0 }
  0xb2   : > { %v683_v7 = vmul.f32 %v681_v59, %v681_v59  ;;  %v802_v29 = vadd.s32 %v801_v40, %v792_v13  ;;  %v882_v38 = vshll.u32 %v3141_v18, %v879_v1  ;;  %v885_v9 = vshll.u32 %v3142_v20, %v879_v1 }
  0xb3   : > { %v883_v19 = vshrl.u32 %v3142_v20, %v880_v58  ;;  %vm805_vm12 = vc.u32 %v3692_v57, %v3682_v60  ;;  %v886_v4 = vshrl.u32 %v3143_v22, %v880_v58  ;;  %v888_v33 = vshll.u32 %v3143_v22, %v879_v1 }
  0xb4   : > { %v684_v61 = vmul.f32 -0.001358992, %v683_v7  ;;  %v691_v42 = vmul.f32 -0.00019511016, %v683_v7  ;;  %v806_v25 = vadd.s32 1, %v802_v29  ;;  %v889_v14 = vshrl.u32 %v3144_v24, %v880_v58 }
  0xb5   : > { %vm897_vm13 = vcmp.lt.s32.totalorder %v3688_v32, 1  ;;  %v891_v17 = vshll.u32 %v3144_v24, %v879_v1  ;;  %v892_v41 = vshrl.u32 %v3145_v26, %v880_v58  ;;  %v884_v63 = vor.u32 %v883_v19, %v882_v38 }
  0xb6   : > { %v685_v28 = vadd.f32 0.041655596, %v684_v61  ;;  %v692_v36 = vadd.f32 0.008332121, %v691_v42  ;;  %v807_v12 = vsel %vm805_vm12, %v806_v25, %v802_v29  ;;  %v894_v6 = vshll.u32 %v3145_v26, %v879_v1 }
  0xb7   : > { %v895_v21 = vshrl.u32 %v3146_v35, %v880_v58  ;;  %v808_v31 = vadd.s32 %v807_v12, %v803_v15  ;;  %v3708_v39 = vor.u32 %v886_v4, %v885_v9  ;;  %v890_v37 = vor.u32 %v889_v14, %v888_v33 }
  0xb8   : > { %v686_v16 = vmul.f32 %v685_v28, %v683_v7  ;;  %v693_v3 = vmul.f32 %v692_v36, %v683_v7  ;;  %v893_v2 = vor.u32 %v892_v41, %v891_v17  ;;  %vm899_vm14 = vcmp.lt.s32.totalorder %v3688_v32, 3 }
  0xb9   : > { %v896_v30 = vor.u32 %v895_v21, %v894_v6  ;;  %v809_v34 = vadd.s32 536870912, %v808_v31  ;;  %vm900_vm15 = vcmp.lt.s32.totalorder %v3688_v32, 4  ;;  %vm898_vm0 = vcmp.lt.s32.totalorder %v3688_v32, 2 }
  0xba   : > { %v687_v0 = vadd.f32 -0.4999988, %v686_v16  ;;  %v694_v13 = vadd.f32 -0.16666654, %v693_v3  ;;  %v906_v1 = vsel %vm900_vm15, %v893_v2, 920167782  ;;  %v905_v29 = vsel %vm897_vm13, %v884_v63, %v3708_v39 }
  0xbb   : > { %v3715_v5 = vshll.u32 %v873_v8, 8  ;;  %v3717_v15 = vshrl.u32 %v809_v34, 30  ;;  %vm701_vm1 = vcmp.lt.s32.totalorder %v3690_v62, 2  ;;  %v907_v38 = vsel %vm899_vm14, %v890_v37, %v906_v1 }
  0xbc   : > { %v688_v27 = vmul.f32 %v687_v0, %v683_v7  ;;  %v695_v40 = vmul.f32 %v694_v13, %v683_v7  ;;  %v910_v19 = vsel %vm900_vm15, %v896_v30, 1326507024  ;;  %v909_v7 = vsel %vm897_vm13, %v3708_v39, %v890_v37 }
  0xbd   : > { %v811_v8 = vshll.u32 %v3717_v15, 30  ;;  %vm702_vm2 = vcmp.eq.s32.totalorder %v3690_v62, 0  ;;  %vm705_vm3 = vcmp.eq.s32.totalorder %v3690_v62, 2  ;;  %v908_v42 = vsel %vm898_vm0, %v905_v29, %v907_v38 }
  0xbe   : > { %v689_v9 = vadd.f32 1.0, %v688_v27  ;;  %v696_v61 = vadd.f32 1.0, %v695_v40  ;;  %v911_v4 = vsel %vm899_vm14, %v893_v2, %v910_v19  ;;  %v914_v28 = vand.u32 65535, %v3715_v5 }
  0xbf   : > { %v812_v14 = vsub.s32 %v808_v31, %v811_v8  ;;  %v881_v36 = vshrl.u32 %v3141_v18, %v880_v58  ;;  %v912_v17 = vsel %vm898_vm0, %v909_v7, %v911_v4  ;;  %v915_v41 = vshrl.u32 %v3715_v5, 16 }
  0xc0   : > { %v697_v25 = vmul.f32 %v696_v61, %v681_v59  ;;  %v706_v33 = vxor.u32 2147483648, %v689_v9  ;;  %v939_v12 = vshrl.u32 %v908_v42, 16  ;;  %vm698_vm5 = vweird.f32 %v3252_v43 }
  0xc1   : > { %vm813_vm4 = vcmp.lt.s32.totalorder %v812_v14, 0  ;;  %v814_v16 = vsub.s32 0, %v812_v14  ;;  %vm712_vm6 = vcmp.lt.s32.totalorder %v3254_v44, 0  ;;  %v916_v59 = vand.u32 65535, %v912_v17 }
  0xc2   : > { %v703_v6 = vxor.u32 2147483648, %v697_v25  ;;  %v707_v21 = vsel %vm705_vm3, %v706_v33, %v697_v25  ;;  %v917_v3 = vshrl.u32 %v912_v17, 16  ;;  %v938_v2 = vand.u32 65535, %v908_v42 }
  0xc3   : > { %v815_v58 = vsel %vm813_vm4, %v814_v16, %v812_v14  ;;  %v3746_v30 = vmul.u32 %v939_v12, %v914_v28  ;;  %v918_v34 = vmul.u32 %v916_v59, %v914_v28  ;;  %v804_v43 = vadd.s32 %v3682_v60, %v3692_v57 }
  0xc4   : > { %v704_v31 = vsel %vm702_vm2, %v689_v9, %v703_v6  ;;  %v816_v13 = vclz %v815_v58  ;;  %v919_v1 = vmul.u32 %v917_v3, %v914_v28  ;;  %v901_v40 = vsel %vm897_vm13, %v881_v36, %v884_v63 }
  0xc5   : > { %v708_v0 = vsel %vm701_vm1, %v704_v31, %v707_v21  ;;  %v920_v29 = vmul.u32 %v916_v59, %v915_v41  ;;  %v902_v19 = vsel %vm900_vm15, %v890_v37, 2102212464  ;;  %v921_v9 = vmul.u32 %v917_v3, %v915_v41 }
  0xc6   : > { %v709_v27 = vsel %vm698_vm5, nan, %v708_v0  ;;  %v2862_v38 = vadd.s32 4294967294, %v816_v13  ;;  %v922_v61 = vshll.u32 %v919_v1, 16  ;;  %v834_v62 = vsub.s32 4, %v3717_v15 }
  0xc7   : > { %2727 = vst [vmem:[%s3579_s15 + $0x10] sm:$0xff] %v709_v27  ;;  %v924_v8 = vshll.u32 %v920_v29, 16  ;;  %v940_v7 = vmul.u32 %v938_v2, %v914_v28  ;;  %v942_v42 = vmul.u32 %v938_v2, %v915_v41  ;;  %vm3760_vm7 = vcmp.le.f32.partialorder %v710_v10, 0.7853982 }
  0xc8   : > { %vm2863_vm8 = vcmp.lt.s32.totalorder %v2862_v38, 0  ;;  %vm926_vm9 = vc.u32 %v918_v34, %v922_v61  ;;  %v928_v57 = vadd.s32 %v922_v61, %v918_v34  ;;  %v944_v63 = vshll.u32 %v3746_v30, 16 }
  0xc9   : > { %v819_v37 = vsel %vm2863_vm8, 0, %v2862_v38  ;;  %v903_v4 = vsel %vm899_vm14, %v3708_v39, %v902_v19  ;;  %v927_v25 = vsel %vm926_vm9, 1, %v3147_v11  ;;  %v943_v33 = vmul.u32 %v939_v12, %v915_v41 }
  0xca   : > { %v820_v28 = vsub.s32 32, %v819_v37  ;;  %v821_v36 = vshll.u32 %v812_v14, %v819_v37  ;;  %v824_v17 = vsub.s32 4294967266, %v819_v37  ;;  %v929_v10 = vadd.s32 %v927_v25, %v921_v9 }
  0xcb   : > { %v835_v6 = vsel %vm712_vm6, %v834_v62, %v3717_v15  ;;  %v923_v21 = vshrl.u32 %v919_v1, 16  ;;  %vm930_vm10 = vc.u32 %v928_v57, %v924_v8  ;;  %v946_v16 = vshll.u32 %v942_v42, 16 }
  0xcc   : > { %v822_v59 = vshrl.u32 %v804_v43, %v820_v28  ;;  %v825_v3 = vadd.s32 127, %v824_v17  ;;  %v931_v31 = vsel %vm930_vm10, 1, %v3147_v11  ;;  %vm948_vm11 = vc.u32 %v940_v7, %v944_v63 }
  0xcd   : > { %v925_v39 = vshrl.u32 %v920_v29, 16  ;;  %v933_v58 = vadd.s32 %v931_v31, %v929_v10  ;;  %v949_v41 = vsel %vm948_vm11, 1, %v3147_v11  ;;  %v950_v12 = vadd.s32 %v944_v63, %v940_v7 }
  0xce   : > { %v823_v14 = vor.u32 %v822_v59, %v821_v36  ;;  %v826_v2 = vshll.u32 %v825_v3, 23  ;;  %v951_v0 = vadd.s32 %v949_v41, %v943_v33  ;;  %v1023_v13 = vand.u32 2139095040, %v3258_v46 }
  0xcf   : > { %v934_v34 = vadd.s32 %v933_v58, %v923_v21  ;;  %v945_v15 = vshrl.u32 %v3746_v30, 16  ;;  %vm952_vm12 = vc.u32 %v950_v12, %v946_v16  ;;  %v1020_v1 = vand.u32 2147483647, %v3258_v46 }
  0xd0   : > { %v827_v27 = vor.u32 4788187, %v826_v2  ;;  %v830_v43 = vcvt.s32.f32 %v823_v14  ;;  %v953_v38 = vsel %vm952_vm12, 1, %v3147_v11  ;;  %v1024_v29 = vshrl.u32 %v1023_v13, 23 }
  0xd1   : > { %v837_v19 = vsel %vm3760_vm7, 0, %v835_v6  ;;  %v904_v9 = vsel %vm898_vm0, %v901_v40, %v903_v4  ;;  %v947_v61 = vshrl.u32 %v942_v42, 16  ;;  %v955_v62 = vadd.s32 %v953_v38, %v951_v0 }
  0xd2   : > { %v828_v8 = vand.u32 2147483647, %v827_v27  ;;  %v935_v7 = vadd.s32 %v934_v34, %v925_v39  ;;  %v954_v57 = vadd.s32 %v950_v12, %v946_v16  ;;  %v2867_v30 = vadd.s32 4294967169, %v1024_v29 }
  0xd3   : > { %v956_v63 = vadd.s32 %v955_v62, %v945_v15  ;;  %v854_v33 = vadd.s32 3, %v837_v19  ;;  %v958_v36 = vmul.u32 %v3715_v5, %v904_v9  ;;  %v1027_v10 = vand.u32 8388607, %v1020_v1 }
  0xd4   : > { %v831_v37 = vmul.f32 %v830_v43, %v828_v8  ;;  %v1030_v25 = vadd.s32 1, %v2867_v30  ;;  %vm960_vm13 = vc.u32 %v935_v7, %v954_v57  ;;  %v1175_v41 = vand.u32 2147483647, %v3260_v47 }
  0xd5   : > { %v957_v28 = vadd.s32 %v956_v63, %v947_v61  ;;  %v3792_v21 = vand.u32 3, %v854_v33  ;;  %v1028_v3 = vor.u32 8388608, %v1027_v10  ;;  %v1178_v60 = vand.u32 2139095040, %v3260_v47 }
  0xd6   : > { %v832_v17 = vxor.u32 2147483648, %v831_v37  ;;  %vm1031_vm14 = vcmp.gt.s32.totalorder %v1030_v25, 0  ;;  %v3813_v9 = vadd.s32 %v954_v57, %v935_v7  ;;  %vm867_vm2 = vcmp.lt.s32.totalorder %v3256_v45, 0 }
  0xd7   : > { %v961_v32 = vadd.s32 1, %v957_v28  ;;  %v1032_v40 = vsel %vm1031_vm14, %v1030_v25, 0  ;;  %vm860_vm15 = vcmp.eq.s32.totalorder %v3792_v21, 2  ;;  %v3818_v8 = vshll.u32 %v1028_v3, 8 }
  0xd8   : > { %v833_v42 = vsel %vm712_vm6, %v832_v17, %v831_v37  ;;  %v1034_v4 = vand.u32 31, %v1032_v40  ;;  %v3815_v61 = vshrl.u32 %v1032_v40, 5  ;;  %v1179_v25 = vshrl.u32 %v1178_v60, 23 }
  0xd9   : > { %v3790_v6 = vsel %vm3760_vm7, %v3254_v44, %v833_v42  ;;  %v962_v5 = vsel %vm960_vm13, %v961_v32, %v957_v28  ;;  %vm857_vm0 = vcmp.eq.s32.totalorder %v3792_v21, 0  ;;  %vm856_vm1 = vcmp.lt.s32.totalorder %v3792_v21, 2 }
  0xda   : > { %v838_v16 = vmul.f32 %v3790_v6, %v3790_v6  ;;  %v963_v59 = vadd.s32 %v962_v5, %v958_v36  ;;  %v3796_v31 = vsub.s32 32, %v1034_v4  ;;  %v1037_v39 = vshll.u32 %v3141_v18, %v1034_v4 }
  0xdb   : > { %v1040_v58 = vshll.u32 %v3142_v20, %v1034_v4  ;;  %v1043_v0 = vshll.u32 %v3143_v22, %v1034_v4  ;;  %v1046_v27 = vshll.u32 %v3144_v24, %v1034_v4  ;;  %v1049_v62 = vshll.u32 %v3145_v26, %v1034_v4 }
  0xdc   : > { %v839_v12 = vmul.f32 -0.001358992, %v838_v16  ;;  %v846_v14 = vmul.f32 -0.00019511016, %v838_v16  ;;  %v964_v2 = vadd.s32 536870912, %v963_v59  ;;  %v1038_v13 = vshrl.u32 %v3142_v20, %v3796_v31 }
  0xdd   : > { %v1041_v34 = vshrl.u32 %v3143_v22, %v3796_v31  ;;  %v1044_v15 = vshrl.u32 %v3144_v24, %v3796_v31  ;;  %v1047_v19 = vshrl.u32 %v3145_v26, %v3796_v31  ;;  %v1050_v7 = vshrl.u32 %v3146_v35, %v3796_v31 }
  0xde   : > { %v840_v43 = vadd.f32 0.041655596, %v839_v12  ;;  %v847_v38 = vadd.f32 0.008332121, %v846_v14  ;;  %v965_v29 = vshrl.u32 %v964_v2, 30  ;;  %v3821_v33 = vor.u32 %v1038_v13, %v1037_v39 }
  0xdf   : > { %v3823_v28 = vor.u32 %v1041_v34, %v1040_v58  ;;  %v1048_v36 = vor.u32 %v1047_v19, %v1046_v27  ;;  %v1045_v32 = vor.u32 %v1044_v15, %v1043_v0  ;;  %vm853_vm3 = vweird.f32 %v3254_v44 }
  0xe0   : > { %v841_v30 = vmul.f32 %v840_v43, %v838_v16  ;;  %v848_v63 = vmul.f32 %v847_v38, %v838_v16  ;;  %v966_v37 = vshll.u32 %v965_v29, 30  ;;  %v1051_v40 = vor.u32 %v1050_v7, %v1049_v62 }
  0xe1   : > { %vm1052_vm4 = vcmp.lt.s32.totalorder %v3815_v61, 1  ;;  %vm1054_vm5 = vcmp.lt.s32.totalorder %v3815_v61, 3  ;;  %vm1055_vm6 = vcmp.lt.s32.totalorder %v3815_v61, 4  ;;  %vm3835_vm8 = vcmp.le.f32.partialorder %v865_v23, 0.7853982 }
  0xe2   : > { %v842_v57 = vadd.f32 -0.4999988, %v841_v30  ;;  %v849_v17 = vadd.f32 -0.16666654, %v848_v63  ;;  %v967_v10 = vsub.s32 %v963_v59, %v966_v37  ;;  %vm1053_vm9 = vcmp.lt.s32.totalorder %v3815_v61, 2 }
  0xe3   : > { %v1061_v59 = vsel %vm1055_vm6, %v1048_v36, 920167782  ;;  %v2870_v39 = vadd.s32 4294967169, %v1179_v25  ;;  %v3844_v58 = vand.u32 8388607, %v1175_v41  ;;  %v1060_v23 = vsel %vm1052_vm4, %v3821_v33, %v3823_v28 }
  0xe4   : > { %v843_v42 = vmul.f32 %v842_v57, %v838_v16  ;;  %v850_v4 = vmul.f32 %v849_v17, %v838_v16  ;;  %vm968_vm7 = vcmp.lt.s32.totalorder %v967_v10, 0  ;;  %v969_v5 = vsub.s32 0, %v967_v10 }
  0xe5   : > { %v989_v2 = vsub.s32 4, %v965_v29  ;;  %v1062_v0 = vsel %vm1054_vm5, %v1045_v32, %v1061_v59  ;;  %v1064_v13 = vsel %vm1052_vm4, %v3823_v28, %v1045_v32  ;;  %v1065_v27 = vsel %vm1055_vm6, %v1051_v40, 1326507024 }
  0xe6   : > { %v844_v60 = vadd.f32 1.0, %v843_v42  ;;  %v851_v16 = vadd.f32 1.0, %v850_v4  ;;  %v970_v12 = vsel %vm968_vm7, %v969_v5, %v967_v10  ;;  %v1069_v43 = vand.u32 65535, %v3818_v8 }
  0xe7   : > { %v971_v14 = vclz %v970_v12  ;;  %v1063_v19 = vsel %vm1053_vm9, %v1060_v23, %v1062_v0  ;;  %v1066_v62 = vsel %vm1054_vm5, %v1048_v36, %v1065_v27  ;;  %v1070_v30 = vshrl.u32 %v3818_v8, 16 }
  0xe8   : > { %v852_v34 = vmul.f32 %v851_v16, %v3790_v6  ;;  %v861_v15 = vxor.u32 2147483648, %v844_v60  ;;  %v1067_v6 = vsel %vm1053_vm9, %v1064_v13, %v1066_v62  ;;  %v1185_v25 = vadd.s32 1, %v2870_v39 }
  0xe9   : > { %v2865_v38 = vadd.s32 4294967294, %v971_v14  ;;  %v990_v7 = vsel %vm867_vm2, %v989_v2, %v965_v29  ;;  %v1071_v57 = vand.u32 65535, %v1067_v6  ;;  %v1072_v17 = vshrl.u32 %v1067_v6, 16 }
  0xea   : > { %v858_v63 = vxor.u32 2147483648, %v852_v34  ;;  %v862_v37 = vsel %vm860_vm15, %v861_v15, %v852_v34  ;;  %v1093_v42 = vand.u32 65535, %v1063_v19  ;;  %v1094_v4 = vshrl.u32 %v1063_v19, 16 }
  0xeb   : > { %vm2866_vm10 = vcmp.lt.s32.totalorder %v2865_v38, 0  ;;  %v992_v29 = vsel %vm3835_vm8, 0, %v990_v7  ;;  %v1036_v23 = vshrl.u32 %v3141_v18, %v3796_v31  ;;  %v1073_v21 = vmul.u32 %v1071_v57, %v1069_v43 }
  0xec   : > { %v859_v40 = vsel %vm857_vm0, %v844_v60, %v858_v63  ;;  %v974_v36 = vsel %vm2866_vm10, 0, %v2865_v38  ;;  %v1057_v60 = vsel %vm1055_vm6, %v1045_v32, 2102212464  ;;  %v1074_v0 = vmul.u32 %v1072_v17, %v1069_v43 }
  0xed   : > { %v863_v5 = vsel %vm856_vm1, %v859_v40, %v862_v37  ;;  %v975_v59 = vsub.s32 32, %v974_v36  ;;  %v976_v16 = vshll.u32 %v967_v10, %v974_v36  ;;  %v979_v12 = vsub.s32 4294967266, %v974_v36 }
  0xee   : > { %v864_v39 = vsel %vm853_vm3, nan, %v863_v5  ;;  %v1075_v10 = vmul.u32 %v1071_v57, %v1070_v30  ;;  %v1095_v13 = vmul.u32 %v1093_v42, %v1069_v43  ;;  %v1096_v34 = vmul.u32 %v1094_v4, %v1069_v43 }
  0xef   : > { %v977_v14 = vshrl.u32 %v3813_v9, %v975_v59  ;;  %v980_v2 = vadd.s32 127, %v979_v12  ;;  %2728 = vst [vmem:[%s3579_s15 + $0x18] sm:$0xff] %v864_v39  ;;  %v1097_v44 = vmul.u32 %v1093_v42, %v1070_v30  ;;  %v1076_v38 = vmul.u32 %v1072_v17, %v1070_v30 }
  0xf0   : > { %v1077_v19 = vshll.u32 %v1074_v0, 16  ;;  %v1056_v31 = vsel %vm1052_vm4, %v1036_v23, %v3821_v33  ;;  %v1079_v62 = vshll.u32 %v1075_v10, 16  ;;  %v1098_v32 = vmul.u32 %v1094_v4, %v1070_v30 }
  0xf1   : > { %v978_v15 = vor.u32 %v977_v14, %v976_v16  ;;  %v981_v27 = vshll.u32 %v980_v2, 23  ;;  %v1099_v63 = vshll.u32 %v1096_v34, 16  ;;  %v1058_v43 = vsel %vm1054_vm5, %v3823_v28, %v1057_v60 }
  0xf2   : > { %vm1081_vm11 = vc.u32 %v1073_v21, %v1077_v19  ;;  %v1083_v6 = vadd.s32 %v1077_v19, %v1073_v21  ;;  %v1078_v7 = vshrl.u32 %v1074_v0, 16  ;;  %v1101_v17 = vshll.u32 %v1097_v44, 16 }
  0xf3   : > { %v982_v9 = vor.u32 4788187, %v981_v27  ;;  %v985_v37 = vcvt.s32.f32 %v978_v15  ;;  %v1082_v57 = vsel %vm1081_vm11, 1, %v3147_v11  ;;  %vm1103_vm13 = vc.u32 %v1095_v13, %v1099_v63 }
  0xf4   : > { %v1084_v36 = vadd.s32 %v1082_v57, %v1076_v38  ;;  %vm1085_vm12 = vc.u32 %v1083_v6, %v1079_v62  ;;  %v1080_v33 = vshrl.u32 %v1075_v10, 16  ;;  %v1104_v42 = vsel %vm1103_vm13, 1, %v3147_v11 }
  0xf5   : > { %v983_v40 = vand.u32 2147483647, %v982_v9  ;;  %v1086_v30 = vsel %vm1085_vm12, 1, %v3147_v11  ;;  %v1105_v4 = vadd.s32 %v1099_v63, %v1095_v13  ;;  %v1106_v16 = vadd.s32 %v1104_v42, %v1098_v32 }
  0xf6   : > { %v1088_v59 = vadd.s32 %v1086_v30, %v1084_v36  ;;  %vm1186_vm14 = vcmp.gt.s32.totalorder %v1185_v25, 0  ;;  %v1059_v28 = vsel %vm1053_vm9, %v1056_v31, %v1058_v43  ;;  %v1100_v12 = vshrl.u32 %v1096_v34, 16 }
  0xf7   : > { %v986_v5 = vmul.f32 %v985_v37, %v983_v40  ;;  %vm1107_vm15 = vc.u32 %v1105_v4, %v1101_v17  ;;  %v1187_v39 = vsel %vm1186_vm14, %v1185_v25, 0  ;;  %v1009_v60 = vadd.s32 3, %v992_v29 }
  0xf8   : > { %v1089_v14 = vadd.s32 %v1088_v59, %v1078_v7  ;;  %v1108_v2 = vsel %vm1107_vm15, 1, %v3147_v11  ;;  %v1102_v21 = vshrl.u32 %v1097_v44, 16  ;;  %v3896_v0 = vadd.s32 %v1105_v4, %v1101_v17 }
  0xf9   : > { %v987_v23 = vxor.u32 2147483648, %v986_v5  ;;  %v1110_v10 = vadd.s32 %v1108_v2, %v1106_v16  ;;  %v1189_v13 = vand.u32 31, %v1187_v39  ;;  %v1183_v29 = vor.u32 8388608, %v3844_v58 }
  0xfa   : > { %v3900_v27 = vadd.s32 %v1089_v14, %v1080_v33  ;;  %v3906_v19 = vand.u32 3, %v1009_v60  ;;  %v1113_v44 = vmul.u32 %v3818_v8, %v1059_v28  ;;  %v3909_v31 = vshrl.u32 %v1187_v39, 5 }
  0xfb   : > { %v988_v15 = vsel %vm867_vm2, %v987_v23, %v986_v5  ;;  %v1111_v25 = vadd.s32 %v1110_v10, %v1100_v12  ;;  %v1190_v34 = vsub.s32 32, %v1189_v13  ;;  %v1192_v32 = vshll.u32 %v3141_v18, %v1189_v13 }
  0xfc   : > { %v991_v61 = vsel %vm3835_vm8, %v3256_v45, %v988_v15  ;;  %vm1115_vm0 = vc.u32 %v3900_v27, %v3896_v0  ;;  %v1195_v58 = vshll.u32 %v3142_v20, %v1189_v13  ;;  %v1198_v43 = vshll.u32 %v3143_v22, %v1189_v13 }
  0xfd   : > { %v993_v38 = vmul.f32 %v991_v61, %v991_v61  ;;  %v1112_v62 = vadd.s32 %v1111_v25, %v1102_v21  ;;  %v1193_v3 = vshrl.u32 %v3142_v20, %v1190_v34  ;;  %v1196_v37 = vshrl.u32 %v3143_v22, %v1190_v34 }
  0xfe   : > { %v1199_v8 = vshrl.u32 %v3144_v24, %v1190_v34  ;;  %v1201_v7 = vshll.u32 %v3144_v24, %v1189_v13  ;;  %v1202_v40 = vshrl.u32 %v3145_v26, %v1190_v34  ;;  %vm1207_vm1 = vcmp.lt.s32.totalorder %v3909_v31, 1 }
  0xff   : > { %v994_v63 = vmul.f32 -0.001358992, %v993_v38  ;;  %v1001_v9 = vmul.f32 -0.00019511016, %v993_v38  ;;  %v1116_v6 = vadd.s32 1, %v1112_v62  ;;  %v1194_v33 = vor.u32 %v1193_v3, %v1192_v32 }
 0x100   : > { %v1204_v30 = vshll.u32 %v3145_v26, %v1189_v13  ;;  %v1205_v42 = vshrl.u32 %v3146_v35, %v1190_v34  ;;  %v1197_v16 = vor.u32 %v1196_v37, %v1195_v58  ;;  %v1200_v28 = vor.u32 %v1199_v8, %v1198_v43 }
 0x101   : > { %v995_v57 = vadd.f32 0.041655596, %v994_v63  ;;  %v1002_v17 = vadd.f32 0.008332121, %v1001_v9  ;;  %v1117_v36 = vsel %vm1115_vm0, %v1116_v6, %v1112_v62  ;;  %v1203_v12 = vor.u32 %v1202_v40, %v1201_v7 }
 0x102   : > { %v1118_v59 = vadd.s32 %v1117_v36, %v1113_v44  ;;  %v1206_v39 = vor.u32 %v1205_v42, %v1204_v30  ;;  %vm1210_vm2 = vcmp.lt.s32.totalorder %v3909_v31, 4  ;;  %vm1209_vm3 = vcmp.lt.s32.totalorder %v3909_v31, 3 }
 0x103   : > { %v996_v4 = vmul.f32 %v995_v57, %v993_v38  ;;  %v1003_v5 = vmul.f32 %v1002_v17, %v993_v38  ;;  %vm1208_vm4 = vcmp.lt.s32.totalorder %v3909_v31, 2  ;;  %v1216_v2 = vsel %vm1210_vm2, %v1203_v12, 920167782 }
 0x104   : > { %v1119_v14 = vadd.s32 536870912, %v1118_v59  ;;  %v3929_v21 = vshll.u32 %v1183_v29, 8  ;;  %v1215_v25 = vsel %vm1207_vm1, %v1194_v33, %v1197_v16  ;;  %vm1011_vm5 = vcmp.lt.s32.totalorder %v3906_v19, 2 }
 0x105   : > { %v997_v23 = vadd.f32 -0.4999988, %v996_v4  ;;  %v1004_v60 = vadd.f32 -0.16666654, %v1003_v5  ;;  %v1217_v44 = vsel %vm1209_vm3, %v1200_v28, %v1216_v2  ;;  %v1220_v62 = vsel %vm1210_vm2, %v1206_v39, 1326507024 }
 0x106   : > { %v3931_v15 = vshrl.u32 %v1119_v14, 30  ;;  %vm1012_vm6 = vcmp.eq.s32.totalorder %v3906_v19, 0  ;;  %vm1015_vm7 = vcmp.eq.s32.totalorder %v3906_v19, 2  ;;  %v1218_v63 = vsel %vm1208_vm4, %v1215_v25, %v1217_v44 }
 0x107   : > { %v998_v10 = vmul.f32 %v997_v23, %v993_v38  ;;  %v1005_v13 = vmul.f32 %v1004_v60, %v993_v38  ;;  %v1219_v38 = vsel %vm1207_vm1, %v1197_v16, %v1200_v28  ;;  %v1221_v9 = vsel %vm1209_vm3, %v1203_v12, %v1220_v62 }
 0x108   : > { %v1121_v29 = vshll.u32 %v3931_v15, 30  ;;  %v1224_v43 = vand.u32 65535, %v3929_v21  ;;  %v1191_v8 = vshrl.u32 %v3141_v18, %v1190_v34  ;;  %v1222_v7 = vsel %vm1208_vm4, %v1219_v38, %v1221_v9 }
 0x109   : > { %v999_v32 = vadd.f32 1.0, %v998_v10  ;;  %v1006_v3 = vadd.f32 1.0, %v1005_v13  ;;  %v1225_v57 = vshrl.u32 %v3929_v21, 16  ;;  %v1249_v17 = vshrl.u32 %v1218_v63, 16 }
 0x10a   : > { %v1122_v6 = vsub.s32 %v1118_v59, %v1121_v29  ;;  %vm1008_vm9 = vweird.f32 %v3256_v45  ;;  %vm1022_vm10 = vcmp.lt.s32.totalorder %v3258_v46, 0  ;;  %v1226_v42 = vand.u32 65535, %v1222_v7 }
 0x10b   : > { %v1007_v58 = vmul.f32 %v1006_v3, %v991_v61  ;;  %v1016_v37 = vxor.u32 2147483648, %v999_v32  ;;  %v1212_v61 = vsel %vm1210_vm2, %v1200_v28, 2102212464  ;;  %v1227_v4 = vshrl.u32 %v1222_v7, 16 }
 0x10c   : > { %vm1123_vm8 = vcmp.lt.s32.totalorder %v1122_v6, 0  ;;  %v1124_v30 = vsub.s32 0, %v1122_v6  ;;  %v1248_v59 = vand.u32 65535, %v1218_v63  ;;  %v3960_v12 = vmul.u32 %v1249_v17, %v1224_v43 }
 0x10d   : > { %v1013_v40 = vxor.u32 2147483648, %v1007_v58  ;;  %v1017_v36 = vsel %vm1015_vm7, %v1016_v37, %v1007_v58  ;;  %v1228_v45 = vmul.u32 %v1226_v42, %v1224_v43  ;;  %v1229_v60 = vmul.u32 %v1227_v4, %v1224_v43 }
 0x10e   : > { %v1125_v5 = vsel %vm1123_vm8, %v1124_v30, %v1122_v6  ;;  %v1114_v28 = vadd.s32 %v3896_v0, %v3900_v27  ;;  %v1211_v2 = vsel %vm1207_vm1, %v1191_v8, %v1194_v33  ;;  %v1230_v10 = vmul.u32 %v1226_v42, %v1225_v57 }
 0x10f   : > { %v1014_v34 = vsel %vm1012_vm6, %v999_v32, %v1013_v40  ;;  %v1126_v23 = vclz %v1125_v5  ;;  %v1213_v25 = vsel %vm1209_vm3, %v1197_v16, %v1212_v61  ;;  %v1231_v44 = vmul.u32 %v1227_v4, %v1225_v57 }
 0x110   : > { %v1018_v39 = vsel %vm1011_vm5, %v1014_v34, %v1017_v36  ;;  %v1232_v62 = vshll.u32 %v1229_v60, 16  ;;  %v1144_v19 = vsub.s32 4, %v3931_v15  ;;  %v1234_v32 = vshll.u32 %v1230_v10, 16 }
 0x111   : > { %v1019_v14 = vsel %vm1008_vm9, nan, %v1018_v39  ;;  %v2868_v13 = vadd.s32 4294967294, %v1126_v23  ;;  %v1250_v3 = vmul.u32 %v1248_v59, %v1224_v43  ;;  %v1252_v29 = vmul.u32 %v1248_v59, %v1225_v57 }
 0x112   : > { %2729 = vst [vmem:[%s3579_s15 + $0x20] sm:$0xff] %v1019_v14  ;;  %vm3974_vm11 = vcmp.le.f32.partialorder %v1020_v1, 0.7853982  ;;  %vm1236_vm13 = vc.u32 %v1228_v45, %v1232_v62  ;;  %v1238_v27 = vadd.s32 %v1232_v62, %v1228_v45  ;;  %v1254_v33 = vshll.u32 %v3960_v12, 16 }
 0x113   : > { %vm2869_vm12 = vcmp.lt.s32.totalorder %v2868_v13, 0  ;;  %v1237_v38 = vsel %vm1236_vm13, 1, %v3147_v11  ;;  %v1253_v63 = vmul.u32 %v1249_v17, %v1225_v57  ;;  %v1333_v9 = vand.u32 2139095040, %v3262_v48 }
 0x114   : > { %v1129_v16 = vsel %vm2869_vm12, 0, %v2868_v13  ;;  %v1239_v8 = vadd.s32 %v1237_v38, %v1231_v44  ;;  %v1145_v1 = vsel %vm1022_vm10, %v1144_v19, %v3931_v15  ;;  %v1233_v7 = vshrl.u32 %v1229_v60, 16 }
 0x115   : > { %v1130_v58 = vsub.s32 32, %v1129_v16  ;;  %v1131_v37 = vshll.u32 %v1122_v6, %v1129_v16  ;;  %v1134_v43 = vsub.s32 4294967266, %v1129_v16  ;;  %vm1240_vm14 = vc.u32 %v1238_v27, %v1234_v32 }
 0x116   : > { %v1256_v40 = vshll.u32 %v1252_v29, 16  ;;  %v1241_v61 = vsel %vm1240_vm14, 1, %v3147_v11  ;;  %vm1258_vm15 = vc.u32 %v1250_v3, %v1254_v33  ;;  %v1260_v17 = vadd.s32 %v1254_v33, %v1250_v3 }
 0x117   : > { %v1132_v36 = vshrl.u32 %v1114_v28, %v1130_v58  ;;  %v1135_v30 = vadd.s32 127, %v1134_v43  ;;  %v1243_v42 = vadd.s32 %v1241_v61, %v1239_v8  ;;  %v1259_v57 = vsel %vm1258_vm15, 1, %v3147_v11 }
 0x118   : > { %v1334_v4 = vshrl.u32 %v1333_v9, 23  ;;  %v1235_v5 = vshrl.u32 %v1230_v10, 16  ;;  %v1261_v59 = vadd.s32 %v1259_v57, %v1253_v63  ;;  %v1255_v15 = vshrl.u32 %v3960_v12, 16 }
 0x119   : > { %v1133_v6 = vor.u32 %v1132_v36, %v1131_v37  ;;  %v1136_v34 = vshll.u32 %v1135_v30, 23  ;;  %v1244_v39 = vadd.s32 %v1243_v42, %v1233_v7  ;;  %vm1262_vm0 = vc.u32 %v1260_v17, %v1256_v40 }
 0x11a   : > { %v2873_v23 = vadd.s32 4294967169, %v1334_v4  ;;  %v1263_v14 = vsel %vm1262_vm0, 1, %v3147_v11  ;;  %v1330_v28 = vand.u32 2147483647, %v3262_v48  ;;  %v1147_v13 = vsel %vm3974_vm11, 0, %v1145_v1 }
 0x11b   : > { %v1137_v45 = vor.u32 4788187, %v1136_v34  ;;  %v1140_v60 = vcvt.s32.f32 %v1133_v6  ;;  %v1257_v44 = vshrl.u32 %v1252_v29, 16  ;;  %v1265_v62 = vadd.s32 %v1263_v14, %v1261_v59 }
 0x11c   : > { %v1340_v19 = vadd.s32 1, %v2873_v23  ;;  %v3991_v10 = vadd.s32 %v1244_v39, %v1235_v5  ;;  %v3993_v3 = vadd.s32 %v1260_v17, %v1256_v40  ;;  %v1214_v12 = vsel %vm1208_vm4, %v1211_v2, %v1213_v25 }
 0x11d   : > { %v1138_v32 = vand.u32 2147483647, %v1137_v45  ;;  %v1266_v27 = vadd.s32 %v1265_v62, %v1255_v15  ;;  %v1164_v16 = vadd.s32 3, %v1147_v13  ;;  %v1337_v38 = vand.u32 8388607, %v1330_v28 }
 0x11e   : > { %vm1341_vm1 = vcmp.gt.s32.totalorder %v1340_v19, 0  ;;  %v1268_v37 = vmul.u32 %v3929_v21, %v1214_v12  ;;  %vm1270_vm2 = vc.u32 %v3991_v10, %v3993_v3  ;;  %vm1163_vm9 = vweird.f32 %v3258_v46 }
 0x11f   : > { %v1141_v33 = vmul.f32 %v1140_v60, %v1138_v32  ;;  %v1342_v63 = vsel %vm1341_vm1, %v1340_v19, 0  ;;  %v1267_v9 = vadd.s32 %v1266_v27, %v1257_v44  ;;  %v4004_v2 = vand.u32 3, %v1164_v16 }
 0x120   : > { %v1344_v29 = vand.u32 31, %v1342_v63  ;;  %v1338_v25 = vor.u32 8388608, %v1337_v38  ;;  %v4011_v40 = vshrl.u32 %v1342_v63, 5  ;;  %v1488_v38 = vand.u32 2139095040, %v3264_v49 }
 0x121   : > { %v1142_v58 = vxor.u32 2147483648, %v1141_v33  ;;  %v1271_v43 = vadd.s32 1, %v1267_v9  ;;  %vm1170_vm3 = vcmp.eq.s32.totalorder %v4004_v2, 2  ;;  %vm1167_vm6 = vcmp.eq.s32.totalorder %v4004_v2, 0 }
 0x122   : > { %v1345_v8 = vsub.s32 32, %v1344_v29  ;;  %v1350_v21 = vshll.u32 %v3142_v20, %v1344_v29  ;;  %v1353_v61 = vshll.u32 %v3143_v22, %v1344_v29  ;;  %v1356_v42 = vshll.u32 %v3144_v24, %v1344_v29 }
 0x123   : > { %v1143_v31 = vsel %vm1022_vm10, %v1142_v58, %v1141_v33  ;;  %v1272_v7 = vsel %vm1270_vm2, %v1271_v43, %v1267_v9  ;;  %v1359_v4 = vshll.u32 %v3145_v26, %v1344_v29  ;;  %v1347_v59 = vshll.u32 %v3141_v18, %v1344_v29 }
 0x124   : > { %v4009_v1 = vsel %vm3974_vm11, %v3258_v46, %v1143_v31  ;;  %v1273_v30 = vadd.s32 %v1272_v7, %v1268_v37  ;;  %v1351_v57 = vshrl.u32 %v3143_v22, %v1345_v8  ;;  %v1354_v17 = vshrl.u32 %v3144_v24, %v1345_v8 }
 0x125   : > { %v1148_v36 = vmul.f32 %v4009_v1, %v4009_v1  ;;  %v1357_v0 = vshrl.u32 %v3145_v26, %v1345_v8  ;;  %v1348_v39 = vshrl.u32 %v3142_v20, %v1345_v8  ;;  %v1360_v15 = vshrl.u32 %v3146_v35, %v1345_v8 }
 0x126   : > { %v1274_v5 = vadd.s32 536870912, %v1273_v30  ;;  %v4025_v23 = vshll.u32 %v1338_v25, 8  ;;  %v4030_v44 = vor.u32 %v1351_v57, %v1350_v21  ;;  %v4032_v62 = vor.u32 %v1354_v17, %v1353_v61 }
 0x127   : > { %v1149_v6 = vmul.f32 -0.001358992, %v1148_v36  ;;  %v1156_v34 = vmul.f32 -0.00019511016, %v1148_v36  ;;  %v1358_v13 = vor.u32 %v1357_v0, %v1356_v42  ;;  %v1361_v19 = vor.u32 %v1360_v15, %v1359_v4 }
 0x128   : > { %v4027_v14 = vshrl.u32 %v1274_v5, 30  ;;  %vm1365_vm4 = vcmp.lt.s32.totalorder %v4011_v40, 4  ;;  %vm1362_vm5 = vcmp.lt.s32.totalorder %v4011_v40, 1  ;;  %v1349_v33 = vor.u32 %v1348_v39, %v1347_v59 }
 0x129   : > { %v1150_v45 = vadd.f32 0.041655596, %v1149_v6  ;;  %v1157_v60 = vadd.f32 0.008332121, %v1156_v34  ;;  %vm1364_vm7 = vcmp.lt.s32.totalorder %v4011_v40, 3  ;;  %v4040_v16 = vand.u32 65535, %v4025_v23 }
 0x12a   : > { %v1276_v27 = vshll.u32 %v4027_v14, 30  ;;  %vm1166_vm8 = vcmp.lt.s32.totalorder %v4004_v2, 2  ;;  %v1371_v58 = vsel %vm1365_vm4, %v1358_v13, 920167782  ;;  %vm1363_vm10 = vcmp.lt.s32.totalorder %v4011_v40, 2 }
 0x12b   : > { %v1151_v32 = vmul.f32 %v1150_v45, %v1148_v36  ;;  %v1158_v12 = vmul.f32 %v1157_v60, %v1148_v36  ;;  %v1374_v37 = vsel %vm1362_vm5, %v4030_v44, %v4032_v62  ;;  %v1375_v43 = vsel %vm1365_vm4, %v1361_v19, 1326507024 }
 0x12c   : > { %v4044_v29 = vsub.s32 %v1273_v30, %v1276_v27  ;;  %v1380_v31 = vshrl.u32 %v4025_v23, 16  ;;  %vm1177_vm12 = vcmp.lt.s32.totalorder %v3260_v47, 0  ;;  %v1346_v30 = vshrl.u32 %v3141_v18, %v1345_v8 }
 0x12d   : > { %v1152_v63 = vadd.f32 -0.4999988, %v1151_v32  ;;  %v1159_v9 = vadd.f32 -0.16666654, %v1158_v12  ;;  %v1370_v61 = vsel %vm1362_vm5, %v1349_v33, %v4030_v44  ;;  %v1372_v42 = vsel %vm1364_vm7, %v4032_v62, %v1371_v58 }
 0x12e   : > { %vm1278_vm11 = vcmp.lt.s32.totalorder %v4044_v29, 0  ;;  %v1279_v21 = vsub.s32 0, %v4044_v29  ;;  %v1376_v57 = vsel %vm1364_vm7, %v1358_v13, %v1375_v43  ;;  %v1485_v5 = vand.u32 2147483647, %v3264_v49 }
 0x12f   : > { %v1153_v25 = vmul.f32 %v1152_v63, %v1148_v36  ;;  %v1160_v7 = vmul.f32 %v1159_v9, %v1148_v36  ;;  %v1377_v4 = vsel %vm1363_vm10, %v1374_v37, %v1376_v57  ;;  %v1269_v15 = vadd.s32 %v3993_v3, %v3991_v10 }
 0x130   : > { %v1280_v0 = vsel %vm1278_vm11, %v1279_v21, %v4044_v29  ;;  %v1381_v8 = vand.u32 65535, %v1377_v4  ;;  %v1382_v34 = vshrl.u32 %v1377_v4, 16  ;;  %v1489_v45 = vshrl.u32 %v1488_v38, 23 }
 0x131   : > { %v1154_v36 = vadd.f32 1.0, %v1153_v25  ;;  %v1161_v17 = vadd.f32 1.0, %v1160_v7  ;;  %v1281_v6 = vclz %v1280_v0  ;;  %v1366_v13 = vsel %vm1362_vm5, %v1346_v30, %v1349_v33 }
 0x132   : > { %v1373_v19 = vsel %vm1363_vm10, %v1370_v61, %v1372_v42  ;;  %v1384_v32 = vmul.u32 %v1382_v34, %v4040_v16  ;;  %v1385_v63 = vmul.u32 %v1381_v8, %v1380_v31  ;;  %v1383_v10 = vmul.u32 %v1381_v8, %v4040_v16 }
 0x133   : > { %v1162_v59 = vmul.f32 %v1161_v17, %v4009_v1  ;;  %v1171_v39 = vxor.u32 2147483648, %v1154_v36  ;;  %v2871_v60 = vadd.s32 4294967294, %v1281_v6  ;;  %v1299_v1 = vsub.s32 4, %v4027_v14 }
 0x134   : > { %v1387_v3 = vshll.u32 %v1384_v32, 16  ;;  %v1403_v38 = vand.u32 65535, %v1373_v19  ;;  %v1386_v58 = vmul.u32 %v1382_v34, %v1380_v31  ;;  %v1404_v37 = vshrl.u32 %v1373_v19, 16 }
 0x135   : > { %v1168_v12 = vxor.u32 2147483648, %v1162_v59  ;;  %v1172_v27 = vsel %vm1170_vm3, %v1171_v39, %v1162_v59  ;;  %vm2872_vm13 = vcmp.lt.s32.totalorder %v2871_v60, 0  ;;  %vm4094_vm14 = vcmp.le.f32.partialorder %v1175_v41, 0.7853982 }
 0x136   : > { %v1284_v9 = vsel %vm2872_vm13, 0, %v2871_v60  ;;  %v1300_v42 = vsel %vm1177_vm12, %v1299_v1, %v4027_v14  ;;  %v1367_v2 = vsel %vm1365_vm4, %v4032_v62, 2102212464  ;;  %v1389_v57 = vshll.u32 %v1385_v63, 16 }
 0x137   : > { %v1169_v33 = vsel %vm1167_vm6, %v1154_v36, %v1168_v12  ;;  %v1285_v25 = vsub.s32 32, %v1284_v9  ;;  %v1286_v7 = vshll.u32 %v4044_v29, %v1284_v9  ;;  %v1289_v21 = vsub.s32 4294967266, %v1284_v9 }
 0x138   : > { %v1173_v43 = vsel %vm1166_vm8, %v1169_v33, %v1172_v27  ;;  %vm1391_vm15 = vc.u32 %v1383_v10, %v1387_v3  ;;  %v2876_v46 = vadd.s32 4294967169, %v1489_v45  ;;  %v1393_v41 = vadd.s32 %v1387_v3, %v1383_v10 }
 0x139   : > { %v1174_v30 = vsel %vm1163_vm9, nan, %v1173_v43  ;;  %v1287_v29 = vshrl.u32 %v1269_v15, %v1285_v25  ;;  %v1290_v36 = vadd.s32 127, %v1289_v21  ;;  %v1392_v17 = vsel %vm1391_vm15, 1, %v3147_v11 }
 0x13a   : > { %2730 = vst [vmem:[%s3579_s15 + $0x28] sm:$0xff] %v1174_v30  ;;  %v1405_v0 = vmul.u32 %v1403_v38, %v4040_v16  ;;  %v1406_v4 = vmul.u32 %v1404_v37, %v4040_v16  ;;  %v1394_v14 = vadd.s32 %v1392_v17, %v1386_v58  ;;  %v1407_v34 = vmul.u32 %v1403_v38, %v1380_v31 }
 0x13b   : > { %v1288_v6 = vor.u32 %v1287_v29, %v1286_v7  ;;  %v1291_v8 = vshll.u32 %v1290_v36, 23  ;;  %v1388_v59 = vshrl.u32 %v1384_v32, 16  ;;  %vm1395_vm0 = vc.u32 %v1393_v41, %v1389_v57 }
 0x13c   : > { %v1408_v62 = vmul.u32 %v1404_v37, %v1380_v31  ;;  %v1409_v39 = vshll.u32 %v1406_v4, 16  ;;  %v1396_v45 = vsel %vm1395_vm0, 1, %v3147_v11  ;;  %v1411_v19 = vshll.u32 %v1407_v34, 16 }
 0x13d   : > { %v1292_v15 = vor.u32 4788187, %v1291_v8  ;;  %v1295_v60 = vcvt.s32.f32 %v1288_v6  ;;  %v1368_v12 = vsel %vm1364_vm7, %v4030_v44, %v1367_v2  ;;  %v1398_v27 = vadd.s32 %v1396_v45, %v1394_v14 }
 0x13e   : > { %vm1413_vm1 = vc.u32 %v1405_v0, %v1409_v39  ;;  %v1415_v16 = vadd.s32 %v1409_v39, %v1405_v0  ;;  %v1390_v10 = vshrl.u32 %v1385_v63, 16  ;;  %v1495_v32 = vadd.s32 1, %v2876_v46 }
 0x13f   : > { %v1293_v1 = vand.u32 2147483647, %v1292_v15  ;;  %v1414_v3 = vsel %vm1413_vm1, 1, %v3147_v11  ;;  %v1399_v38 = vadd.s32 %v1398_v27, %v1388_v59  ;;  %v1410_v31 = vshrl.u32 %v1406_v4, 16 }
 0x140   : > { %v1416_v33 = vadd.s32 %v1414_v3, %v1408_v62  ;;  %vm1417_vm2 = vc.u32 %v1415_v16, %v1411_v19  ;;  %v1302_v58 = vsel %vm4094_vm14, 0, %v1300_v42  ;;  %vm1496_vm3 = vcmp.gt.s32.totalorder %v1495_v32, 0 }
 0x141   : > { %v1296_v9 = vmul.f32 %v1295_v60, %v1293_v1  ;;  %v1418_v37 = vsel %vm1417_vm2, 1, %v3147_v11  ;;  %v1369_v44 = vsel %vm1363_vm10, %v1366_v13, %v1368_v12  ;;  %v1412_v43 = vshrl.u32 %v1407_v34, 16 }
 0x142   : > { %v1420_v25 = vadd.s32 %v1418_v37, %v1416_v33  ;;  %v1497_v63 = vsel %vm1496_vm3, %v1495_v32, 0  ;;  %v4118_v21 = vadd.s32 %v1399_v38, %v1390_v10  ;;  %v4120_v30 = vadd.s32 %v1415_v16, %v1411_v19 }
 0x143   : > { %v1297_v7 = vxor.u32 2147483648, %v1296_v9  ;;  %v1499_v2 = vand.u32 31, %v1497_v63  ;;  %v1423_v42 = vmul.u32 %v4025_v23, %v1369_v44  ;;  %v1492_v36 = vand.u32 8388607, %v1485_v5 }
 0x144   : > { %v1421_v57 = vadd.s32 %v1420_v25, %v1410_v31  ;;  %v1319_v46 = vadd.s32 3, %v1302_v58  ;;  %v4132_v41 = vshrl.u32 %v1497_v63, 5  ;;  %vm1425_vm4 = vc.u32 %v4118_v21, %v4120_v30 }
 0x145   : > { %v1298_v29 = vsel %vm1177_vm12, %v1297_v7, %v1296_v9  ;;  %v4127_v40 = vsub.s32 32, %v1499_v2  ;;  %v1505_v4 = vshll.u32 %v3142_v20, %v1499_v2  ;;  %v1511_v23 = vshll.u32 %v3144_v24, %v1499_v2 }
 0x146   : > { %v1301_v13 = vsel %vm4094_vm14, %v3260_v47, %v1298_v29  ;;  %v1422_v17 = vadd.s32 %v1421_v57, %v1412_v43  ;;  %v1514_v14 = vshll.u32 %v3145_v26, %v1499_v2  ;;  %v1508_v62 = vshll.u32 %v3143_v22, %v1499_v2 }
 0x147   : > { %v1303_v0 = vmul.f32 %v1301_v13, %v1301_v13  ;;  %v1506_v8 = vshrl.u32 %v3143_v22, %v4127_v40  ;;  %v1512_v61 = vshrl.u32 %v3145_v26, %v4127_v40  ;;  %v1509_v39 = vshrl.u32 %v3144_v24, %v4127_v40 }
 0x148   : > { %v1426_v6 = vadd.s32 1, %v1422_v17  ;;  %v1502_v60 = vshll.u32 %v3141_v18, %v1499_v2  ;;  %v1503_v45 = vshrl.u32 %v3142_v20, %v4127_v40  ;;  %v1515_v19 = vshrl.u32 %v3146_v35, %v4127_v40 }
 0x149   : > { %v1304_v34 = vmul.f32 -0.001358992, %v1303_v0  ;;  %v1311_v59 = vmul.f32 -0.00019511016, %v1303_v0  ;;  %v1320_v16 = vand.u32 3, %v1319_v46  ;;  %v1493_v10 = vor.u32 8388608, %v1492_v36 }
 0x14a   : > { %v1427_v15 = vsel %vm1425_vm4, %v1426_v6, %v1422_v17  ;;  %v4151_v3 = vor.u32 %v1506_v8, %v1505_v4  ;;  %v1513_v32 = vor.u32 %v1512_v61, %v1511_v23  ;;  %v1516_v38 = vor.u32 %v1515_v19, %v1514_v14 }
 0x14b   : > { %v1305_v12 = vadd.f32 0.041655596, %v1304_v34  ;;  %v1312_v27 = vadd.f32 0.008332121, %v1311_v59  ;;  %v1428_v1 = vadd.s32 %v1427_v15, %v1423_v42  ;;  %v1510_v58 = vor.u32 %v1509_v39, %v1508_v62 }
 0x14c   : > { %v1504_v37 = vor.u32 %v1503_v45, %v1502_v60  ;;  %vm1517_vm5 = vcmp.lt.s32.totalorder %v4132_v41, 1  ;;  %vm1520_vm6 = vcmp.lt.s32.totalorder %v4132_v41, 4  ;;  %vm1321_vm7 = vcmp.lt.s32.totalorder %v1320_v16, 2 }
 0x14d   : > { %v1306_v31 = vmul.f32 %v1305_v12, %v1303_v0  ;;  %v1313_v33 = vmul.f32 %v1312_v27, %v1303_v0  ;;  %v1429_v9 = vadd.s32 536870912, %v1428_v1  ;;  %vm1519_vm8 = vcmp.lt.s32.totalorder %v4132_v41, 3 }
 0x14e   : > { %vm1318_vm9 = vweird.f32 %v3260_v47  ;;  %vm1518_vm10 = vcmp.lt.s32.totalorder %v4132_v41, 2  ;;  %v1526_v63 = vsel %vm1520_vm6, %v1513_v32, 920167782  ;;  %v1530_v7 = vsel %vm1520_vm6, %v1516_v38, 1326507024 }
 0x14f   : > { %v1307_v44 = vadd.f32 -0.4999988, %v1306_v31  ;;  %v1314_v43 = vadd.f32 -0.16666654, %v1313_v33  ;;  %v4155_v25 = vshrl.u32 %v1429_v9, 30  ;;  %v4164_v2 = vshll.u32 %v1493_v10, 8 }
 0x150   : > { %v1529_v36 = vsel %vm1517_vm5, %v4151_v3, %v1510_v58  ;;  %vm1322_vm11 = vcmp.eq.s32.totalorder %v1320_v16, 0  ;;  %vm1325_vm12 = vcmp.eq.s32.totalorder %v1320_v16, 2  ;;  %v1525_v46 = vsel %vm1517_vm5, %v1504_v37, %v4151_v3 }
 0x151   : > { %v1308_v57 = vmul.f32 %v1307_v44, %v1303_v0  ;;  %v1315_v29 = vmul.f32 %v1314_v43, %v1303_v0  ;;  %v1431_v42 = vshll.u32 %v4155_v25, 30  ;;  %v1531_v17 = vsel %vm1519_vm8, %v1513_v32, %v1530_v7 }
 0x152   : > { %v1527_v0 = vsel %vm1519_vm8, %v1510_v58, %v1526_v63  ;;  %v1532_v8 = vsel %vm1518_vm10, %v1529_v36, %v1531_v17  ;;  %v1534_v61 = vand.u32 65535, %v4164_v2  ;;  %v1535_v14 = vshrl.u32 %v4164_v2, 16 }
 0x153   : > { %v1309_v4 = vadd.f32 1.0, %v1308_v57  ;;  %v1316_v23 = vadd.f32 1.0, %v1315_v29  ;;  %v1432_v6 = vsub.s32 %v1428_v1, %v1431_v42  ;;  %v1640_v34 = vand.u32 2147483647, %v3266_v50 }
 0x154   : > { %v1501_v15 = vshrl.u32 %v3141_v18, %v4127_v40  ;;  %v1528_v60 = vsel %vm1518_vm10, %v1525_v46, %v1527_v0  ;;  %v1536_v45 = vand.u32 65535, %v1532_v8  ;;  %v1537_v19 = vshrl.u32 %v1532_v8, 16 }
 0x155   : > { %v1317_v59 = vmul.f32 %v1316_v23, %v1301_v13  ;;  %v1326_v62 = vxor.u32 2147483648, %v1309_v4  ;;  %vm1433_vm13 = vcmp.lt.s32.totalorder %v1432_v6, 0  ;;  %v1434_v39 = vsub.s32 0, %v1432_v6 }
 0x156   : > { %v1643_v10 = vand.u32 2139095040, %v3266_v50  ;;  %v1538_v38 = vmul.u32 %v1536_v45, %v1534_v61  ;;  %v1539_v13 = vmul.u32 %v1537_v19, %v1534_v61  ;;  %v1540_v31 = vmul.u32 %v1536_v45, %v1535_v14 }
 0x157   : > { %v1323_v12 = vxor.u32 2147483648, %v1317_v59  ;;  %v1327_v27 = vsel %vm1325_vm12, %v1326_v62, %v1317_v59  ;;  %v1435_v1 = vsel %vm1433_vm13, %v1434_v39, %v1432_v6  ;;  %v1424_v40 = vadd.s32 %v4120_v30, %v4118_v21 }
 0x158   : > { %v1436_v32 = vclz %v1435_v1  ;;  %v1558_v9 = vand.u32 65535, %v1528_v60  ;;  %v1559_v44 = vshrl.u32 %v1528_v60, 16  ;;  %v1541_v7 = vmul.u32 %v1537_v19, %v1535_v14 }
 0x159   : > { %v1324_v33 = vsel %vm1322_vm11, %v1309_v4, %v1323_v12  ;;  %v1542_v57 = vshll.u32 %v1539_v13, 16  ;;  %v1521_v42 = vsel %vm1517_vm5, %v1501_v15, %v1504_v37  ;;  %v1522_v36 = vsel %vm1520_vm6, %v1510_v58, 2102212464 }
 0x15a   : > { %v1328_v43 = vsel %vm1321_vm7, %v1324_v33, %v1327_v27  ;;  %v2874_v63 = vadd.s32 4294967294, %v1436_v32  ;;  %v1544_v46 = vshll.u32 %v1540_v31, 16  ;;  %v1644_v30 = vshrl.u32 %v1643_v10, 23 }
 0x15b   : > { %v1329_v29 = vsel %vm1318_vm9, nan, %v1328_v43  ;;  %vm1546_vm15 = vc.u32 %v1538_v38, %v1542_v57  ;;  %v1548_v21 = vadd.s32 %v1542_v57, %v1538_v38  ;;  %v1561_v4 = vmul.u32 %v1559_v44, %v1534_v61 }
 0x15c   : > { %vm2875_vm14 = vcmp.lt.s32.totalorder %v2874_v63, 0  ;;  %2731 = vst [vmem:[%s3579_s15 + $0x30] sm:$0xff] %v1329_v29  ;;  %v1547_v17 = vsel %vm1546_vm15, 1, %v3147_v11  ;;  %v1562_v23 = vmul.u32 %v1558_v9, %v1535_v14  ;;  %v1454_v37 = vsub.s32 4, %v4155_v25 }
 0x15d   : > { %v1439_v16 = vsel %vm2875_vm14, 0, %v2874_v63  ;;  %v1549_v59 = vadd.s32 %v1547_v17, %v1541_v7  ;;  %v1543_v62 = vshrl.u32 %v1539_v13, 16  ;;  %vm1550_vm0 = vc.u32 %v1548_v21, %v1544_v46 }
 0x15e   : > { %v1440_v0 = vsub.s32 32, %v1439_v16  ;;  %v1441_v47 = vshll.u32 %v1432_v6, %v1439_v16  ;;  %v1444_v8 = vsub.s32 4294967266, %v1439_v16  ;;  %v1560_v58 = vmul.u32 %v1558_v9, %v1534_v61 }
 0x15f   : > { %v1545_v60 = vshrl.u32 %v1540_v31, 16  ;;  %v1551_v45 = vsel %vm1550_vm0, 1, %v3147_v11  ;;  %v1563_v12 = vmul.u32 %v1559_v44, %v1535_v14  ;;  %v1564_v27 = vshll.u32 %v1561_v4, 16 }
 0x160   : > { %v1442_v39 = vshrl.u32 %v1424_v40, %v1440_v0  ;;  %v1445_v15 = vadd.s32 127, %v1444_v8  ;;  %v1553_v19 = vadd.s32 %v1551_v45, %v1549_v59  ;;  %v1566_v1 = vshll.u32 %v1562_v23, 16 }
 0x161   : > { %v1523_v6 = vsel %vm1519_vm8, %v4151_v3, %v1522_v36  ;;  %v2879_v38 = vadd.s32 4294967169, %v1644_v30  ;;  %v1565_v13 = vshrl.u32 %v1561_v4, 16  ;;  %vm1568_vm1 = vc.u32 %v1560_v58, %v1564_v27 }
 0x162   : > { %v1443_v10 = vor.u32 %v1442_v39, %v1441_v47  ;;  %v1446_v32 = vshll.u32 %v1445_v15, 23  ;;  %v1554_v33 = vadd.s32 %v1553_v19, %v1543_v62  ;;  %v1570_v61 = vadd.s32 %v1564_v27, %v1560_v58 }
 0x163   : > { %v1569_v31 = vsel %vm1568_vm1, 1, %v3147_v11  ;;  %v1650_v43 = vadd.s32 1, %v2879_v38  ;;  %v1524_v3 = vsel %vm1518_vm10, %v1521_v42, %v1523_v6  ;;  %vm1332_vm4 = vcmp.lt.s32.totalorder %v3262_v48, 0 }
 0x164   : > { %v1447_v40 = vor.u32 4788187, %v1446_v32  ;;  %v1450_v9 = vcvt.s32.f32 %v1443_v10  ;;  %v4206_v63 = vadd.s32 %v1554_v33, %v1545_v60  ;;  %v1571_v14 = vadd.s32 %v1569_v31, %v1563_v12 }
 0x165   : > { %vm1572_vm2 = vc.u32 %v1570_v61, %v1566_v1  ;;  %v4208_v44 = vadd.s32 %v1570_v61, %v1566_v1  ;;  %vm1651_vm3 = vcmp.gt.s32.totalorder %v1650_v43, 0  ;;  %v1567_v29 = vshrl.u32 %v1562_v23, 16 }
 0x166   : > { %v1448_v7 = vand.u32 2147483647, %v1447_v40  ;;  %v1573_v57 = vsel %vm1572_vm2, 1, %v3147_v11  ;;  %v1652_v46 = vsel %vm1651_vm3, %v1650_v43, 0  ;;  %vm4216_vm5 = vcmp.le.f32.partialorder %v1330_v28, 0.7853982 }
 0x167   : > { %v1575_v36 = vadd.s32 %v1573_v57, %v1571_v14  ;;  %v1455_v41 = vsel %vm1332_vm4, %v1454_v37, %v4155_v25  ;;  %v1654_v42 = vand.u32 31, %v1652_v46  ;;  %v1578_v17 = vmul.u32 %v4164_v2, %v1524_v3 }
 0x168   : > { %v1451_v30 = vmul.f32 %v1450_v9, %v1448_v7  ;;  %vm1580_vm6 = vc.u32 %v4206_v63, %v4208_v44  ;;  %v1647_v4 = vand.u32 8388607, %v1640_v34  ;;  %v4228_v28 = vshrl.u32 %v1652_v46, 5 }
 0x169   : > { %v1576_v16 = vadd.s32 %v1575_v36, %v1565_v13  ;;  %v4230_v0 = vsub.s32 32, %v1654_v42  ;;  %v1657_v47 = vshll.u32 %v3141_v18, %v1654_v42  ;;  %v1660_v25 = vshll.u32 %v3142_v20, %v1654_v42 }
 0x16a   : > { %v1452_v23 = vxor.u32 2147483648, %v1451_v30  ;;  %v1663_v59 = vshll.u32 %v3143_v22, %v1654_v42  ;;  %v1666_v2 = vshll.u32 %v3144_v24, %v1654_v42  ;;  %v1669_v39 = vshll.u32 %v3145_v26, %v1654_v42 }
 0x16b   : > { %v1577_v8 = vadd.s32 %v1576_v16, %v1567_v29  ;;  %v1658_v62 = vshrl.u32 %v3142_v20, %v4230_v0  ;;  %v1661_v58 = vshrl.u32 %v3143_v22, %v4230_v0  ;;  %v1664_v45 = vshrl.u32 %v3144_v24, %v4230_v0 }
 0x16c   : > { %v1453_v37 = vsel %vm1332_vm4, %v1452_v23, %v1451_v30  ;;  %v1667_v19 = vshrl.u32 %v3145_v26, %v4230_v0  ;;  %v1457_v12 = vsel %vm4216_vm5, 0, %v1455_v41  ;;  %v1670_v1 = vshrl.u32 %v3146_v35, %v4230_v0 }
 0x16d   : > { %v1456_v15 = vsel %vm4216_vm5, %v3262_v48, %v1453_v37  ;;  %v1581_v60 = vadd.s32 1, %v1577_v8  ;;  %v1648_v32 = vor.u32 8388608, %v1647_v4  ;;  %v4257_v6 = vor.u32 %v1658_v62, %v1657_v47 }
 0x16e   : > { %v1458_v27 = vmul.f32 %v1456_v15, %v1456_v15  ;;  %v1668_v38 = vor.u32 %v1667_v19, %v1666_v2  ;;  %v4259_v40 = vor.u32 %v1661_v58, %v1660_v25  ;;  %v4261_v9 = vor.u32 %v1664_v45, %v1663_v59 }
 0x16f   : > { %v1582_v10 = vsel %vm1580_vm6, %v1581_v60, %v1577_v8  ;;  %v1671_v31 = vor.u32 %v1670_v1, %v1669_v39  ;;  %vm1672_vm7 = vcmp.lt.s32.totalorder %v4228_v28, 1  ;;  %vm1674_vm8 = vcmp.lt.s32.totalorder %v4228_v28, 3 }
 0x170   : > { %v1459_v33 = vmul.f32 -0.001358992, %v1458_v27  ;;  %v1466_v13 = vmul.f32 -0.00019511016, %v1458_v27  ;;  %v1583_v61 = vadd.s32 %v1582_v10, %v1578_v17  ;;  %vm1675_vm9 = vcmp.lt.s32.totalorder %v4228_v28, 4 }
 0x171   : > { %v1474_v3 = vadd.s32 3, %v1457_v12  ;;  %vm1673_vm10 = vcmp.lt.s32.totalorder %v4228_v28, 2  ;;  %v1681_v57 = vsel %vm1675_vm9, %v1668_v38, 920167782  ;;  %v1680_v21 = vsel %vm1672_vm7, %v4257_v6, %v4259_v40 }
 0x172   : > { %v1460_v43 = vadd.f32 0.041655596, %v1459_v33  ;;  %v1467_v14 = vadd.f32 0.008332121, %v1466_v13  ;;  %v1584_v7 = vadd.s32 536870912, %v1583_v61  ;;  %v1682_v30 = vsel %vm1674_vm8, %v4261_v9, %v1681_v57 }
 0x173   : > { %v1685_v41 = vsel %vm1675_vm9, %v1671_v31, 1326507024  ;;  %v4280_v42 = vshll.u32 %v1648_v32, 8  ;;  %v1684_v23 = vsel %vm1672_vm7, %v4259_v40, %v4261_v9  ;;  %v1475_v47 = vand.u32 3, %v1474_v3 }
 0x174   : > { %v1461_v29 = vmul.f32 %v1460_v43, %v1458_v27  ;;  %v1468_v36 = vmul.f32 %v1467_v14, %v1458_v27  ;;  %v4269_v46 = vshrl.u32 %v1584_v7, 30  ;;  %v1683_v8 = vsel %vm1673_vm10, %v1680_v21, %v1682_v30 }
 0x175   : > { %v1686_v25 = vsel %vm1674_vm8, %v1668_v38, %v1685_v41  ;;  %vm1473_vm11 = vweird.f32 %v3262_v48  ;;  %v1689_v58 = vand.u32 65535, %v4280_v42  ;;  %v1690_v39 = vshrl.u32 %v4280_v42, 16 }
 0x176   : > { %v1462_v16 = vadd.f32 -0.4999988, %v1461_v29  ;;  %v1469_v17 = vadd.f32 -0.16666654, %v1468_v36  ;;  %v1586_v4 = vshll.u32 %v4269_v46, 30  ;;  %v1687_v62 = vsel %vm1673_vm10, %v1684_v23, %v1686_v25 }
 0x177   : > { %v1714_v60 = vshrl.u32 %v1683_v8, 16  ;;  %vm1477_vm13 = vcmp.eq.s32.totalorder %v1475_v47, 0  ;;  %vm1480_vm14 = vcmp.eq.s32.totalorder %v1475_v47, 2  ;;  %v1691_v1 = vand.u32 65535, %v1687_v62 }
 0x178   : > { %v1463_v59 = vmul.f32 %v1462_v16, %v1458_v27  ;;  %v1470_v2 = vmul.f32 %v1469_v17, %v1458_v27  ;;  %v1587_v37 = vsub.s32 %v1583_v61, %v1586_v4  ;;  %v1692_v10 = vshrl.u32 %v1687_v62, 16 }
 0x179   : > { %v1713_v33 = vand.u32 65535, %v1683_v8  ;;  %v1693_v61 = vmul.u32 %v1691_v1, %v1689_v58  ;;  %v4296_v43 = vmul.u32 %v1691_v1, %v1690_v39  ;;  %vm1476_vm15 = vcmp.lt.s32.totalorder %v1475_v47, 2 }
 0x17a   : > { %v1464_v45 = vadd.f32 1.0, %v1463_v59  ;;  %v1471_v19 = vadd.f32 1.0, %v1470_v2  ;;  %vm1588_vm12 = vcmp.lt.s32.totalorder %v1587_v37, 0  ;;  %v1589_v12 = vsub.s32 0, %v1587_v37 }
 0x17b   : > { %v1694_v31 = vmul.u32 %v1692_v10, %v1689_v58  ;;  %v4298_v3 = vmul.u32 %v1714_v60, %v1689_v58  ;;  %vm1487_vm0 = vcmp.lt.s32.totalorder %v3264_v49, 0  ;;  %v1579_v57 = vadd.s32 %v4208_v44, %v4206_v63 }
 0x17c   : > { %v1472_v27 = vmul.f32 %v1471_v19, %v1456_v15  ;;  %v1481_v32 = vxor.u32 2147483648, %v1464_v45  ;;  %v1590_v38 = vsel %vm1588_vm12, %v1589_v12, %v1587_v37  ;;  %v1798_v36 = vand.u32 2139095040, %v3268_v51 }
 0x17d   : > { %v1591_v13 = vclz %v1590_v38  ;;  %v1697_v15 = vshll.u32 %v1694_v31, 16  ;;  %v1696_v30 = vmul.u32 %v1692_v10, %v1690_v39  ;;  %v1715_v41 = vmul.u32 %v1713_v33, %v1689_v58 }
 0x17e   : > { %v1478_v14 = vxor.u32 2147483648, %v1472_v27  ;;  %v1482_v7 = vsel %vm1480_vm14, %v1481_v32, %v1472_v27  ;;  %v1717_v16 = vmul.u32 %v1713_v33, %v1690_v39  ;;  %v1699_v4 = vshll.u32 %v4296_v43, 16 }
 0x17f   : > { %v2877_v29 = vadd.s32 4294967294, %v1591_v13  ;;  %vm1701_vm2 = vc.u32 %v1693_v61, %v1697_v15  ;;  %v1719_v44 = vshll.u32 %v4298_v3, 16  ;;  %vm4312_vm3 = vcmp.le.f32.partialorder %v1485_v5, 0.7853982 }
 0x180   : > { %v1479_v21 = vsel %vm1477_vm13, %v1464_v45, %v1478_v14  ;;  %v1702_v63 = vsel %vm1701_vm2, 1, %v3147_v11  ;;  %v1703_v62 = vadd.s32 %v1697_v15, %v1693_v61  ;;  %v1609_v58 = vsub.s32 4, %v4269_v46 }
 0x181   : > { %v1483_v17 = vsel %vm1476_vm15, %v1479_v21, %v1482_v7  ;;  %vm2878_vm1 = vcmp.lt.s32.totalorder %v2877_v29, 0  ;;  %v1656_v48 = vshrl.u32 %v3141_v18, %v4230_v0  ;;  %v1704_v45 = vadd.s32 %v1702_v63, %v1696_v30 }
 0x182   : > { %v1484_v23 = vsel %vm1473_vm11, nan, %v1483_v17  ;;  %v1594_v8 = vsel %vm2878_vm1, 0, %v2877_v29  ;;  %v1718_v19 = vmul.u32 %v1714_v60, %v1690_v39  ;;  %v1698_v10 = vshrl.u32 %v1694_v31, 16 }
 0x183   : > { %v1595_v25 = vsub.s32 32, %v1594_v8  ;;  %v1596_v59 = vshll.u32 %v1587_v37, %v1594_v8  ;;  %v1599_v2 = vsub.s32 4294967266, %v1594_v8  ;;  %2732 = vst [vmem:[%s3579_s15 + $0x38] sm:$0xff] %v1484_v23  ;;  %vm1705_vm4 = vc.u32 %v1703_v62, %v1699_v4 }
 0x184   : > { %v1677_v5 = vsel %vm1675_vm9, %v4261_v9, 2102212464  ;;  %v1706_v37 = vsel %vm1705_vm4, 1, %v3147_v11  ;;  %v1721_v27 = vshll.u32 %v1717_v16, 16  ;;  %vm1723_vm5 = vc.u32 %v1715_v41, %v1719_v44 }
 0x185   : > { %v1597_v12 = vshrl.u32 %v1579_v57, %v1595_v25  ;;  %v1600_v1 = vadd.s32 127, %v1599_v2  ;;  %v1708_v33 = vadd.s32 %v1706_v37, %v1704_v45  ;;  %v1724_v13 = vsel %vm1723_vm5, 1, %v3147_v11 }
 0x186   : > { %v1610_v0 = vsel %vm1487_vm0, %v1609_v58, %v4269_v46  ;;  %v1725_v39 = vadd.s32 %v1719_v44, %v1715_v41  ;;  %v1726_v60 = vadd.s32 %v1724_v13, %v1718_v19  ;;  %v1799_v61 = vshrl.u32 %v1798_v36, 23 }
 0x187   : > { %v1598_v32 = vor.u32 %v1597_v12, %v1596_v59  ;;  %v1601_v38 = vshll.u32 %v1600_v1, 23  ;;  %v1700_v9 = vshrl.u32 %v4296_v43, 16  ;;  %v1709_v7 = vadd.s32 %v1708_v33, %v1698_v10 }
 0x188   : > { %v1720_v57 = vshrl.u32 %v4298_v3, 16  ;;  %vm1727_vm6 = vc.u32 %v1725_v39, %v1721_v27  ;;  %v1795_v29 = vand.u32 2147483647, %v3268_v51  ;;  %v2882_v15 = vadd.s32 4294967169, %v1799_v61 }
 0x189   : > { %v1602_v31 = vor.u32 4788187, %v1601_v38  ;;  %v1605_v14 = vcvt.s32.f32 %v1598_v32  ;;  %v1676_v30 = vsel %vm1672_vm7, %v1656_v48, %v4257_v6  ;;  %v1678_v46 = vsel %vm1674_vm8, %v4259_v40, %v1677_v5 }
 0x18a   : > { %v1728_v36 = vsel %vm1727_vm6, 1, %v3147_v11  ;;  %v1612_v43 = vsel %vm4312_vm3, 0, %v1610_v0  ;;  %v1722_v41 = vshrl.u32 %v1717_v16, 16  ;;  %v1805_v17 = vadd.s32 1, %v2882_v15 }
 0x18b   : > { %v1603_v21 = vand.u32 2147483647, %v1602_v31  ;;  %v1730_v3 = vadd.s32 %v1728_v36, %v1726_v60  ;;  %v4340_v23 = vadd.s32 %v1709_v7, %v1700_v9  ;;  %v4342_v8 = vadd.s32 %v1725_v39, %v1721_v27 }
 0x18c   : > { %v1679_v6 = vsel %vm1673_vm10, %v1676_v30, %v1678_v46  ;;  %vm1806_vm7 = vcmp.gt.s32.totalorder %v1805_v17, 0  ;;  %v1629_v40 = vadd.s32 3, %v1612_v43  ;;  %v1802_v25 = vand.u32 8388607, %v1795_v29 }
 0x18d   : > { %v1606_v4 = vmul.f32 %v1605_v14, %v1603_v21  ;;  %v1731_v63 = vadd.s32 %v1730_v3, %v1720_v57  ;;  %v1807_v59 = vsel %vm1806_vm7, %v1805_v17, 0  ;;  %v1733_v58 = vmul.u32 %v4280_v42, %v1679_v6 }
 0x18e   : > { %v1809_v16 = vand.u32 31, %v1807_v59  ;;  %vm1735_vm8 = vc.u32 %v4340_v23, %v4342_v8  ;;  %v4360_v12 = vand.u32 3, %v1629_v40  ;;  %v1803_v1 = vor.u32 8388608, %v1802_v25 }
 0x18f   : > { %v1607_v44 = vxor.u32 2147483648, %v1606_v4  ;;  %v1732_v2 = vadd.s32 %v1731_v63, %v1722_v41  ;;  %v4367_v13 = vshrl.u32 %v1807_v59, 5  ;;  %v1953_v60 = vand.u32 2139095040, %v3270_v52 }
 0x190   : > { %v1810_v45 = vsub.s32 32, %v1809_v16  ;;  %v1812_v10 = vshll.u32 %v3141_v18, %v1809_v16  ;;  %v1815_v37 = vshll.u32 %v3142_v20, %v1809_v16  ;;  %v1821_v33 = vshll.u32 %v3144_v24, %v1809_v16 }
 0x191   : > { %v1608_v62 = vsel %vm1487_vm0, %v1607_v44, %v1606_v4  ;;  %v1736_v48 = vadd.s32 1, %v1732_v2  ;;  %v1818_v0 = vshll.u32 %v3143_v22, %v1809_v16  ;;  %vm1635_vm9 = vcmp.eq.s32.totalorder %v4360_v12, 2 }
 0x192   : > { %v4356_v28 = vsel %vm4312_vm3, %v3264_v49, %v1608_v62  ;;  %v1813_v42 = vshrl.u32 %v3142_v20, %v1810_v45  ;;  %v1816_v27 = vshrl.u32 %v3143_v22, %v1810_v45  ;;  %v1819_v39 = vshrl.u32 %v3144_v24, %v1810_v45 }
 0x193   : > { %v1613_v19 = vmul.f32 %v4356_v28, %v4356_v28  ;;  %v1737_v5 = vsel %vm1735_vm8, %v1736_v48, %v1732_v2  ;;  %v1822_v9 = vshrl.u32 %v3145_v26, %v1810_v45  ;;  %v1824_v15 = vshll.u32 %v3145_v26, %v1809_v16 }
 0x194   : > { %v1738_v38 = vadd.s32 %v1737_v5, %v1733_v58  ;;  %v1814_v7 = vor.u32 %v1813_v42, %v1812_v10  ;;  %v4374_v57 = vor.u32 %v1816_v27, %v1815_v37  ;;  %v1825_v21 = vshrl.u32 %v3146_v35, %v1810_v45 }
 0x195   : > { %v1614_v47 = vmul.f32 -0.001358992, %v1613_v19  ;;  %v1621_v32 = vmul.f32 -0.00019511016, %v1613_v19  ;;  %v1823_v43 = vor.u32 %v1822_v9, %v1821_v33  ;;  %vm1632_vm10 = vcmp.eq.s32.totalorder %v4360_v12, 0 }
 0x196   : > { %v1739_v14 = vadd.s32 536870912, %v1738_v38  ;;  %v1820_v41 = vor.u32 %v1819_v39, %v1818_v0  ;;  %vm1827_vm11 = vcmp.lt.s32.totalorder %v4367_v13, 1  ;;  %vm1830_vm12 = vcmp.lt.s32.totalorder %v4367_v13, 4 }
 0x197   : > { %v1615_v61 = vadd.f32 0.041655596, %v1614_v47  ;;  %v1622_v31 = vadd.f32 0.008332121, %v1621_v32  ;;  %v4381_v3 = vshll.u32 %v1803_v1, 8  ;;  %vm1631_vm13 = vcmp.lt.s32.totalorder %v4360_v12, 2 }
 0x198   : > { %v1740_v36 = vshrl.u32 %v1739_v14, 30  ;;  %vm1829_vm14 = vcmp.lt.s32.totalorder %v4367_v13, 3  ;;  %vm1628_vm15 = vweird.f32 %v3264_v49  ;;  %v1826_v63 = vor.u32 %v1825_v21, %v1824_v15 }
 0x199   : > { %v1616_v30 = vmul.f32 %v1615_v61, %v1613_v19  ;;  %v1623_v46 = vmul.f32 %v1622_v31, %v1613_v19  ;;  %vm1828_vm0 = vcmp.lt.s32.totalorder %v4367_v13, 2  ;;  %v1836_v44 = vsel %vm1830_vm12, %v1823_v43, 920167782 }
 0x19a   : > { %v1741_v6 = vshll.u32 %v1740_v36, 30  ;;  %v1950_v40 = vand.u32 2147483647, %v3270_v52  ;;  %vm1642_vm1 = vcmp.lt.s32.totalorder %v3266_v50, 0  ;;  %v1835_v16 = vsel %vm1827_vm11, %v1814_v7, %v4374_v57 }
 0x19b   : > { %v1617_v17 = vadd.f32 -0.4999988, %v1616_v30  ;;  %v1624_v4 = vadd.f32 -0.16666654, %v1623_v46  ;;  %v1837_v62 = vsel %vm1829_vm14, %v1820_v41, %v1836_v44  ;;  %v1839_v58 = vsel %vm1827_vm11, %v4374_v57, %v1820_v41 }
 0x19c   : > { %v1742_v2 = vsub.s32 %v1738_v38, %v1741_v6  ;;  %v1844_v48 = vand.u32 65535, %v4381_v3  ;;  %v1954_v1 = vshrl.u32 %v1953_v60, 23  ;;  %vm4402_vm3 = vcmp.le.f32.partialorder %v1640_v34, 0.7853982 }
 0x19d   : > { %v1618_v25 = vmul.f32 %v1617_v17, %v1613_v19  ;;  %v1625_v59 = vmul.f32 %v1624_v4, %v1613_v19  ;;  %v1811_v37 = vshrl.u32 %v3141_v18, %v1810_v45  ;;  %v1838_v27 = vsel %vm1828_vm0, %v1835_v16, %v1837_v62 }
 0x19e   : > { %vm1743_vm2 = vcmp.lt.s32.totalorder %v1742_v2, 0  ;;  %v1744_v19 = vsub.s32 0, %v1742_v2  ;;  %v1840_v47 = vsel %vm1830_vm12, %v1826_v63, 1326507024  ;;  %v1845_v32 = vshrl.u32 %v4381_v3, 16 }
 0x19f   : > { %v1619_v10 = vadd.f32 1.0, %v1618_v25  ;;  %v1626_v5 = vadd.f32 1.0, %v1625_v59  ;;  %v1841_v34 = vsel %vm1829_vm14, %v1823_v43, %v1840_v47  ;;  %v1764_v60 = vsub.s32 4, %v1740_v36 }
 0x1a0   : > { %v1745_v0 = vsel %vm1743_vm2, %v1744_v19, %v1742_v2  ;;  %v1842_v45 = vsel %vm1828_vm0, %v1839_v58, %v1841_v34  ;;  %v1869_v61 = vshrl.u32 %v1838_v27, 16  ;;  %v1831_v30 = vsel %vm1827_vm11, %v1811_v37, %v1814_v7 }
 0x1a1   : > { %v1627_v38 = vmul.f32 %v1626_v5, %v4356_v28  ;;  %v1636_v33 = vxor.u32 2147483648, %v1619_v10  ;;  %v1746_v39 = vclz %v1745_v0  ;;  %v1846_v9 = vand.u32 65535, %v1842_v45 }
 0x1a2   : > { %v1847_v15 = vshrl.u32 %v1842_v45, 16  ;;  %v1734_v28 = vadd.s32 %v4342_v8, %v4340_v23  ;;  %v2885_v46 = vadd.s32 4294967169, %v1954_v1  ;;  %v1832_v17 = vsel %vm1830_vm12, %v1820_v41, 2102212464 }
 0x1a3   : > { %v1633_v31 = vxor.u32 2147483648, %v1627_v38  ;;  %v1637_v14 = vsel %vm1635_vm9, %v1636_v33, %v1627_v38  ;;  %v2880_v21 = vadd.s32 4294967294, %v1746_v39  ;;  %v1868_v6 = vand.u32 65535, %v1838_v27 }
 0x1a4   : > { %v1849_v4 = vmul.u32 %v1847_v15, %v1844_v48  ;;  %v1765_v23 = vsel %vm1642_vm1, %v1764_v60, %v1740_v36  ;;  %v1850_v8 = vmul.u32 %v1846_v9, %v1845_v32  ;;  %v1848_v25 = vmul.u32 %v1846_v9, %v1844_v48 }
 0x1a5   : > { %v1634_v43 = vsel %vm1632_vm10, %v1619_v10, %v1633_v31  ;;  %vm2881_vm4 = vcmp.lt.s32.totalorder %v2880_v21, 0  ;;  %v1871_v59 = vmul.u32 %v1869_v61, %v1844_v48  ;;  %v1767_v12 = vsel %vm4402_vm3, 0, %v1765_v23 }
 0x1a6   : > { %v1638_v63 = vsel %vm1631_vm13, %v1634_v43, %v1637_v14  ;;  %v1749_v44 = vsel %vm2881_vm4, 0, %v2880_v21  ;;  %v1852_v41 = vshll.u32 %v1849_v4, 16  ;;  %v1833_v1 = vsel %vm1829_vm14, %v4374_v57, %v1832_v17 }
 0x1a7   : > { %v1639_v7 = vsel %vm1628_vm15, nan, %v1638_v63  ;;  %v1750_v16 = vsub.s32 32, %v1749_v44  ;;  %v1751_v62 = vshll.u32 %v1742_v2, %v1749_v44  ;;  %v1754_v58 = vsub.s32 4294967266, %v1749_v44 }
 0x1a8   : > { %2733 = vst [vmem:[%s3579_s15 + $0x40] sm:$0xff] %v1639_v7  ;;  %v1851_v36 = vmul.u32 %v1847_v15, %v1845_v32  ;;  %v1872_v10 = vmul.u32 %v1868_v6, %v1845_v32  ;;  %v1854_v19 = vshll.u32 %v1850_v8, 16  ;;  %v1870_v37 = vmul.u32 %v1868_v6, %v1844_v48 }
 0x1a9   : > { %v1752_v5 = vshrl.u32 %v1734_v28, %v1750_v16  ;;  %v1755_v49 = vadd.s32 127, %v1754_v58  ;;  %vm1856_vm5 = vc.u32 %v1848_v25, %v1852_v41  ;;  %v1858_v27 = vadd.s32 %v1852_v41, %v1848_v25 }
 0x1aa   : > { %v1874_v47 = vshll.u32 %v1871_v59, 16  ;;  %v1960_v2 = vadd.s32 1, %v2885_v46  ;;  %v1857_v0 = vsel %vm1856_vm5, 1, %v3147_v11  ;;  %v1873_v34 = vmul.u32 %v1869_v61, %v1845_v32 }
 0x1ab   : > { %v1753_v38 = vor.u32 %v1752_v5, %v1751_v62  ;;  %v1756_v33 = vshll.u32 %v1755_v49, 23  ;;  %v1853_v39 = vshrl.u32 %v1849_v4, 16  ;;  %v1859_v60 = vadd.s32 %v1857_v0, %v1851_v36 }
 0x1ac   : > { %vm1860_vm6 = vc.u32 %v1858_v27, %v1854_v19  ;;  %v1876_v45 = vshll.u32 %v1872_v10, 16  ;;  %vm1878_vm7 = vc.u32 %v1870_v37, %v1874_v47  ;;  %v1855_v9 = vshrl.u32 %v1850_v8, 16 }
 0x1ad   : > { %v1757_v57 = vor.u32 4788187, %v1756_v33  ;;  %v1760_v31 = vcvt.s32.f32 %v1753_v38  ;;  %v1861_v14 = vsel %vm1860_vm6, 1, %v3147_v11  ;;  %v1879_v15 = vsel %vm1878_vm7, 1, %v3147_v11 }
 0x1ae   : > { %v1863_v48 = vadd.s32 %v1861_v14, %v1859_v60  ;;  %v1880_v28 = vadd.s32 %v1874_v47, %v1870_v37  ;;  %v1834_v46 = vsel %vm1828_vm0, %v1831_v30, %v1833_v1  ;;  %v1881_v43 = vadd.s32 %v1879_v15, %v1873_v34 }
 0x1af   : > { %v1758_v21 = vand.u32 2147483647, %v1757_v57  ;;  %vm1961_vm8 = vcmp.gt.s32.totalorder %v1960_v2, 0  ;;  %v1875_v61 = vshrl.u32 %v1871_v59, 16  ;;  %v1877_v7 = vshrl.u32 %v1872_v10, 16 }
 0x1b0   : > { %v1864_v32 = vadd.s32 %v1863_v48, %v1853_v39  ;;  %vm1882_vm9 = vc.u32 %v1880_v28, %v1876_v45  ;;  %v1962_v17 = vsel %vm1961_vm8, %v1960_v2, 0  ;;  %v4445_v63 = vadd.s32 %v1880_v28, %v1876_v45 }
 0x1b1   : > { %v1761_v4 = vmul.f32 %v1760_v31, %v1758_v21  ;;  %v1883_v6 = vsel %vm1882_vm9, 1, %v3147_v11  ;;  %v1964_v23 = vand.u32 31, %v1962_v17  ;;  %v1957_v13 = vand.u32 8388607, %v1950_v40 }
 0x1b2   : > { %v4447_v8 = vadd.s32 %v1864_v32, %v1855_v9  ;;  %v1885_v44 = vadd.s32 %v1883_v6, %v1881_v43  ;;  %v1784_v16 = vadd.s32 3, %v1767_v12  ;;  %v1888_v62 = vmul.u32 %v4381_v3, %v1834_v46 }
 0x1b3   : > { %v1762_v25 = vxor.u32 2147483648, %v1761_v4  ;;  %v4451_v30 = vsub.s32 32, %v1964_v23  ;;  %v4454_v58 = vshrl.u32 %v1962_v17, 5  ;;  %v1967_v1 = vshll.u32 %v3141_v18, %v1964_v23 }
 0x1b4   : > { %v1886_v59 = vadd.s32 %v1885_v44, %v1875_v61  ;;  %vm1890_vm10 = vc.u32 %v4447_v8, %v4445_v63  ;;  %v1970_v36 = vshll.u32 %v3142_v20, %v1964_v23  ;;  %v1976_v5 = vshll.u32 %v3144_v24, %v1964_v23 }
 0x1b5   : > { %v1763_v41 = vsel %vm1642_vm1, %v1762_v25, %v1761_v4  ;;  %v1971_v3 = vshrl.u32 %v3143_v22, %v4451_v30  ;;  %v1973_v19 = vshll.u32 %v3143_v22, %v1964_v23  ;;  %v1974_v37 = vshrl.u32 %v3144_v24, %v4451_v30 }
 0x1b6   : > { %v1766_v10 = vsel %vm4402_vm3, %v3266_v50, %v1763_v41  ;;  %v1887_v12 = vadd.s32 %v1886_v59, %v1877_v7  ;;  %v1977_v27 = vshrl.u32 %v3145_v26, %v4451_v30  ;;  %v1968_v42 = vshrl.u32 %v3142_v20, %v4451_v30 }
 0x1b7   : > { %v1768_v49 = vmul.f32 %v1766_v10, %v1766_v10  ;;  %v1979_v2 = vshll.u32 %v3145_v26, %v1964_v23  ;;  %v1980_v38 = vshrl.u32 %v3146_v35, %v4451_v30  ;;  %v1958_v34 = vor.u32 8388608, %v1957_v13 }
 0x1b8   : > { %v1891_v47 = vadd.s32 1, %v1887_v12  ;;  %v4481_v60 = vor.u32 %v1971_v3, %v1970_v36  ;;  %v1978_v45 = vor.u32 %v1977_v27, %v1976_v5  ;;  %v1975_v48 = vor.u32 %v1974_v37, %v1973_v19 }
 0x1b9   : > { %v1769_v33 = vmul.f32 -0.001358992, %v1768_v49  ;;  %v1776_v0 = vmul.f32 -0.00019511016, %v1768_v49  ;;  %v1981_v57 = vor.u32 %v1980_v38, %v1979_v2  ;;  %v1785_v15 = vand.u32 3, %v1784_v16 }
 0x1ba   : > { %v1892_v39 = vsel %vm1890_vm10, %v1891_v47, %v1887_v12  ;;  %v1969_v28 = vor.u32 %v1968_v42, %v1967_v1  ;;  %vm1982_vm11 = vcmp.lt.s32.totalorder %v4454_v58, 1  ;;  %vm1985_vm12 = vcmp.lt.s32.totalorder %v4454_v58, 4 }
 0x1bb   : > { %v1770_v31 = vadd.f32 0.041655596, %v1769_v33  ;;  %v1777_v14 = vadd.f32 0.008332121, %v1776_v0  ;;  %v1893_v9 = vadd.s32 %v1892_v39, %v1888_v62  ;;  %vm1984_vm13 = vcmp.lt.s32.totalorder %v4454_v58, 3 }
 0x1bc   : > { %vm1983_vm14 = vcmp.lt.s32.totalorder %v4454_v58, 2  ;;  %v1991_v32 = vsel %vm1985_vm12, %v1978_v45, 920167782  ;;  %v1995_v61 = vsel %vm1985_vm12, %v1981_v57, 1326507024  ;;  %v4491_v17 = vshll.u32 %v1958_v34, 8 }
 0x1bd   : > { %v1771_v21 = vmul.f32 %v1770_v31, %v1768_v49  ;;  %v1778_v46 = vmul.f32 %v1777_v14, %v1768_v49  ;;  %v1894_v43 = vadd.s32 536870912, %v1893_v9  ;;  %v1994_v7 = vsel %vm1982_vm11, %v4481_v60, %v1975_v48 }
 0x1be   : > { %vm1783_vm15 = vweird.f32 %v3266_v50  ;;  %vm1786_vm0 = vcmp.lt.s32.totalorder %v1785_v15, 2  ;;  %v1990_v44 = vsel %vm1982_vm11, %v1969_v28, %v4481_v60  ;;  %v1996_v25 = vsel %vm1984_vm13, %v1978_v45, %v1995_v61 }
 0x1bf   : > { %v1772_v4 = vadd.f32 -0.4999988, %v1771_v21  ;;  %v1779_v6 = vadd.f32 -0.16666654, %v1778_v46  ;;  %v4493_v23 = vshrl.u32 %v1894_v43, 30  ;;  %v1992_v62 = vsel %vm1984_vm13, %v1975_v48, %v1991_v32 }
 0x1c0   : > { %vm1787_vm1 = vcmp.eq.s32.totalorder %v1785_v15, 0  ;;  %v1997_v41 = vsel %vm1983_vm14, %v1994_v7, %v1996_v25  ;;  %v1999_v1 = vand.u32 65535, %v4491_v17  ;;  %v2000_v36 = vshrl.u32 %v4491_v17, 16 }
 0x1c1   : > { %v1773_v13 = vmul.f32 %v1772_v4, %v1768_v49  ;;  %v1780_v16 = vmul.f32 %v1779_v6, %v1768_v49  ;;  %v1896_v59 = vshll.u32 %v4493_v23, 30  ;;  %vm1790_vm2 = vcmp.eq.s32.totalorder %v1785_v15, 2 }
 0x1c2   : > { %v1966_v49 = vshrl.u32 %v3141_v18, %v4451_v30  ;;  %v1993_v19 = vsel %vm1983_vm14, %v1990_v44, %v1992_v62  ;;  %v2001_v37 = vand.u32 65535, %v1997_v41  ;;  %v2002_v27 = vshrl.u32 %v1997_v41, 16 }
 0x1c3   : > { %v1774_v12 = vadd.f32 1.0, %v1773_v13  ;;  %v1781_v3 = vadd.f32 1.0, %v1780_v16  ;;  %v1897_v5 = vsub.s32 %v1893_v9, %v1896_v59  ;;  %v1889_v38 = vadd.s32 %v4445_v63, %v4447_v8 }
 0x1c4   : > { %v2003_v33 = vmul.u32 %v2001_v37, %v1999_v1  ;;  %v2004_v0 = vmul.u32 %v2002_v27, %v1999_v1  ;;  %v4517_v34 = vmul.u32 %v2001_v37, %v2000_v36  ;;  %v2024_v30 = vshrl.u32 %v1993_v19, 16 }
 0x1c5   : > { %v1782_v47 = vmul.f32 %v1781_v3, %v1766_v10  ;;  %v1791_v42 = vxor.u32 2147483648, %v1774_v12  ;;  %vm1898_vm3 = vcmp.lt.s32.totalorder %v1897_v5, 0  ;;  %v1899_v2 = vsub.s32 0, %v1897_v5 }
 0x1c6   : > { %v2006_v14 = vmul.u32 %v2002_v27, %v2000_v36  ;;  %v2007_v9 = vshll.u32 %v2004_v0, 16  ;;  %v2009_v21 = vshll.u32 %v4517_v34, 16  ;;  %v1986_v46 = vsel %vm1982_vm11, %v1966_v49, %v1969_v28 }
 0x1c7   : > { %v1788_v39 = vxor.u32 2147483648, %v1782_v47  ;;  %v1792_v45 = vsel %vm1790_vm2, %v1791_v42, %v1782_v47  ;;  %v1900_v57 = vsel %vm1898_vm3, %v1899_v2, %v1897_v5  ;;  %v1987_v63 = vsel %vm1985_vm12, %v1975_v48, 2102212464 }
 0x1c8   : > { %v1901_v31 = vclz %v1900_v57  ;;  %v2023_v8 = vand.u32 65535, %v1993_v19  ;;  %vm2011_vm4 = vc.u32 %v2003_v33, %v2007_v9  ;;  %v2013_v61 = vadd.s32 %v2007_v9, %v2003_v33 }
 0x1c9   : > { %v1789_v10 = vsel %vm1787_vm1, %v1774_v12, %v1788_v39  ;;  %vm1797_vm5 = vcmp.lt.s32.totalorder %v3268_v51, 0  ;;  %v2012_v6 = vsel %vm2011_vm4, 1, %v3147_v11  ;;  %v2026_v7 = vmul.u32 %v2024_v30, %v1999_v1 }
 0x1ca   : > { %v1793_v43 = vsel %vm1786_vm0, %v1789_v10, %v1792_v45  ;;  %v2883_v32 = vadd.s32 4294967294, %v1901_v31  ;;  %v2105_v28 = vand.u32 2147483647, %v3272_v53  ;;  %v2008_v44 = vshrl.u32 %v2004_v0, 16 }
 0x1cb   : > { %v1794_v4 = vsel %vm1783_vm15, nan, %v1793_v43  ;;  %v2014_v25 = vadd.s32 %v2012_v6, %v2006_v14  ;;  %vm2015_vm7 = vc.u32 %v2013_v61, %v2009_v21  ;;  %v2025_v13 = vmul.u32 %v2023_v8, %v1999_v1 }
 0x1cc   : > { %vm2884_vm6 = vcmp.lt.s32.totalorder %v2883_v32, 0  ;;  %2734 = vst [vmem:[%s3579_s15 + $0x48] sm:$0xff] %v1794_v4  ;;  %v2016_v15 = vsel %vm2015_vm7, 1, %v3147_v11  ;;  %v2027_v16 = vmul.u32 %v2023_v8, %v2000_v36  ;;  %v1988_v12 = vsel %vm1984_vm13, %v4481_v60, %v1987_v63 }
 0x1cd   : > { %v1904_v48 = vsel %vm2884_vm6, 0, %v2883_v32  ;;  %v2018_v41 = vadd.s32 %v2016_v15, %v2014_v25  ;;  %v2028_v3 = vmul.u32 %v2024_v30, %v2000_v36  ;;  %v2029_v49 = vshll.u32 %v2026_v7, 16 }
 0x1ce   : > { %v1905_v59 = vsub.s32 32, %v1904_v48  ;;  %v1906_v50 = vshll.u32 %v1897_v5, %v1904_v48  ;;  %v1909_v62 = vsub.s32 4294967266, %v1904_v48  ;;  %v2108_v19 = vand.u32 2139095040, %v3272_v53 }
 0x1cf   : > { %v1919_v47 = vsub.s32 4, %v4493_v23  ;;  %v2112_v1 = vand.u32 8388607, %v2105_v28  ;;  %v2010_v42 = vshrl.u32 %v4517_v34, 16  ;;  %v2031_v5 = vshll.u32 %v2027_v16, 16 }
 0x1d0   : > { %v1907_v37 = vshrl.u32 %v1889_v38, %v1905_v59  ;;  %v1910_v27 = vadd.s32 127, %v1909_v62  ;;  %vm2033_vm8 = vc.u32 %v2025_v13, %v2029_v49  ;;  %v2035_v2 = vadd.s32 %v2029_v49, %v2025_v13 }
 0x1d1   : > { %v2019_v39 = vadd.s32 %v2018_v41, %v2008_v44  ;;  %v2034_v60 = vsel %vm2033_vm8, 1, %v3147_v11  ;;  %v2030_v36 = vshrl.u32 %v2026_v7, 16  ;;  %v2109_v38 = vshrl.u32 %v2108_v19, 23 }
 0x1d2   : > { %v1908_v33 = vor.u32 %v1907_v37, %v1906_v50  ;;  %v1911_v0 = vshll.u32 %v1910_v27, 23  ;;  %v2036_v45 = vadd.s32 %v2034_v60, %v2028_v3  ;;  %vm2037_vm9 = vc.u32 %v2035_v2, %v2031_v5 }
 0x1d3   : > { %v1920_v31 = vsel %vm1797_vm5, %v1919_v47, %v4493_v23  ;;  %v2038_v34 = vsel %vm2037_vm9, 1, %v3147_v11  ;;  %vm4548_vm10 = vcmp.le.f32.partialorder %v1795_v29, 0.7853982  ;;  %v2032_v9 = vshrl.u32 %v2027_v16, 16 }
 0x1d4   : > { %v1912_v57 = vor.u32 4788187, %v1911_v0  ;;  %v1915_v30 = vcvt.s32.f32 %v1908_v33  ;;  %v2040_v21 = vadd.s32 %v2038_v34, %v2036_v45  ;;  %v2888_v10 = vadd.s32 4294967169, %v2109_v38 }
 0x1d5   : > { %v1989_v8 = vsel %vm1983_vm14, %v1986_v46, %v1988_v12  ;;  %v4554_v43 = vadd.s32 %v2019_v39, %v2010_v42  ;;  %v4556_v32 = vadd.s32 %v2035_v2, %v2031_v5  ;;  %v1922_v23 = vsel %vm4548_vm10, 0, %v1920_v31 }
 0x1d6   : > { %v1913_v63 = vand.u32 2147483647, %v1912_v57  ;;  %v2041_v61 = vadd.s32 %v2040_v21, %v2030_v36  ;;  %v2113_v4 = vor.u32 8388608, %v2112_v1  ;;  %v2115_v29 = vadd.s32 1, %v2888_v10 }
 0x1d7   : > { %v2043_v44 = vmul.u32 %v4491_v17, %v1989_v8  ;;  %v1939_v48 = vadd.s32 3, %v1922_v23  ;;  %vm2045_vm12 = vc.u32 %v4554_v43, %v4556_v32  ;;  %v2260_v19 = vand.u32 2147483647, %v3274_v54 }
 0x1d8   : > { %v1916_v6 = vmul.f32 %v1915_v30, %v1913_v63  ;;  %v2042_v7 = vadd.s32 %v2041_v61, %v2032_v9  ;;  %vm2116_vm11 = vcmp.gt.s32.totalorder %v2115_v29, 0  ;;  %v4563_v13 = vshll.u32 %v2113_v4, 8 }
 0x1d9   : > { %v2117_v58 = vsel %vm2116_vm11, %v2115_v29, 0  ;;  %v4576_v41 = vand.u32 3, %v1939_v48  ;;  %v2263_v37 = vand.u32 2139095040, %v3274_v54  ;;  %vm1952_vm0 = vcmp.lt.s32.totalorder %v3270_v52, 0 }
 0x1da   : > { %v1917_v25 = vxor.u32 2147483648, %v1916_v6  ;;  %v2046_v46 = vadd.s32 1, %v2042_v7  ;;  %v2119_v15 = vand.u32 31, %v2117_v58  ;;  %v4578_v3 = vshrl.u32 %v2117_v58, 5 }
 0x1db   : > { %v4581_v49 = vand.u32 65535, %v4563_v13  ;;  %vm1945_vm13 = vcmp.eq.s32.totalorder %v4576_v41, 2  ;;  %v2264_v21 = vshrl.u32 %v2263_v37, 23  ;;  %vm1942_vm14 = vcmp.eq.s32.totalorder %v4576_v41, 0 }
 0x1dc   : > { %v1918_v16 = vsel %vm1797_vm5, %v1917_v25, %v1916_v6  ;;  %v2047_v17 = vsel %vm2045_vm12, %v2046_v46, %v2042_v7  ;;  %v4572_v50 = vsub.s32 32, %v2119_v15  ;;  %v2125_v42 = vshll.u32 %v3142_v20, %v2119_v15 }
 0x1dd   : > { %v4570_v59 = vsel %vm4548_vm10, %v3268_v51, %v1918_v16  ;;  %v2048_v12 = vadd.s32 %v2047_v17, %v2043_v44  ;;  %v2128_v2 = vshll.u32 %v3143_v22, %v2119_v15  ;;  %v2131_v0 = vshll.u32 %v3144_v24, %v2119_v15 }
 0x1de   : > { %v1923_v62 = vmul.f32 %v4570_v59, %v4570_v59  ;;  %v2126_v5 = vshrl.u32 %v3143_v22, %v4572_v50  ;;  %v2129_v33 = vshrl.u32 %v3144_v24, %v4572_v50  ;;  %v2132_v45 = vshrl.u32 %v3145_v26, %v4572_v50 }
 0x1df   : > { %v2049_v1 = vadd.s32 536870912, %v2048_v12  ;;  %v2122_v38 = vshll.u32 %v3141_v18, %v2119_v15  ;;  %v2123_v57 = vshrl.u32 %v3142_v20, %v4572_v50  ;;  %v2134_v30 = vshll.u32 %v3145_v26, %v2119_v15 }
 0x1e0   : > { %v1924_v27 = vmul.f32 -0.001358992, %v1923_v62  ;;  %v1931_v47 = vmul.f32 -0.00019511016, %v1923_v62  ;;  %v2135_v31 = vshrl.u32 %v3146_v35, %v4572_v50  ;;  %v4602_v10 = vor.u32 %v2126_v5, %v2125_v42 }
 0x1e1   : > { %v2050_v36 = vshrl.u32 %v2049_v1, 30  ;;  %v4604_v63 = vor.u32 %v2129_v33, %v2128_v2  ;;  %v2133_v8 = vor.u32 %v2132_v45, %v2131_v0  ;;  %vm1941_vm15 = vcmp.lt.s32.totalorder %v4576_v41, 2 }
 0x1e2   : > { %v1925_v39 = vadd.f32 0.041655596, %v1924_v27  ;;  %v1932_v60 = vadd.f32 0.008332121, %v1931_v47  ;;  %v2136_v23 = vor.u32 %v2135_v31, %v2134_v30  ;;  %vm2137_vm1 = vcmp.lt.s32.totalorder %v4578_v3, 1 }
 0x1e3   : > { %v2051_v9 = vshll.u32 %v2050_v36, 30  ;;  %vm1938_vm2 = vweird.f32 %v3268_v51  ;;  %v4610_v6 = vor.u32 %v2123_v57, %v2122_v38  ;;  %vm2139_vm3 = vcmp.lt.s32.totalorder %v4578_v3, 3 }
 0x1e4   : > { %v1926_v34 = vmul.f32 %v1925_v39, %v1923_v62  ;;  %v1933_v14 = vmul.f32 %v1932_v60, %v1923_v62  ;;  %vm2140_vm4 = vcmp.lt.s32.totalorder %v4578_v3, 4  ;;  %v4615_v7 = vshrl.u32 %v4563_v13, 16 }
 0x1e5   : > { %v2052_v29 = vsub.s32 %v2048_v12, %v2051_v9  ;;  %vm2138_vm6 = vcmp.lt.s32.totalorder %v4578_v3, 2  ;;  %v2146_v58 = vsel %vm2140_vm4, %v2133_v8, 920167782  ;;  %v2149_v46 = vsel %vm2137_vm1, %v4602_v10, %v4604_v63 }
 0x1e6   : > { %v1927_v61 = vadd.f32 -0.4999988, %v1926_v34  ;;  %v1934_v4 = vadd.f32 -0.16666654, %v1933_v14  ;;  %v2150_v15 = vsel %vm2140_vm4, %v2136_v23, 1326507024  ;;  %v2145_v1 = vsel %vm2137_vm1, %v4610_v6, %v4602_v10 }
 0x1e7   : > { %vm2053_vm5 = vcmp.lt.s32.totalorder %v2052_v29, 0  ;;  %v2054_v48 = vsub.s32 0, %v2052_v29  ;;  %v2891_v37 = vadd.s32 4294967169, %v2264_v21  ;;  %vm4628_vm7 = vcmp.le.f32.partialorder %v1950_v40, 0.7853982 }
 0x1e8   : > { %v1928_v44 = vmul.f32 %v1927_v61, %v1923_v62  ;;  %v1935_v25 = vmul.f32 %v1934_v4, %v1923_v62  ;;  %v2074_v47 = vsub.s32 4, %v2050_v36  ;;  %v2151_v42 = vsel %vm2139_vm3, %v2133_v8, %v2150_v15 }
 0x1e9   : > { %v2055_v12 = vsel %vm2053_vm5, %v2054_v48, %v2052_v29  ;;  %v2147_v40 = vsel %vm2139_vm3, %v4604_v63, %v2146_v58  ;;  %v2152_v33 = vsel %vm2138_vm6, %v2149_v46, %v2151_v42  ;;  %v2044_v0 = vadd.s32 %v4556_v32, %v4554_v43 }
 0x1ea   : > { %v1929_v16 = vadd.f32 1.0, %v1928_v44  ;;  %v1936_v17 = vadd.f32 1.0, %v1935_v25  ;;  %v2056_v27 = vclz %v2055_v12  ;;  %v2156_v60 = vand.u32 65535, %v2152_v33 }
 0x1eb   : > { %v2157_v45 = vshrl.u32 %v2152_v33, 16  ;;  %v2270_v30 = vadd.s32 1, %v2891_v37  ;;  %v2075_v31 = vsel %vm1952_vm0, %v2074_v47, %v2050_v36  ;;  %v2148_v34 = vsel %vm2138_vm6, %v2145_v1, %v2147_v40 }
 0x1ec   : > { %v1937_v5 = vmul.f32 %v1936_v17, %v4570_v59  ;;  %v1946_v2 = vxor.u32 2147483648, %v1929_v16  ;;  %v2886_v39 = vadd.s32 4294967294, %v2056_v27  ;;  %v4650_v59 = vand.u32 8388607, %v2260_v19 }
 0x1ed   : > { %v2159_v43 = vmul.u32 %v2157_v45, %v4581_v49  ;;  %v2158_v9 = vmul.u32 %v2156_v60, %v4581_v49  ;;  %v2160_v21 = vmul.u32 %v2156_v60, %v4615_v7  ;;  %v2121_v44 = vshrl.u32 %v3141_v18, %v4572_v50 }
 0x1ee   : > { %v1943_v38 = vxor.u32 2147483648, %v1937_v5  ;;  %v1947_v57 = vsel %vm1945_vm13, %v1946_v2, %v1937_v5  ;;  %vm2887_vm8 = vcmp.lt.s32.totalorder %v2886_v39, 0  ;;  %v2178_v25 = vand.u32 65535, %v2148_v34 }
 0x1ef   : > { %v2059_v14 = vsel %vm2887_vm8, 0, %v2886_v39  ;;  %v2179_v48 = vshrl.u32 %v2148_v34, 16  ;;  %v2161_v15 = vmul.u32 %v2157_v45, %v4615_v7  ;;  %v2077_v41 = vsel %vm4628_vm7, 0, %v2075_v31 }
 0x1f0   : > { %v1944_v32 = vsel %vm1942_vm14, %v1929_v16, %v1943_v38  ;;  %v2060_v23 = vsub.s32 32, %v2059_v14  ;;  %v2061_v61 = vshll.u32 %v2052_v29, %v2059_v14  ;;  %v2064_v36 = vsub.s32 4294967266, %v2059_v14 }
 0x1f1   : > { %v1948_v8 = vsel %vm1941_vm15, %v1944_v32, %v1947_v57  ;;  %v2162_v16 = vshll.u32 %v2159_v43, 16  ;;  %v2142_v29 = vsel %vm2140_vm4, %v4604_v63, 2102212464  ;;  %v2163_v51 = vshrl.u32 %v2159_v43, 16 }
 0x1f2   : > { %v1949_v4 = vsel %vm1938_vm2, nan, %v1948_v8  ;;  %v2062_v58 = vshrl.u32 %v2044_v0, %v2060_v23  ;;  %v2065_v46 = vadd.s32 127, %v2064_v36  ;;  %v2164_v17 = vshll.u32 %v2160_v21, 16 }
 0x1f3   : > { %2735 = vst [vmem:[%s3579_s15 + $0x50] sm:$0xff] %v1949_v4  ;;  %vm2166_vm9 = vc.u32 %v2158_v9, %v2162_v16  ;;  %v2168_v50 = vadd.s32 %v2162_v16, %v2158_v9  ;;  %v2180_v47 = vmul.u32 %v2178_v25, %v4581_v49  ;;  %v2181_v1 = vmul.u32 %v2179_v48, %v4581_v49 }
 0x1f4   : > { %v2063_v12 = vor.u32 %v2062_v58, %v2061_v61  ;;  %v2066_v37 = vshll.u32 %v2065_v46, 23  ;;  %v2167_v27 = vsel %vm2166_vm9, 1, %v3147_v11  ;;  %v2182_v42 = vmul.u32 %v2178_v25, %v4615_v7 }
 0x1f5   : > { %v2169_v40 = vadd.s32 %v2167_v27, %v2161_v15  ;;  %vm2170_vm10 = vc.u32 %v2168_v50, %v2164_v17  ;;  %v2183_v33 = vmul.u32 %v2179_v48, %v4615_v7  ;;  %v2184_v0 = vshll.u32 %v2181_v1, 16 }
 0x1f6   : > { %v2067_v5 = vor.u32 4788187, %v2066_v37  ;;  %v2070_v2 = vcvt.s32.f32 %v2063_v12  ;;  %v2171_v63 = vsel %vm2170_vm10, 1, %v3147_v11  ;;  %v2186_v39 = vshll.u32 %v2182_v42, 16 }
 0x1f7   : > { %v2141_v45 = vsel %vm2137_vm1, %v2121_v44, %v4610_v6  ;;  %v2143_v49 = vsel %vm2139_vm3, %v4602_v10, %v2142_v29  ;;  %v2173_v38 = vadd.s32 %v2171_v63, %v2169_v40  ;;  %v2165_v57 = vshrl.u32 %v2160_v21, 16 }
 0x1f8   : > { %v2068_v60 = vand.u32 2147483647, %v2067_v5  ;;  %vm2188_vm11 = vc.u32 %v2180_v47, %v2184_v0  ;;  %v2190_v31 = vadd.s32 %v2184_v0, %v2180_v47  ;;  %vm2271_vm12 = vcmp.gt.s32.totalorder %v2270_v30, 0 }
 0x1f9   : > { %v2174_v43 = vadd.s32 %v2173_v38, %v2163_v51  ;;  %v2189_v7 = vsel %vm2188_vm11, 1, %v3147_v11  ;;  %v2272_v32 = vsel %vm2271_vm12, %v2270_v30, 0  ;;  %v2185_v14 = vshrl.u32 %v2181_v1, 16 }
 0x1fa   : > { %v2071_v34 = vmul.f32 %v2070_v2, %v2068_v60  ;;  %v2191_v9 = vadd.s32 %v2189_v7, %v2183_v33  ;;  %vm2192_vm13 = vc.u32 %v2190_v31, %v2186_v39  ;;  %v2268_v23 = vor.u32 8388608, %v4650_v59 }
 0x1fb   : > { %v2193_v6 = vsel %vm2192_vm13, 1, %v3147_v11  ;;  %v2274_v61 = vand.u32 31, %v2272_v32  ;;  %v2094_v10 = vadd.s32 3, %v2077_v41  ;;  %v2144_v21 = vsel %vm2138_vm6, %v2141_v45, %v2143_v49 }
 0x1fc   : > { %v2072_v8 = vxor.u32 2147483648, %v2071_v34  ;;  %v2187_v36 = vshrl.u32 %v2182_v42, 16  ;;  %v2195_v4 = vadd.s32 %v2193_v6, %v2191_v9  ;;  %v4693_v25 = vadd.s32 %v2174_v43, %v2165_v57 }
 0x1fd   : > { %v4695_v30 = vadd.s32 %v2190_v31, %v2186_v39  ;;  %v4697_v48 = vsub.s32 32, %v2274_v61  ;;  %v4702_v46 = vshrl.u32 %v2272_v32, 5  ;;  %v2277_v3 = vshll.u32 %v3141_v18, %v2274_v61 }
 0x1fe   : > { %v2073_v44 = vsel %vm1952_vm0, %v2072_v8, %v2071_v34  ;;  %v2196_v58 = vadd.s32 %v2195_v4, %v2185_v14  ;;  %v2280_v41 = vshll.u32 %v3142_v20, %v2274_v61  ;;  %v2283_v17 = vshll.u32 %v3143_v22, %v2274_v61 }
 0x1ff   : > { %v2076_v59 = vsel %vm4628_vm7, %v3270_v52, %v2073_v44  ;;  %v2278_v16 = vshrl.u32 %v3142_v20, %v4697_v48  ;;  %v2281_v29 = vshrl.u32 %v3143_v22, %v4697_v48  ;;  %v2284_v62 = vshrl.u32 %v3144_v24, %v4697_v48 }
 0x200   : > { %v2078_v15 = vmul.f32 %v2076_v59, %v2076_v59  ;;  %v2197_v51 = vadd.s32 %v2196_v58, %v2187_v36  ;;  %v2286_v12 = vshll.u32 %v3144_v24, %v2274_v61  ;;  %v2198_v27 = vmul.u32 %v4563_v13, %v2144_v21 }
 0x201   : > { %vm2200_vm14 = vc.u32 %v4693_v25, %v4695_v30  ;;  %v4717_v1 = vor.u32 %v2278_v16, %v2277_v3  ;;  %v2287_v42 = vshrl.u32 %v3145_v26, %v4697_v48  ;;  %v2289_v5 = vshll.u32 %v3145_v26, %v2274_v61 }
 0x202   : > { %v2079_v37 = vmul.f32 -0.001358992, %v2078_v15  ;;  %v2086_v50 = vmul.f32 -0.00019511016, %v2078_v15  ;;  %v2201_v47 = vadd.s32 1, %v2197_v51  ;;  %v4722_v63 = vor.u32 %v2281_v29, %v2280_v41 }
 0x203   : > { %v2290_v33 = vshrl.u32 %v3146_v35, %v4697_v48  ;;  %v4726_v13 = vor.u32 %v2284_v62, %v2283_v17  ;;  %v2288_v39 = vor.u32 %v2287_v42, %v2286_v12  ;;  %vm2292_vm15 = vcmp.lt.s32.totalorder %v4702_v46, 1 }
 0x204   : > { %v2080_v2 = vadd.f32 0.041655596, %v2079_v37  ;;  %v2087_v40 = vadd.f32 0.008332121, %v2086_v50  ;;  %v2202_v0 = vsel %vm2200_vm14, %v2201_v47, %v2197_v51  ;;  %vm2295_vm0 = vcmp.lt.s32.totalorder %v4702_v46, 4 }
 0x205   : > { %v2203_v49 = vadd.s32 %v2202_v0, %v2198_v27  ;;  %v2095_v38 = vand.u32 3, %v2094_v10  ;;  %v2291_v57 = vor.u32 %v2290_v33, %v2289_v5  ;;  %vm2293_vm1 = vcmp.lt.s32.totalorder %v4702_v46, 2 }
 0x206   : > { %v2081_v60 = vmul.f32 %v2080_v2, %v2078_v15  ;;  %v2088_v45 = vmul.f32 %v2087_v40, %v2078_v15  ;;  %vm2294_vm2 = vcmp.lt.s32.totalorder %v4702_v46, 3  ;;  %v2300_v7 = vsel %vm2292_vm15, %v4717_v1, %v4722_v63 }
 0x207   : > { %v2204_v43 = vadd.s32 536870912, %v2203_v49  ;;  %v2301_v32 = vsel %vm2295_vm0, %v2288_v39, 920167782  ;;  %v2304_v14 = vsel %vm2292_vm15, %v4722_v63, %v4726_v13  ;;  %v2305_v9 = vsel %vm2295_vm0, %v2291_v57, 1326507024 }
 0x208   : > { %v2082_v31 = vadd.f32 -0.4999988, %v2081_v60  ;;  %v2089_v34 = vadd.f32 -0.16666654, %v2088_v45  ;;  %v4744_v8 = vshll.u32 %v2268_v23, 8  ;;  %v2302_v21 = vsel %vm2294_vm2, %v4726_v13, %v2301_v32 }
 0x209   : > { %v4746_v10 = vshrl.u32 %v2204_v43, 30  ;;  %v2303_v36 = vsel %vm2293_vm1, %v2300_v7, %v2302_v21  ;;  %v2306_v4 = vsel %vm2294_vm2, %v2288_v39, %v2305_v9  ;;  %vm2100_vm3 = vcmp.eq.s32.totalorder %v2095_v38, 2 }
 0x20a   : > { %v2083_v6 = vmul.f32 %v2082_v31, %v2078_v15  ;;  %v2090_v61 = vmul.f32 %v2089_v34, %v2078_v15  ;;  %v2307_v23 = vsel %vm2293_vm1, %v2304_v14, %v2306_v4  ;;  %v2309_v15 = vand.u32 65535, %v4744_v8 }
 0x20b   : > { %v2206_v3 = vshll.u32 %v4746_v10, 30  ;;  %v2310_v16 = vshrl.u32 %v4744_v8, 16  ;;  %v2334_v17 = vshrl.u32 %v2303_v36, 16  ;;  %vm2096_vm4 = vcmp.lt.s32.totalorder %v2095_v38, 2 }
 0x20c   : > { %v2084_v44 = vadd.f32 1.0, %v2083_v6  ;;  %v2091_v58 = vadd.f32 1.0, %v2090_v61  ;;  %vm2097_vm5 = vcmp.eq.s32.totalorder %v2095_v38, 0  ;;  %v2311_v62 = vand.u32 65535, %v2307_v23 }
 0x20d   : > { %v2207_v51 = vsub.s32 %v2203_v49, %v2206_v3  ;;  %v2312_v12 = vshrl.u32 %v2307_v23, 16  ;;  %vm2093_vm7 = vweird.f32 %v3270_v52  ;;  %v2333_v40 = vand.u32 65535, %v2303_v36 }
 0x20e   : > { %v2092_v41 = vmul.f32 %v2091_v58, %v2076_v59  ;;  %v2101_v29 = vxor.u32 2147483648, %v2084_v44  ;;  %v2313_v47 = vmul.u32 %v2311_v62, %v2309_v15  ;;  %v4761_v5 = vmul.u32 %v2311_v62, %v2310_v16 }
 0x20f   : > { %vm2208_vm6 = vcmp.lt.s32.totalorder %v2207_v51, 0  ;;  %v2209_v27 = vsub.s32 0, %v2207_v51  ;;  %v2314_v42 = vmul.u32 %v2312_v12, %v2309_v15  ;;  %v4763_v33 = vmul.u32 %v2334_v17, %v2309_v15 }
 0x210   : > { %v2098_v37 = vxor.u32 2147483648, %v2092_v41  ;;  %v2102_v50 = vsel %vm2100_vm3, %v2101_v29, %v2092_v41  ;;  %v2316_v60 = vmul.u32 %v2312_v12, %v2310_v16  ;;  %v2199_v57 = vadd.s32 %v4695_v30, %v4693_v25 }
 0x211   : > { %v2210_v59 = vsel %vm2208_vm6, %v2209_v27, %v2207_v51  ;;  %v2317_v45 = vshll.u32 %v2314_v42, 16  ;;  %v2319_v52 = vshll.u32 %v4761_v5, 16  ;;  %v2276_v34 = vshrl.u32 %v3141_v18, %v4697_v48 }
 0x212   : > { %v2099_v2 = vsel %vm2097_vm5, %v2084_v44, %v2098_v37  ;;  %v2211_v39 = vclz %v2210_v59  ;;  %v2335_v38 = vmul.u32 %v2333_v40, %v2309_v15  ;;  %v2337_v32 = vmul.u32 %v2333_v40, %v2310_v16 }
 0x213   : > { %v2103_v0 = vsel %vm2096_vm4, %v2099_v2, %v2102_v50  ;;  %vm2321_vm8 = vc.u32 %v2313_v47, %v2317_v45  ;;  %v2323_v43 = vadd.s32 %v2317_v45, %v2313_v47  ;;  %v2339_v14 = vshll.u32 %v4763_v33, 16 }
 0x214   : > { %v2104_v49 = vsel %vm2093_vm7, nan, %v2103_v0  ;;  %v2889_v31 = vadd.s32 4294967294, %v2211_v39  ;;  %v2322_v7 = vsel %vm2321_vm8, 1, %v3147_v11  ;;  %v2297_v25 = vsel %vm2295_vm0, %v4726_v13, 2102212464 }
 0x215   : > { %2736 = vst [vmem:[%s3579_s15 + $0x58] sm:$0xff] %v2104_v49  ;;  %v2324_v30 = vadd.s32 %v2322_v7, %v2316_v60  ;;  %vm2325_vm10 = vc.u32 %v2323_v43, %v2319_v52  ;;  %v2318_v6 = vshrl.u32 %v2314_v42, 16  ;;  %v2338_v61 = vmul.u32 %v2334_v17, %v2310_v16 }
 0x216   : > { %vm2890_vm9 = vcmp.lt.s32.totalorder %v2889_v31, 0  ;;  %v2326_v48 = vsel %vm2325_vm10, 1, %v3147_v11  ;;  %vm2107_vm11 = vcmp.lt.s32.totalorder %v3272_v53, 0  ;;  %v2296_v58 = vsel %vm2292_vm15, %v2276_v34, %v4717_v1 }
 0x217   : > { %v2214_v9 = vsel %vm2890_vm9, 0, %v2889_v31  ;;  %v2328_v44 = vadd.s32 %v2326_v48, %v2324_v30  ;;  %v2341_v3 = vshll.u32 %v2337_v32, 16  ;;  %vm2343_vm12 = vc.u32 %v2335_v38, %v2339_v14 }
 0x218   : > { %v2215_v21 = vsub.s32 32, %v2214_v9  ;;  %v2216_v36 = vshll.u32 %v2207_v51, %v2214_v9  ;;  %v2219_v4 = vsub.s32 4294967266, %v2214_v9  ;;  %v2229_v15 = vsub.s32 4, %v4746_v10 }
 0x219   : > { %v2344_v41 = vsel %vm2343_vm12, 1, %v3147_v11  ;;  %v2298_v16 = vsel %vm2294_vm2, %v4722_v63, %v2297_v25  ;;  %v2345_v29 = vadd.s32 %v2339_v14, %v2335_v38  ;;  %v2418_v17 = vand.u32 2139095040, %v3276_v55 }
 0x21a   : > { %v2217_v13 = vshrl.u32 %v2199_v57, %v2215_v21  ;;  %v2220_v23 = vadd.s32 127, %v2219_v4  ;;  %v2346_v51 = vadd.s32 %v2344_v41, %v2338_v61  ;;  %v2320_v1 = vshrl.u32 %v4761_v5, 16 }
 0x21b   : > { %v2329_v37 = vadd.s32 %v2328_v44, %v2318_v6  ;;  %v2340_v50 = vshrl.u32 %v4763_v33, 16  ;;  %vm2347_vm13 = vc.u32 %v2345_v29, %v2341_v3  ;;  %v2415_v27 = vand.u32 2147483647, %v3276_v55 }
 0x21c   : > { %v2218_v62 = vor.u32 %v2217_v13, %v2216_v36  ;;  %v2221_v12 = vshll.u32 %v2220_v23, 23  ;;  %v2419_v47 = vshrl.u32 %v2418_v17, 23  ;;  %v2230_v63 = vsel %vm2107_vm11, %v2229_v15, %v4746_v10 }
 0x21d   : > { %v2348_v59 = vsel %vm2347_vm13, 1, %v3147_v11  ;;  %vm4797_vm14 = vcmp.le.f32.partialorder %v2105_v28, 0.7853982  ;;  %v2342_v5 = vshrl.u32 %v2337_v32, 16  ;;  %v2299_v60 = vsel %vm2293_vm1, %v2296_v58, %v2298_v16 }
 0x21e   : > { %v2222_v42 = vor.u32 4788187, %v2221_v12  ;;  %v2225_v2 = vcvt.s32.f32 %v2218_v62  ;;  %v2350_v33 = vadd.s32 %v2348_v59, %v2346_v51  ;;  %v2894_v0 = vadd.s32 4294967169, %v2419_v47 }
 0x21f   : > { %v2330_v45 = vadd.s32 %v2329_v37, %v2320_v1  ;;  %v2349_v49 = vadd.s32 %v2345_v29, %v2341_v3  ;;  %v2232_v10 = vsel %vm4797_vm14, 0, %v2230_v63  ;;  %v2422_v52 = vand.u32 8388607, %v2415_v27 }
 0x220   : > { %v2223_v39 = vand.u32 2147483647, %v2222_v42  ;;  %v2351_v57 = vadd.s32 %v2350_v33, %v2340_v50  ;;  %v2425_v28 = vadd.s32 1, %v2894_v0  ;;  %v2353_v43 = vmul.u32 %v4744_v8, %v2299_v60 }
 0x221   : > { %v2249_v38 = vadd.s32 3, %v2232_v10  ;;  %vm2355_vm0 = vc.u32 %v2330_v45, %v2349_v49  ;;  %v2423_v14 = vor.u32 8388608, %v2422_v52  ;;  %v2573_v30 = vand.u32 2139095040, %v3278_v56 }
 0x222   : > { %v2226_v31 = vmul.f32 %v2225_v2, %v2223_v39  ;;  %v2352_v34 = vadd.s32 %v2351_v57, %v2342_v5  ;;  %vm2426_vm15 = vcmp.gt.s32.totalorder %v2425_v28, 0  ;;  %v2570_v4 = vand.u32 2147483647, %v3278_v56 }
 0x223   : > { %v2427_v46 = vsel %vm2426_vm15, %v2425_v28, 0  ;;  %v4820_v21 = vand.u32 3, %v2249_v38  ;;  %v4823_v44 = vadd.s32 %v2349_v49, %v2330_v45  ;;  %v4827_v3 = vshll.u32 %v2423_v14, 8 }
 0x224   : > { %v2227_v7 = vxor.u32 2147483648, %v2226_v31  ;;  %v2356_v32 = vadd.s32 1, %v2352_v34  ;;  %v2429_v25 = vand.u32 31, %v2427_v46  ;;  %v4825_v58 = vshrl.u32 %v2427_v46, 5 }
 0x225   : > { %v2574_v13 = vshrl.u32 %v2573_v30, 23  ;;  %vm2255_vm1 = vcmp.eq.s32.totalorder %v4820_v21, 2  ;;  %v4849_v33 = vand.u32 65535, %v4827_v3  ;;  %vm2252_vm2 = vcmp.eq.s32.totalorder %v4820_v21, 0 }
 0x226   : > { %v2228_v9 = vsel %vm2107_vm11, %v2227_v7, %v2226_v31  ;;  %v2357_v48 = vsel %vm2355_vm0, %v2356_v32, %v2352_v34  ;;  %v4816_v8 = vsub.s32 32, %v2429_v25  ;;  %v2435_v16 = vshll.u32 %v3142_v20, %v2429_v25 }
 0x227   : > { %v4814_v6 = vsel %vm4797_vm14, %v3272_v53, %v2228_v9  ;;  %v2358_v36 = vadd.s32 %v2357_v48, %v2353_v43  ;;  %v2438_v51 = vshll.u32 %v3143_v22, %v2429_v25  ;;  %v2441_v62 = vshll.u32 %v3144_v24, %v2429_v25 }
 0x228   : > { %v2233_v61 = vmul.f32 %v4814_v6, %v4814_v6  ;;  %v2436_v29 = vshrl.u32 %v3143_v22, %v4816_v8  ;;  %v2439_v17 = vshrl.u32 %v3144_v24, %v4816_v8  ;;  %v2442_v50 = vshrl.u32 %v3145_v26, %v4816_v8 }
 0x229   : > { %v2359_v41 = vadd.s32 536870912, %v2358_v36  ;;  %v2432_v47 = vshll.u32 %v3141_v18, %v2429_v25  ;;  %v2433_v42 = vshrl.u32 %v3142_v20, %v4816_v8  ;;  %v2444_v2 = vshll.u32 %v3145_v26, %v2429_v25 }
 0x22a   : > { %v2234_v23 = vmul.f32 -0.001358992, %v2233_v61  ;;  %v2241_v15 = vmul.f32 -0.00019511016, %v2233_v61  ;;  %v2445_v63 = vshrl.u32 %v3146_v35, %v4816_v8  ;;  %v4852_v0 = vor.u32 %v2436_v29, %v2435_v16 }
 0x22b   : > { %v4836_v37 = vshrl.u32 %v2359_v41, 30  ;;  %v2440_v39 = vor.u32 %v2439_v17, %v2438_v51  ;;  %v2443_v60 = vor.u32 %v2442_v50, %v2441_v62  ;;  %vm2251_vm3 = vcmp.lt.s32.totalorder %v4820_v21, 2 }
 0x22c   : > { %v2235_v12 = vadd.f32 0.041655596, %v2234_v23  ;;  %v2242_v1 = vadd.f32 0.008332121, %v2241_v15  ;;  %v2446_v45 = vor.u32 %v2445_v63, %v2444_v2  ;;  %vm2447_vm4 = vcmp.lt.s32.totalorder %v4825_v58, 1 }
 0x22d   : > { %v2361_v5 = vshll.u32 %v4836_v37, 30  ;;  %vm2248_vm5 = vweird.f32 %v3272_v53  ;;  %v2434_v52 = vor.u32 %v2433_v42, %v2432_v47  ;;  %vm2449_vm6 = vcmp.lt.s32.totalorder %v4825_v58, 3 }
 0x22e   : > { %v2236_v59 = vmul.f32 %v2235_v12, %v2233_v61  ;;  %v2243_v40 = vmul.f32 %v2242_v1, %v2233_v61  ;;  %vm2450_vm7 = vcmp.lt.s32.totalorder %v4825_v58, 4  ;;  %v2897_v28 = vadd.s32 4294967169, %v2574_v13 }
 0x22f   : > { %v4855_v57 = vsub.s32 %v2358_v36, %v2361_v5  ;;  %vm2262_vm9 = vcmp.lt.s32.totalorder %v3274_v54, 0  ;;  %vm2448_vm10 = vcmp.lt.s32.totalorder %v4825_v58, 2  ;;  %v2456_v7 = vsel %vm2450_vm7, %v2443_v60, 920167782 }
 0x230   : > { %v2237_v49 = vadd.f32 -0.4999988, %v2236_v59  ;;  %v2244_v10 = vadd.f32 -0.16666654, %v2243_v40  ;;  %v2459_v38 = vsel %vm2447_vm4, %v4852_v0, %v2440_v39  ;;  %v2460_v46 = vsel %vm2450_vm7, %v2446_v45, 1326507024 }
 0x231   : > { %vm2363_vm8 = vcmp.lt.s32.totalorder %v4855_v57, 0  ;;  %v2364_v43 = vsub.s32 0, %v4855_v57  ;;  %v2465_v30 = vshrl.u32 %v4827_v3, 16  ;;  %v2455_v48 = vsel %vm2447_vm4, %v2434_v52, %v4852_v0 }
 0x232   : > { %v2238_v31 = vmul.f32 %v2237_v49, %v2233_v61  ;;  %v2245_v34 = vmul.f32 %v2244_v10, %v2233_v61  ;;  %v2461_v61 = vsel %vm2449_vm6, %v2443_v60, %v2460_v46  ;;  %v4879_v36 = vadd.s32 1, %v2897_v28 }
 0x233   : > { %v2365_v25 = vsel %vm2363_vm8, %v2364_v43, %v4855_v57  ;;  %v2457_v15 = vsel %vm2449_vm6, %v2440_v39, %v2456_v7  ;;  %v2462_v41 = vsel %vm2448_vm10, %v2459_v38, %v2461_v61  ;;  %v4888_v17 = vand.u32 8388607, %v2570_v4 }
 0x234   : > { %v2239_v32 = vadd.f32 1.0, %v2238_v31  ;;  %v2246_v14 = vadd.f32 1.0, %v2245_v34  ;;  %v2366_v9 = vclz %v2365_v25  ;;  %v2466_v29 = vand.u32 65535, %v2462_v41 }
 0x235   : > { %v2467_v51 = vshrl.u32 %v2462_v41, 16  ;;  %v2431_v1 = vshrl.u32 %v3141_v18, %v4816_v8  ;;  %v2452_v50 = vsel %vm2450_vm7, %v2440_v39, 2102212464  ;;  %v2458_v47 = vsel %vm2448_vm10, %v2455_v48, %v2457_v15 }
 0x236   : > { %v2247_v13 = vmul.f32 %v2246_v14, %v4814_v6  ;;  %v2256_v23 = vxor.u32 2147483648, %v2239_v32  ;;  %v2892_v16 = vadd.s32 4294967294, %v2366_v9  ;;  %v2384_v6 = vsub.s32 4, %v4836_v37 }
 0x237   : > { %v2469_v42 = vmul.u32 %v2467_v51, %v4849_v33  ;;  %vm2581_vm12 = vcmp.gt.s32.totalorder %v4879_v36, 0  ;;  %vm4905_vm13 = vcmp.le.f32.partialorder %v2260_v19, 0.7853982  ;;  %v2468_v59 = vmul.u32 %v2466_v29, %v4849_v33 }
 0x238   : > { %v2253_v62 = vxor.u32 2147483648, %v2247_v13  ;;  %v2257_v12 = vsel %vm2255_vm1, %v2256_v23, %v2247_v13  ;;  %vm2893_vm11 = vcmp.lt.s32.totalorder %v2892_v16, 0  ;;  %v2470_v40 = vmul.u32 %v2466_v29, %v2465_v30 }
 0x239   : > { %v2369_v8 = vsel %vm2893_vm11, 0, %v2892_v16  ;;  %v2385_v19 = vsel %vm2262_vm9, %v2384_v6, %v4836_v37  ;;  %v2488_v10 = vand.u32 65535, %v2458_v47  ;;  %v2489_v28 = vshrl.u32 %v2458_v47, 16 }
 0x23a   : > { %v2254_v2 = vsel %vm2252_vm2, %v2239_v32, %v2253_v62  ;;  %v2370_v39 = vsub.s32 32, %v2369_v8  ;;  %v2371_v60 = vshll.u32 %v4855_v57, %v2369_v8  ;;  %v2374_v45 = vsub.s32 4294967266, %v2369_v8 }
 0x23b   : > { %v2258_v5 = vsel %vm2251_vm3, %v2254_v2, %v2257_v12  ;;  %v2471_v43 = vmul.u32 %v2467_v51, %v2465_v30  ;;  %v2472_v7 = vshll.u32 %v2469_v42, 16  ;;  %v2451_v21 = vsel %vm2447_vm4, %v2431_v1, %v2434_v52 }
 0x23c   : > { %v2259_v49 = vsel %vm2248_vm5, nan, %v2258_v5  ;;  %v2372_v31 = vshrl.u32 %v4823_v44, %v2370_v39  ;;  %v2375_v34 = vadd.s32 127, %v2374_v45  ;;  %v2453_v53 = vsel %vm2449_vm6, %v4852_v0, %v2452_v50 }
 0x23d   : > { %2737 = vst [vmem:[%s3579_s15 + $0x60] sm:$0xff] %v2259_v49  ;;  %v2473_v57 = vshrl.u32 %v2469_v42, 16  ;;  %v2474_v38 = vshll.u32 %v2470_v40, 16  ;;  %vm2476_vm14 = vc.u32 %v2468_v59, %v2472_v7  ;;  %v2478_v37 = vadd.s32 %v2472_v7, %v2468_v59 }
 0x23e   : > { %v2373_v46 = vor.u32 %v2372_v31, %v2371_v60  ;;  %v2376_v32 = vshll.u32 %v2375_v34, 23  ;;  %v2477_v14 = vsel %vm2476_vm14, 1, %v3147_v11  ;;  %v2490_v44 = vmul.u32 %v2488_v10, %v4849_v33 }
 0x23f   : > { %v2491_v25 = vmul.u32 %v2489_v28, %v4849_v33  ;;  %v2492_v9 = vmul.u32 %v2488_v10, %v2465_v30  ;;  %v2479_v52 = vadd.s32 %v2477_v14, %v2471_v43  ;;  %vm2480_vm15 = vc.u32 %v2478_v37, %v2474_v38 }
 0x240   : > { %v2377_v48 = vor.u32 4788187, %v2376_v32  ;;  %v2380_v61 = vcvt.s32.f32 %v2373_v46  ;;  %v2481_v13 = vsel %vm2480_vm15, 1, %v3147_v11  ;;  %v2493_v0 = vmul.u32 %v2489_v28, %v2465_v30 }
 0x241   : > { %v2494_v23 = vshll.u32 %v2491_v25, 16  ;;  %v2496_v15 = vshll.u32 %v2492_v9, 16  ;;  %v2387_v16 = vsel %vm4905_vm13, 0, %v2385_v19  ;;  %v2483_v29 = vadd.s32 %v2481_v13, %v2479_v52 }
 0x242   : > { %v2378_v41 = vand.u32 2147483647, %v2377_v48  ;;  %v2578_v51 = vor.u32 8388608, %v4888_v17  ;;  %v2454_v33 = vsel %vm2448_vm10, %v2451_v21, %v2453_v53  ;;  %v2582_v12 = vsel %vm2581_vm12, %v4879_v36, 0 }
 0x243   : > { %vm2498_vm0 = vc.u32 %v2490_v44, %v2494_v23  ;;  %v2500_v62 = vadd.s32 %v2494_v23, %v2490_v44  ;;  %v2475_v30 = vshrl.u32 %v2470_v40, 16  ;;  %v2484_v1 = vadd.s32 %v2483_v29, %v2473_v57 }
 0x244   : > { %v2381_v6 = vmul.f32 %v2380_v61, %v2378_v41  ;;  %v2499_v50 = vsel %vm2498_vm0, 1, %v3147_v11  ;;  %v2495_v47 = vshrl.u32 %v2491_v25, 16  ;;  %v2584_v2 = vand.u32 31, %v2582_v12 }
 0x245   : > { %v2501_v42 = vadd.s32 %v2499_v50, %v2493_v0  ;;  %vm2502_vm1 = vc.u32 %v2500_v62, %v2496_v15  ;;  %v2404_v17 = vadd.s32 3, %v2387_v16  ;;  %v2497_v59 = vshrl.u32 %v2492_v9, 16 }
 0x246   : > { %v2382_v8 = vxor.u32 2147483648, %v2381_v6  ;;  %v2503_v58 = vsel %vm2502_vm1, 1, %v3147_v11  ;;  %v2508_v39 = vmul.u32 %v4827_v3, %v2454_v33  ;;  %v4940_v60 = vshrl.u32 %v2582_v12, 5 }
 0x247   : > { %v2505_v5 = vadd.s32 %v2503_v58, %v2501_v42  ;;  %v4942_v36 = vsub.s32 32, %v2584_v2  ;;  %v4946_v45 = vadd.s32 %v2484_v1, %v2475_v30  ;;  %v4948_v49 = vadd.s32 %v2500_v62, %v2496_v15 }
 0x248   : > { %v2383_v40 = vsel %vm2262_vm9, %v2382_v8, %v2381_v6  ;;  %v2587_v19 = vshll.u32 %v3141_v18, %v2584_v2  ;;  %v2590_v31 = vshll.u32 %v3142_v20, %v2584_v2  ;;  %v2593_v7 = vshll.u32 %v3143_v22, %v2584_v2 }
 0x249   : > { %v2386_v10 = vsel %vm4905_vm13, %v3274_v54, %v2383_v40  ;;  %v2506_v28 = vadd.s32 %v2505_v5, %v2495_v47  ;;  %v2588_v3 = vshrl.u32 %v3142_v20, %v4942_v36  ;;  %v2591_v43 = vshrl.u32 %v3143_v22, %v4942_v36 }
 0x24a   : > { %v2388_v34 = vmul.f32 %v2386_v10, %v2386_v10  ;;  %v2596_v21 = vshll.u32 %v3144_v24, %v2584_v2  ;;  %v2594_v57 = vshrl.u32 %v3144_v24, %v4942_v36  ;;  %v2597_v63 = vshrl.u32 %v3145_v26, %v4942_v36 }
 0x24b   : > { %v2507_v53 = vadd.s32 %v2506_v28, %v2497_v59  ;;  %v2599_v38 = vshll.u32 %v3145_v26, %v2584_v2  ;;  %vm2510_vm2 = vc.u32 %v4946_v45, %v4948_v49  ;;  %v4968_v20 = vor.u32 %v2588_v3, %v2587_v19 }
 0x24c   : > { %v2389_v46 = vmul.f32 -0.001358992, %v2388_v34  ;;  %v2396_v32 = vmul.f32 -0.00019511016, %v2388_v34  ;;  %v4970_v22 = vor.u32 %v2591_v43, %v2590_v31  ;;  %v2598_v14 = vor.u32 %v2597_v63, %v2596_v21 }
 0x24d   : > { %v2511_v37 = vadd.s32 1, %v2507_v53  ;;  %v2600_v44 = vshrl.u32 %v3146_v35, %v4942_v36  ;;  %vm2602_vm3 = vcmp.lt.s32.totalorder %v4940_v60, 1  ;;  %vm2605_vm4 = vcmp.lt.s32.totalorder %v4940_v60, 4 }
 0x24e   : > { %v2390_v24 = vadd.f32 0.041655596, %v2389_v46  ;;  %v2397_v25 = vadd.f32 0.008332121, %v2396_v32  ;;  %v4976_v9 = vor.u32 %v2594_v57, %v2593_v7  ;;  %v4978_v61 = vshll.u32 %v2578_v51, 8 }
 0x24f   : > { %v2512_v26 = vsel %vm2510_vm2, %v2511_v37, %v2507_v53  ;;  %v2601_v48 = vor.u32 %v2600_v44, %v2599_v38  ;;  %vm2604_vm5 = vcmp.lt.s32.totalorder %v4940_v60, 3  ;;  %vm2603_vm6 = vcmp.lt.s32.totalorder %v4940_v60, 2 }
 0x250   : > { %v2391_v52 = vmul.f32 %v2390_v24, %v2388_v34  ;;  %v2398_v13 = vmul.f32 %v2397_v25, %v2388_v34  ;;  %v2513_v0 = vadd.s32 %v2512_v26, %v2508_v39  ;;  %v2610_v35 = vsel %vm2602_vm3, %v4968_v20, %v4970_v22 }
 0x251   : > { %v2611_v23 = vsel %vm2605_vm4, %v2598_v14, 920167782  ;;  %v2405_v16 = vand.u32 3, %v2404_v17  ;;  %v2614_v33 = vsel %vm2602_vm3, %v4970_v22, %v4976_v9  ;;  %v2615_v62 = vsel %vm2605_vm4, %v2601_v48, 1326507024 }
 0x252   : > { %v2392_v15 = vadd.f32 -0.4999988, %v2391_v52  ;;  %v2399_v41 = vadd.f32 -0.16666654, %v2398_v13  ;;  %v2514_v29 = vadd.s32 536870912, %v2513_v0  ;;  %v2612_v51 = vsel %vm2604_vm5, %v4976_v9, %v2611_v23 }
 0x253   : > { %v2619_v12 = vand.u32 65535, %v4978_v61  ;;  %v2613_v50 = vsel %vm2603_vm6, %v2610_v35, %v2612_v51  ;;  %v2616_v47 = vsel %vm2604_vm5, %v2598_v14, %v2615_v62  ;;  %vm2403_vm7 = vweird.f32 %v3274_v54 }
 0x254   : > { %v2393_v6 = vmul.f32 %v2392_v15, %v2388_v34  ;;  %v2400_v30 = vmul.f32 %v2399_v41, %v2388_v34  ;;  %v4998_v1 = vshrl.u32 %v2514_v29, 30  ;;  %v2644_v42 = vshrl.u32 %v2613_v50, 16 }
 0x255   : > { %vm2410_vm8 = vcmp.eq.s32.totalorder %v2405_v16, 2  ;;  %v2617_v59 = vsel %vm2603_vm6, %v2614_v33, %v2616_v47  ;;  %v2620_v58 = vshrl.u32 %v4978_v61, 16  ;;  %v2643_v5 = vand.u32 65535, %v2613_v50 }
 0x256   : > { %v2394_v2 = vadd.f32 1.0, %v2393_v6  ;;  %v2401_v8 = vadd.f32 1.0, %v2400_v30  ;;  %v2516_v17 = vshll.u32 %v4998_v1, 30  ;;  %v5009_v28 = vmul.u32 %v2644_v42, %v2619_v12 }
 0x257   : > { %vm2406_vm9 = vcmp.lt.s32.totalorder %v2405_v16, 2  ;;  %vm2407_vm10 = vcmp.eq.s32.totalorder %v2405_v16, 0  ;;  %v2621_v3 = vand.u32 65535, %v2617_v59  ;;  %v2622_v31 = vshrl.u32 %v2617_v59, 16 }
 0x258   : > { %v2402_v39 = vmul.f32 %v2401_v8, %v2386_v10  ;;  %v2411_v40 = vxor.u32 2147483648, %v2394_v2  ;;  %v2517_v19 = vsub.s32 %v2513_v0, %v2516_v17  ;;  %v2645_v63 = vmul.u32 %v2643_v5, %v2619_v12 }
 0x259   : > { %v2623_v21 = vmul.u32 %v2621_v3, %v2619_v12  ;;  %v2624_v53 = vmul.u32 %v2622_v31, %v2619_v12  ;;  %v2625_v57 = vmul.u32 %v2621_v3, %v2620_v58  ;;  %v2647_v10 = vmul.u32 %v2643_v5, %v2620_v58 }
 0x25a   : > { %v2408_v34 = vxor.u32 2147483648, %v2402_v39  ;;  %v2412_v43 = vsel %vm2410_vm8, %v2411_v40, %v2402_v39  ;;  %vm2518_vm11 = vcmp.lt.s32.totalorder %v2517_v19, 0  ;;  %v2519_v7 = vsub.s32 0, %v2517_v19 }
 0x25b   : > { %v2649_v32 = vshll.u32 %v5009_v28, 16  ;;  %v2626_v44 = vmul.u32 %v2622_v31, %v2620_v58  ;;  %v2627_v24 = vshll.u32 %v2624_v53, 16  ;;  %v2509_v26 = vadd.s32 %v4948_v49, %v4946_v45 }
 0x25c   : > { %v2409_v38 = vsel %vm2407_vm10, %v2394_v2, %v2408_v34  ;;  %v2520_v46 = vsel %vm2518_vm11, %v2519_v7, %v2517_v19  ;;  %v2586_v48 = vshrl.u32 %v3141_v18, %v4942_v36  ;;  %v2629_v52 = vshll.u32 %v2625_v57, 16 }
 0x25d   : > { %v2413_v37 = vsel %vm2406_vm9, %v2409_v38, %v2412_v43  ;;  %v2521_v14 = vclz %v2520_v46  ;;  %vm2631_vm12 = vc.u32 %v2623_v21, %v2627_v24  ;;  %v2633_v0 = vadd.s32 %v2627_v24, %v2623_v21 }
 0x25e   : > { %v2414_v25 = vsel %vm2403_vm7, nan, %v2413_v37  ;;  %v2648_v35 = vmul.u32 %v2644_v42, %v2620_v58  ;;  %v2628_v23 = vshrl.u32 %v2624_v53, 16  ;;  %v2632_v15 = vsel %vm2631_vm12, 1, %v3147_v11 }
 0x25f   : > { %v2895_v13 = vadd.s32 4294967294, %v2521_v14  ;;  %2738 = vst [vmem:[%s3579_s15 + $0x68] sm:$0xff] %v2414_v25  ;;  %v2651_v41 = vshll.u32 %v2647_v10, 16  ;;  %vm2653_vm13 = vc.u32 %v2645_v63, %v2649_v32  ;;  %v2634_v54 = vadd.s32 %v2632_v15, %v2626_v44 }
 0x260   : > { %vm2635_vm15 = vc.u32 %v2633_v0, %v2629_v52  ;;  %v2655_v16 = vadd.s32 %v2649_v32, %v2645_v63  ;;  %v2607_v18 = vsel %vm2605_vm4, %v4976_v9, 2102212464  ;;  %v2654_v45 = vsel %vm2653_vm13, 1, %v3147_v11 }
 0x261   : > { %vm2896_vm14 = vcmp.lt.s32.totalorder %v2895_v13, 0  ;;  %v2636_v36 = vsel %vm2635_vm15, 1, %v3147_v11  ;;  %v2630_v12 = vshrl.u32 %v2625_v57, 16  ;;  %v2650_v6 = vshrl.u32 %v5009_v28, 16 }
 0x262   : > { %v2524_v29 = vsel %vm2896_vm14, 0, %v2895_v13  ;;  %v2638_v62 = vadd.s32 %v2636_v36, %v2634_v54  ;;  %v2656_v30 = vadd.s32 %v2654_v45, %v2648_v35  ;;  %vm2657_vm0 = vc.u32 %v2655_v16, %v2651_v41 }
 0x263   : > { %v2525_v49 = vsub.s32 32, %v2524_v29  ;;  %v2526_v51 = vshll.u32 %v2517_v19, %v2524_v29  ;;  %v2529_v33 = vsub.s32 4294967266, %v2524_v29  ;;  %v2606_v9 = vsel %vm2602_vm3, %v2586_v48, %v4968_v20 }
 0x264   : > { %v2639_v42 = vadd.s32 %v2638_v62, %v2628_v23  ;;  %v2608_v2 = vsel %vm2604_vm5, %v4970_v22, %v2607_v18  ;;  %v2658_v8 = vsel %vm2657_vm0, 1, %v3147_v11  ;;  %v2652_v58 = vshrl.u32 %v2647_v10, 16 }
 0x265   : > { %v2527_v50 = vshrl.u32 %v2509_v26, %v2525_v49  ;;  %v2530_v47 = vadd.s32 127, %v2529_v33  ;;  %v2660_v5 = vadd.s32 %v2658_v8, %v2656_v30  ;;  %v2659_v40 = vadd.s32 %v2655_v16, %v2651_v41 }
 0x266   : > { %v2640_v39 = vadd.s32 %v2639_v42, %v2630_v12  ;;  %v2609_v3 = vsel %vm2603_vm6, %v2606_v9, %v2608_v2  ;;  %vm2417_vm2 = vcmp.lt.s32.totalorder %v3276_v55, 0  ;;  %v2539_v11 = vsub.s32 4, %v4998_v1 }
 0x267   : > { %v2528_v17 = vor.u32 %v2527_v50, %v2526_v51  ;;  %v2531_v59 = vshll.u32 %v2530_v47, 23  ;;  %v2661_v31 = vadd.s32 %v2660_v5, %v2650_v6  ;;  %v2663_v43 = vmul.u32 %v4978_v61, %v2609_v3 }
 0x268   : > { %vm2665_vm1 = vc.u32 %v2640_v39, %v2659_v40  ;;  %vm5041_vm3 = vcmp.le.f32.partialorder %v2415_v27, 0.7853982  ;;  %v2540_v38 = vsel %vm2417_vm2, %v2539_v11, %v4998_v1  ;;  %v2664_v51 = vadd.s32 %v2659_v40, %v2640_v39 }
 0x269   : > { %v2532_v19 = vor.u32 4788187, %v2531_v59  ;;  %v2535_v28 = vcvt.s32.f32 %v2528_v17  ;;  %v2662_v20 = vadd.s32 %v2661_v31, %v2652_v58  ;;  %v2542_v37 = vsel %vm5041_vm3, 0, %v2540_v38 }
 0x26a   : > { %v2559_v26 = vadd.s32 3, %v2542_v37  ;;  %vm2558_vm9 = vweird.f32 %v3276_v55  ;;  %vm2572_vm10 = vcmp.lt.s32.totalorder %v3278_v56, 0  ;;  %vm2571_vm11 = vcmp.le.f32.partialorder %v2570_v4, 0.7853982 }
 0x26b   : > { %v2533_v34 = vand.u32 2147483647, %v2532_v19  ;;  %v2666_v7 = vadd.s32 1, %v2662_v20  ;;  %vm2713_vm15 = vweird.f32 %v3278_v56 }
 0x26c   : > { %v2560_v23 = vand.u32 3, %v2559_v26 }
 0x26d   : > { %v2536_v22 = vmul.f32 %v2535_v28, %v2533_v34  ;;  %v2667_v53 = vsel %vm2665_vm1, %v2666_v7, %v2662_v20 }
 0x26e   : > { %v2668_v57 = vadd.s32 %v2667_v53, %v2663_v43  ;;  %vm2565_vm5 = vcmp.eq.s32.totalorder %v2560_v23, 2  ;;  %vm2561_vm7 = vcmp.lt.s32.totalorder %v2560_v23, 2  ;;  %vm2562_vm8 = vcmp.eq.s32.totalorder %v2560_v23, 0 }
 0x26f   : > { %v2537_v60 = vxor.u32 2147483648, %v2536_v22 }
 0x270   : > { %v2669_v46 = vadd.s32 536870912, %v2668_v57 }
 0x271   : > { %v2538_v63 = vsel %vm2417_vm2, %v2537_v60, %v2536_v22 }
 0x272   : > { %v2541_v61 = vsel %vm5041_vm3, %v3276_v55, %v2538_v63  ;;  %v2670_v32 = vshrl.u32 %v2669_v46, 30 }
 0x273   : > { %v2543_v10 = vmul.f32 %v2541_v61, %v2541_v61 }
 0x274   : > { %v2671_v44 = vshll.u32 %v2670_v32, 30  ;;  %v2694_v19 = vsub.s32 4, %v2670_v32 }
 0x275   : > { %v2544_v27 = vmul.f32 -0.001358992, %v2543_v10  ;;  %v2551_v14 = vmul.f32 -0.00019511016, %v2543_v10 }
 0x276   : > { %v2672_v48 = vsub.s32 %v2668_v57, %v2671_v44  ;;  %v2695_v3 = vsel %vm2572_vm10, %v2694_v19, %v2670_v32 }
 0x277   : > { %v2545_v24 = vadd.f32 0.041655596, %v2544_v27  ;;  %v2552_v25 = vadd.f32 0.008332121, %v2551_v14  ;;  %v2697_v20 = vsel %vm2571_vm11, 0, %v2695_v3 }
 0x278   : > { %vm2673_vm4 = vcmp.lt.s32.totalorder %v2672_v48, 0  ;;  %v2674_v1 = vsub.s32 0, %v2672_v48  ;;  %v2714_v21 = vadd.s32 3, %v2697_v20 }
 0x279   : > { %v2546_v52 = vmul.f32 %v2545_v24, %v2543_v10  ;;  %v2553_v13 = vmul.f32 %v2552_v25, %v2543_v10 }
 0x27a   : > { %v2675_v15 = vsel %vm2673_vm4, %v2674_v1, %v2672_v48  ;;  %v2715_v38 = vand.u32 3, %v2714_v21 }
 0x27b   : > { %v2547_v0 = vadd.f32 -0.4999988, %v2546_v52  ;;  %v2554_v35 = vadd.f32 -0.16666654, %v2553_v13  ;;  %v2676_v16 = vclz %v2675_v15 }
 0x27c   : > { %vm2720_vm12 = vcmp.eq.s32.totalorder %v2715_v38, 2  ;;  %vm2717_vm13 = vcmp.eq.s32.totalorder %v2715_v38, 0  ;;  %vm2716_vm14 = vcmp.lt.s32.totalorder %v2715_v38, 2 }
 0x27d   : > { %v2548_v41 = vmul.f32 %v2547_v0, %v2543_v10  ;;  %v2555_v54 = vmul.f32 %v2554_v35, %v2543_v10  ;;  %v2898_v36 = vadd.s32 4294967294, %v2676_v16 }
 0x27f   : > { %v2549_v29 = vadd.f32 1.0, %v2548_v41  ;;  %v2556_v18 = vadd.f32 1.0, %v2555_v54  ;;  %vm2899_vm6 = vcmp.lt.s32.totalorder %v2898_v36, 0 }
 0x280   : > { %v2679_v33 = vsel %vm2899_vm6, 0, %v2898_v36 }
 0x281   : > { %v2557_v45 = vmul.f32 %v2556_v18, %v2541_v61  ;;  %v2566_v49 = vxor.u32 2147483648, %v2549_v29  ;;  %v2680_v6 = vsub.s32 32, %v2679_v33  ;;  %v2681_v30 = vshll.u32 %v2672_v48, %v2679_v33 }
 0x282   : > { %v2684_v50 = vsub.s32 4294967266, %v2679_v33 }
 0x283   : > { %v2563_v62 = vxor.u32 2147483648, %v2557_v45  ;;  %v2567_v12 = vsel %vm2565_vm5, %v2566_v49, %v2557_v45  ;;  %v2682_v42 = vshrl.u32 %v2664_v51, %v2680_v6 }
 0x284   : > { %v2685_v2 = vadd.s32 127, %v2684_v50 }
 0x285   : > { %v2564_v47 = vsel %vm2562_vm8, %v2549_v29, %v2563_v62  ;;  %v2683_v17 = vor.u32 %v2682_v42, %v2681_v30 }
 0x286   : > { %v2568_v9 = vsel %vm2561_vm7, %v2564_v47, %v2567_v12  ;;  %v2686_v59 = vshll.u32 %v2685_v2, 23 }
 0x287   : > { %v2569_v8 = vsel %vm2558_vm9, nan, %v2568_v9  ;;  %v2690_v5 = vcvt.s32.f32 %v2683_v17 }
 0x288   : > { %2739 = vst [vmem:[%s3579_s15 + $0x70] sm:$0xff] %v2569_v8  ;;  %v2687_v58 = vor.u32 4788187, %v2686_v59 }
 0x28a   : > { %v2688_v39 = vand.u32 2147483647, %v2687_v58 }
 0x28c   : > { %v2691_v40 = vmul.f32 %v2690_v5, %v2688_v39 }
 0x28e   : > { %v2692_v55 = vxor.u32 2147483648, %v2691_v40 }
 0x290   : > { %v2693_v28 = vsel %vm2572_vm10, %v2692_v55, %v2691_v40 }
 0x291   : > { %v2696_v31 = vsel %vm2571_vm11, %v3278_v56, %v2693_v28 }
 0x292   : > { %v2698_v34 = vmul.f32 %v2696_v31, %v2696_v31 }
 0x294   : > { %v2699_v43 = vmul.f32 -0.001358992, %v2698_v34  ;;  %v2706_v22 = vmul.f32 -0.00019511016, %v2698_v34 }
 0x296   : > { %v2700_v7 = vadd.f32 0.041655596, %v2699_v43  ;;  %v2707_v11 = vadd.f32 0.008332121, %v2706_v22 }
 0x298   : > { %v2701_v60 = vmul.f32 %v2700_v7, %v2698_v34  ;;  %v2708_v53 = vmul.f32 %v2707_v11, %v2698_v34 }
 0x29a   : > { %v2702_v57 = vadd.f32 -0.4999988, %v2701_v60  ;;  %v2709_v63 = vadd.f32 -0.16666654, %v2708_v53 }
 0x29c   : > { %v2703_v4 = vmul.f32 %v2702_v57, %v2698_v34  ;;  %v2710_v61 = vmul.f32 %v2709_v63, %v2698_v34 }
 0x29e   : > { %v2704_v46 = vadd.f32 1.0, %v2703_v4  ;;  %v2711_v10 = vadd.f32 1.0, %v2710_v61 }
 0x2a0   : > { %v2712_v32 = vmul.f32 %v2711_v10, %v2696_v31  ;;  %v2721_v37 = vxor.u32 2147483648, %v2704_v46 }
 0x2a2   : > { %v2718_v27 = vxor.u32 2147483648, %v2712_v32  ;;  %v2722_v14 = vsel %vm2720_vm12, %v2721_v37, %v2712_v32 }
 0x2a4   : > { %v2719_v44 = vsel %vm2717_vm13, %v2704_v46, %v2718_v27 }
 0x2a5   : > { %v2723_v24 = vsel %vm2716_vm14, %v2719_v44, %v2722_v14 }
 0x2a6   : > { %v2724_v25 = vsel %vm2713_vm15, nan, %v2723_v24 }
 0x2a7   : > { %2740 = vst [vmem:[%s3579_s15 + $0x78] sm:$0xff] %v2724_v25 }
 0x2a8   : > { %3078 = shalt.err (!%p3075_p7)
}
 0x2a9   : > { %s3148_s5 = smov 1024   ;;  %s3149_s6 = smov 64  }
 0x2aa   : > { %2914 = dma.vmem_to_hbm [thread:$0]  (%p3205_p4), %s2758_s24, 2048, %s2760_s25, %s2742_s12, %s3148_s5, %s3148_s5, %s3149_s6  }
 0x2ab PF: > { %p2931_p9 = scmp.ge.s32.totalorder %s3137_s14, 2  ;;  %s2774_s7 = sand.u32 1, %s3117_s9  }
 0x2ac   : > { %s2775_s8 = scalar_lea.sflag [#allocation4], %s2774_s7 }
 0x2ad   : > { %p2924_p10 = pnand %p2931_p9, %p3212_p8 }
 0x2af   : > { %p2925_p11 = pneg %p2924_p10 }
 0x2b1   : > { %3112 = dma.done.wait (%p2925_p11), %s2775_s8, 2048  }
 0x2b2   : > { %3114 = vsyncadd (%p2925_p11), %s2775_s8, 4294965248  ;;  %s17_s14 = sadd.s32 1, %s3137_s14   ;;  %s5135_s9 = smov %s3121_s10 }
 0x2b3   : > { %p14_p12 = scmp.ge.s32.totalorder %s17_s14, 4   ;;  %s5136_s10 = smov %s3125_s11 }
 0x2b4   : > { %s5137_s11 = smov %s3218_s22  ;;  %s5138_s12 = smov %s3133_s13 }
 0x2b5   : > { %s5139_s13 = smov %s5141_s17  ;;  %16 = sbr.rel (!%p14_p12) target bundleno = 6 (0x6), region = 69 }
 0x2ba   :  { %2781 = vsyncpa [#allocation3], 1 }
 0x2bb   :  { %2783 = vsyncpa [#allocation3 + $0x1], 1 }
 0x2bc   :  { %2784 = vsyncpa [#allocation6], 1 }
 0x2bd   :  { %2785 = vsyncpa [#allocation4], 1 }
 0x2be   :  { %2787 = vsyncpa [#allocation4 + $0x1], 1 }

</bundles_post_ra>
